<compile_context>
chip_gen: v6e
topology: v6e:2x2x1
jax: 0.10.0
libtpu: 0.0.40
codegen_flags: <defaults>
</compile_context>

<pallas_src>
import functools
import re

import jax
import jax.numpy as jnp
import numpy as np
from jax.experimental import pallas as pl
from jax.experimental.pallas import tpu as pltpu


# ----------------------------------------------------------------------------
# Pallas kernel: batched log-domain Sinkhorn (cost matrix + iterations + cost)
# ----------------------------------------------------------------------------
def _sinkhorn_kernel(freqs_ref, amps_ref, spec_ref, binf_ref, cost_ref,
                     *, epsilon, niter, use_bf16):
    clamp_eps = 1e-9
    freqs = freqs_ref[...]                          # (Bt, A)
    amps = amps_ref[...]                            # (Bt, A)
    spec = spec_ref[...]                            # (Bt, F)
    binf = binf_ref[...]                            # (1, F)

    Bt, A = freqs.shape
    F = spec.shape[-1]
    inv_eps = 1.0 / epsilon
    summand_dtype = jnp.bfloat16 if use_bf16 else jnp.float32
    # Constant ones matrix: lane-axis sums become an MXU matmul (MXU is
    # otherwise idle in this kernel); 128 columns keeps the result lane-dense.
    ones_cols = jnp.ones((F, 128), dtype=summand_dtype)

    def _lane_sum(x3d):
        # sum over the 128-lane (spectral-bin) axis on the MXU.
        # Reshape BEFORE the bf16 cast: (Bt, A, F)->(Bt*A, F) is layout-trivial
        # in f32 (A is a multiple of 8); only the 2-D operand is narrowed.
        x2d = x3d.reshape(Bt * A, F).astype(summand_dtype)
        s = jnp.dot(x2d, ones_cols, preferred_element_type=jnp.float32)
        return s[:, 0:1].reshape(Bt, A, 1)          # (Bt, A, 1) f32

    def _log_normalized(x):
        # log(normalize(x)) without the vector divide: log(x+eps) - log(sum)
        x = jnp.clip(x, 0.0, 1e9) + clamp_eps
        return jnp.log(x) - jnp.log(jnp.sum(x, axis=-1, keepdims=True))

    mu = _log_normalized(amps)[:, :, None]          # (Bt, A, 1)
    nu = _log_normalized(spec)[:, None, :]          # (Bt, 1, F)

    def _neg_cost_scaled():
        # negC_s[b,i,j] = -|freqs[b,i] - bin_freqs[j]| / epsilon
        return jnp.abs(freqs[:, :, None] - binf[:, None, :]) * (-inv_eps)

    # Carry M = (-C + u + v) / eps directly (u = v = 0 initially -> M = negC_s).
    # negC_s is NOT kept live across iterations; it is recomputed for the cost.
    M = _neg_cost_scaled()

    def _u_update(M):
        # logsumexp over the lane (spectral-bin) axis; sum on the MXU
        m1 = jnp.max(M, axis=2, keepdims=True)                      # (Bt, A, 1)
        lse1 = jnp.log(_lane_sum(jnp.exp(M - m1))) + m1             # (Bt, A, 1)
        return M + (mu - lse1)                                      # apply du/eps

    def _iteration(_, M):
        M = _u_update(M)
        # v update: logsumexp over the sublane (oscillator) axis (small, VPU/XLU)
        m2 = jnp.max(M, axis=1, keepdims=True)                      # (Bt, 1, F)
        s2 = jnp.sum(jnp.exp(M - m2), axis=1, keepdims=True)        # (Bt, 1, F)
        return M + (nu - (jnp.log(s2) + m2))                        # apply dv/eps

    if niter == 0:
        pi = jnp.exp(M)
    else:
        if niter > 1:
            # fori_loop bounds live ranges (spill-safety at large block_b on
            # v7x); loop overhead is negligible vs. the full-tensor body.
            M = jax.lax.fori_loop(0, niter - 1, _iteration, M)
        # Peeled last iteration: reuse the final exp pass for the plan.
        M = _u_update(M)
        m2 = jnp.max(M, axis=1, keepdims=True)
        e2 = jnp.exp(M - m2)
        s2 = jnp.sum(e2, axis=1, keepdims=True)
        dv = nu - (jnp.log(s2) + m2)                                # dv/eps
        # pi = exp(M + dv) = e2 * exp(m2 + dv),  m2 + dv = nu - log(s2) <= 0
        pi = e2 * jnp.exp(m2 + dv)

    # cost = sum(pi * C) = -epsilon * sum(pi * negC_s); lane sum on the MXU.
    per_osc = _lane_sum(pi * _neg_cost_scaled())[:, :, 0]           # (Bt, A)
    cost = (-epsilon) * jnp.sum(per_osc, axis=1)                    # (Bt,)
    cost_ref[...] = cost.reshape(1, 1, Bt)


def _round_up(x, m):
    return ((x + m - 1) // m) * m


def _tpu_tuning():
    """Generation-aware tiling / dtype knobs (safe defaults if detection fails)."""
    gen = 0
    try:
        kind = jax.devices()[0].device_kind
        m = re.search(r"(\d+)", kind)
        if m:
            gen = int(m.group(1))
    except Exception:
        gen = 0
    if gen >= 7:
        # 64 MiB physical / 32 MiB scoped VMEM, 2 TensorCores per chip.
        return dict(vmem_budget_bytes=20 << 20, max_block=512,
                    vmem_limit_bytes=32 * 1024 * 1024, min_blocks=2,
                    use_bf16=True)
    if gen == 6:
        return dict(vmem_budget_bytes=48 << 20, max_block=1024,
                    vmem_limit_bytes=64 * 1024 * 1024, min_blocks=1,
                    use_bf16=True)
    if gen == 5:
        # 128 MiB VMEM, but no bf16 VPU/EUP: keep summands f32.
        return dict(vmem_budget_bytes=48 << 20, max_block=1024,
                    vmem_limit_bytes=64 * 1024 * 1024, min_blocks=1,
                    use_bf16=False)
    # unknown / older: conservative
    return dict(vmem_budget_bytes=20 << 20, max_block=512,
                vmem_limit_bytes=32 * 1024 * 1024, min_blocks=1,
                use_bf16=False)


def _choose_block_b(B, A, F, *, vmem_budget_bytes, max_block, min_blocks):
    """Largest row-tile whose live f32 (block_b, A, F) intermediates plus the
    MXU-sum buffer and double-buffered inputs stay inside the VMEM budget,
    with an optional minimum block count (v7x: keep both TensorCores busy)."""
    per_row = (5 * A * F + A * 128) * 4 + 2 * (2 * A + F) * 4
    cap = max(8, min(max_block, (vmem_budget_bytes // per_row) // 8 * 8))
    n_blocks = -(-B // cap)
    if min_blocks > 1 and B >= 8 * min_blocks:
        n_blocks = max(n_blocks, min_blocks)
    return _round_up(-(-B // n_blocks), 8)


def sinkhorn_cost_pallas(output_freqs, output_amps, target_spec, bin_freqs,
                         *, epsilon, niter, block_b=None):
    tune = _tpu_tuning()

    output_freqs = jnp.asarray(output_freqs, jnp.float32)
    output_amps = jnp.asarray(output_amps, jnp.float32)
    target_spec = jnp.asarray(target_spec, jnp.float32)
    bin_freqs = jnp.asarray(bin_freqs, jnp.float32).reshape(-1)

    B, A = output_freqs.shape
    F = target_spec.shape[-1]

    # --- pad oscillator axis to the f32 sublane multiple (8) ----------------
    A_pad = _round_up(max(A, 1), 8)
    if A_pad != A:
        # zero amplitude -> ~1e-9 mass at frequency 0: negligible cost impact
        output_freqs = jnp.pad(output_freqs, ((0, 0), (0, A_pad - A)))
        output_amps = jnp.pad(output_amps, ((0, 0), (0, A_pad - A)))

    # --- pad spectral-bin axis to the lane multiple (128) -------------------
    F_pad = _round_up(max(F, 1), 128)
    if F_pad != F:
        # zero-magnitude bins at a moderately far frequency: they attract only
        # ~1e-9 of the target mass so their cost contribution is negligible.
        pad_freq = bin_freqs[-1] * 2.0 + 1.0
        bin_freqs = jnp.concatenate(
            [bin_freqs, jnp.ones((F_pad - F,), jnp.float32) * pad_freq])
        target_spec = jnp.pad(target_spec, ((0, 0), (0, F_pad - F)))

    # --- choose row tile and pad the batch*frames axis -----------------------
    if block_b is None:
        block_b = _choose_block_b(
            B, A_pad, F_pad,
            vmem_budget_bytes=tune["vmem_budget_bytes"],
            max_block=tune["max_block"],
            min_blocks=tune["min_blocks"])
    block_b = _round_up(max(block_b, 8), 8)
    B_pad = _round_up(max(B, 1), block_b)
    if B_pad != B:
        pad_rows = B_pad - B
        # dummy rows: uniform distributions, freq 0 -> finite cost, discarded
        output_freqs = jnp.pad(output_freqs, ((0, pad_rows), (0, 0)))
        output_amps = jnp.pad(output_amps, ((0, pad_rows), (0, 0)),
                              constant_values=1.0)
        target_spec = jnp.pad(target_spec, ((0, pad_rows), (0, 0)),
                              constant_values=1.0)

    num_blocks = B_pad // block_b
    binf2d = bin_freqs.reshape(1, F_pad)

    kernel = functools.partial(_sinkhorn_kernel, epsilon=epsilon, niter=niter,
                               use_bf16=tune["use_bf16"])
    out = pl.pallas_call(
        kernel,
        out_shape=jax.ShapeDtypeStruct((num_blocks, 1, block_b), jnp.float32),
        grid_spec=pltpu.PrefetchScalarGridSpec(
            num_scalar_prefetch=0,
            grid=(num_blocks,),
            in_specs=[
                pl.BlockSpec((block_b, A_pad), lambda i: (i, 0)),
                pl.BlockSpec((block_b, A_pad), lambda i: (i, 0)),
                pl.BlockSpec((block_b, F_pad), lambda i: (i, 0)),
                pl.BlockSpec((1, F_pad), lambda i: (0, 0)),
            ],
            out_specs=pl.BlockSpec((1, 1, block_b), lambda i: (i, 0, 0)),
        ),
        compiler_params=pltpu.CompilerParams(
            dimension_semantics=("parallel",),
            vmem_limit_bytes=tune["vmem_limit_bytes"],
        ),
    )(output_freqs, output_amps, target_spec, binf2d)
    return out.reshape(-1)[:B]


# ----------------------------------------------------------------------------
# Plain-JAX glue (spectrogram / control-frame resampling) + module wrapper
# ----------------------------------------------------------------------------
def hann_window(n):
    # torch.hann_window default (periodic=True)
    return 0.5 - 0.5 * jnp.cos(2.0 * jnp.pi * jnp.arange(n) / n)


def spectrogram(audio, n_fft, window, hop_length):
    # magnitude STFT, center=False, power=1  -> (batch, n_features, n_frames)
    win = window.shape[0]
    n_frames = 1 + (audio.shape[-1] - win) // hop_length
    idx = jnp.arange(n_frames)[:, None] * hop_length + jnp.arange(win)[None, :]
    frames = audio[:, idx] * window                       # (batch, n_frames, win)
    spec = jnp.abs(jnp.fft.rfft(frames, n=n_fft, axis=-1))
    return jnp.transpose(spec, (0, 2, 1))


def resample_frames(x, n_frames):
    # linear interpolation along time axis: (batch, T, K) -> (batch, n_frames, K)
    T = x.shape[1]
    pos = jnp.linspace(0.0, T - 1.0, n_frames)
    lo = jnp.floor(pos).astype(jnp.int32)
    hi = jnp.minimum(lo + 1, T - 1)
    w = (pos - lo.astype(pos.dtype))[None, :, None]
    return x[:, lo, :] * (1.0 - w) + x[:, hi, :] * w


class OscSpecSinkhornLossPallas:
    def __init__(self, fft_size=254, win_length=None, hop_length=None, sr=16000,
                 niter=5, epsilon=0.01, reduce='mean',
                 amp_key='SIN_AMPS', frq_key='SIN_FRQS'):
        self.niter = niter
        self.fft_size = fft_size
        if win_length is None:
            win_length = fft_size
        if hop_length is None:
            hop_length = fft_size // 2
        self.win_length = win_length
        self.hop_length = hop_length
        self.window = hann_window(win_length).astype(jnp.float32)
        self.epsilon = epsilon
        self.reduce = reduce
        self.amp_key = amp_key
        self.frq_key = frq_key
        # librosa.fft_frequencies(sr, n_fft) == arange(n_fft//2 + 1) * sr / n_fft
        self.bin_freqs = (jnp.arange(fft_size // 2 + 1) * (sr / fft_size)
                          ).astype(jnp.float32)

    def __call__(self, output_dict, target_dict):
        target_audio = target_dict['audio']
        target_spec = spectrogram(target_audio, self.fft_size, self.window,
                                  self.hop_length)
        batch_size, n_features, n_frames = target_spec.shape
        target_spec = jnp.transpose(target_spec, (0, 2, 1)).reshape(
            batch_size * n_frames, n_features)

        params = output_dict['params']
        # NOTE: key swap reproduced verbatim from the reference module.
        output_freqs = resample_frames(params[self.amp_key], n_frames).reshape(
            batch_size * n_frames, -1)
        output_amps = resample_frames(params[self.frq_key], n_frames).reshape(
            batch_size * n_frames, -1)

        cost = sinkhorn_cost_pallas(output_freqs, output_amps, target_spec,
                                    self.bin_freqs,
                                    epsilon=self.epsilon, niter=self.niter)
        if self.reduce == 'mean':
            return cost.mean()
        # TODO(synk): non-'mean' branch would also return the transport plan;
        # only the cost path is exported from the kernel here.
        return cost.reshape(batch_size, n_frames)


# ----------------------------------------------------------------------------
# Pure-JAX reference (mirrors the PyTorch log_sinkhorn_loss) for validation
# ----------------------------------------------------------------------------
def log_sinkhorn_ref(source_dist, target_dist, cost_matrix, epsilon, niter):
    def M(u, v):
        return (-cost_matrix + u[:, :, None] + v[:, None, :]) / epsilon

    def normalize(x):
        x = jnp.clip(x, 0.0, 1e9) + 1e-9
        return x / jnp.sum(x, axis=-1, keepdims=True)

    mu = jnp.log(normalize(source_dist))
    nu = jnp.log(normalize(target_dist))
    u, v = jnp.zeros_like(mu), jnp.zeros_like(nu)
    for _ in range(niter):
        u = epsilon * (mu - jax.scipy.special.logsumexp(M(u, v), axis=2)) + u
        v = epsilon * (nu - jax.scipy.special.logsumexp(
            jnp.swapaxes(M(u, v), 1, 2), axis=2)) + v
    pi = jnp.exp(M(u, v))
    cost = jnp.sum(pi * cost_matrix, axis=(1, 2))
    return pi, cost


def forward_ref(loss_mod, output_dict, target_dict):
    target_spec = spectrogram(target_dict['audio'], loss_mod.fft_size,
                              loss_mod.window, loss_mod.hop_length)
    batch_size, n_features, n_frames = target_spec.shape
    target_spec = jnp.transpose(target_spec, (0, 2, 1)).reshape(-1, n_features)
    params = output_dict['params']
    freqs = resample_frames(params[loss_mod.amp_key], n_frames).reshape(
        batch_size * n_frames, -1)
    amps = resample_frames(params[loss_mod.frq_key], n_frames).reshape(
        batch_size * n_frames, -1)
    C = jnp.abs(freqs[:, :, None] - loss_mod.bin_freqs[None, None, :])
    _, cost = log_sinkhorn_ref(amps, target_spec, C, loss_mod.epsilon,
                               loss_mod.niter)
    return cost.mean()


# ----------------------------------------------------------------------------
if __name__ == "__main__":
    key = jax.random.PRNGKey(0)
    k_audio, k_amps, k_frqs = jax.random.split(key, 3)

    fft_size = 254           # -> n_features = 128 (lane-aligned)
    hop = fft_size // 2      # 127
    batch = 2
    n_ctrl_frames = 5
    n_osc = 8
    audio_len = fft_size + hop * 8        # -> n_frames = 9, B = 18 (exercises padding)

    audio = jax.random.normal(k_audio, (batch, audio_len), dtype=jnp.float32)
    sin_amps = jax.random.uniform(k_amps, (batch, n_ctrl_frames, n_osc),
                                  minval=0.0, maxval=8000.0)  # becomes freqs
    sin_frqs = jax.random.uniform(k_frqs, (batch, n_ctrl_frames, n_osc),
                                  minval=0.0, maxval=1.0)     # becomes amps

    output_dict = {'params': {'SIN_AMPS': sin_amps, 'SIN_FRQS': sin_frqs}}
    target_dict = {'audio': audio}

    loss_mod = OscSpecSinkhornLossPallas(fft_size=fft_size, sr=16000,
                                         niter=5, epsilon=0.01, reduce='mean')

    loss = jax.block_until_ready(loss_mod(output_dict, target_dict))
    loss_ref = jax.block_until_ready(forward_ref(loss_mod, output_dict,
                                                 target_dict))

    assert np.isfinite(np.asarray(loss)), "kernel loss not finite"
    assert np.allclose(np.asarray(loss), np.asarray(loss_ref),
                       rtol=5e-2, atol=1e-2), (loss, loss_ref)
    print("KERNEL_OK")
</pallas_src>

<mosaic_0001>
module attributes {stable_mosaic.version = 11 : i64} {
  func.func @_sinkhorn_kernel(%arg0: i32, %arg1: memref<24x8xf32, #tpu.memory_space<vmem>>, %arg2: memref<24x8xf32, #tpu.memory_space<vmem>>, %arg3: memref<24x128xf32, #tpu.memory_space<vmem>>, %arg4: memref<1x128xf32, #tpu.memory_space<vmem>>, %arg5: memref<1x1x24xf32, #tpu.memory_space<vmem>>) attributes {dimension_semantics = [#tpu.dimension_semantics<parallel>], iteration_bounds = array<i64: 1>, scalar_prefetch = 0 : i64, scratch_operands = 0 : i64, tpu.core_type = #tpu.core_type<tc>, window_params = [{transform_indices = @transform_0, window_bounds = array<i64: 24, 8>}, {transform_indices = @transform_1, window_bounds = array<i64: 24, 8>}, {transform_indices = @transform_2, window_bounds = array<i64: 24, 128>}, {pipeline_mode = #tpu.pipeline_mode<synchronous>, transform_indices = @transform_3, window_bounds = array<i64: 1, 128>}, {transform_indices = @transform_4, window_bounds = array<i64: 1, 1, 24>}]} {
    %c0 = arith.constant 0 : index
    %c0_0 = arith.constant 0 : index
    %0 = vector.load %arg1[%c0, %c0_0] : memref<24x8xf32, #tpu.memory_space<vmem>>, vector<24x8xf32>
    %c0_1 = arith.constant 0 : index
    %c0_2 = arith.constant 0 : index
    %1 = vector.load %arg2[%c0_1, %c0_2] : memref<24x8xf32, #tpu.memory_space<vmem>>, vector<24x8xf32>
    %c0_3 = arith.constant 0 : index
    %c0_4 = arith.constant 0 : index
    %2 = vector.load %arg3[%c0_3, %c0_4] : memref<24x128xf32, #tpu.memory_space<vmem>>, vector<24x128xf32>
    %c0_5 = arith.constant 0 : index
    %c0_6 = arith.constant 0 : index
    %3 = vector.load %arg4[%c0_5, %c0_6] : memref<1x128xf32, #tpu.memory_space<vmem>>, vector<1x128xf32>
    %cst = arith.constant 1.000000e+00 : f32
    %4 = vector.broadcast %cst : f32 to vector<128x128xf32>
    %cst_7 = arith.constant 0.000000e+00 : f32
    %cst_8 = arith.constant 1.000000e+09 : f32
    %5 = vector.broadcast %cst_7 : f32 to vector<24x8xf32>
    %6 = arith.maximumf %5, %1 : vector<24x8xf32>
    %7 = vector.broadcast %cst_8 : f32 to vector<24x8xf32>
    %8 = arith.minimumf %7, %6 : vector<24x8xf32>
    %cst_9 = arith.constant 9.99999971E-10 : f32
    %9 = vector.broadcast %cst_9 : f32 to vector<24x8xf32>
    %10 = arith.addf %8, %9 : vector<24x8xf32>
    %11 = math.log %10 : vector<24x8xf32>
    %cst_10 = arith.constant dense<0.000000e+00> : vector<24xf32>
    %12 = vector.multi_reduction <add>, %10, %cst_10 [1] : vector<24x8xf32> to vector<24xf32>
    %13 = vector.shape_cast %12 : vector<24xf32> to vector<24x1xf32>
    %14 = math.log %13 : vector<24x1xf32>
    %15 = vector.broadcast %14 : vector<24x1xf32> to vector<24x8xf32>
    %16 = arith.subf %11, %15 : vector<24x8xf32>
    %17 = vector.shape_cast %16 : vector<24x8xf32> to vector<24x8x1xf32>
    %cst_11 = arith.constant 0.000000e+00 : f32
    %cst_12 = arith.constant 1.000000e+09 : f32
    %18 = vector.broadcast %cst_11 : f32 to vector<24x128xf32>
    %19 = arith.maximumf %18, %2 : vector<24x128xf32>
    %20 = vector.broadcast %cst_12 : f32 to vector<24x128xf32>
    %21 = arith.minimumf %20, %19 : vector<24x128xf32>
    %cst_13 = arith.constant 9.99999971E-10 : f32
    %22 = vector.broadcast %cst_13 : f32 to vector<24x128xf32>
    %23 = arith.addf %21, %22 : vector<24x128xf32>
    %24 = math.log %23 : vector<24x128xf32>
    %cst_14 = arith.constant dense<0.000000e+00> : vector<24xf32>
    %25 = vector.multi_reduction <add>, %23, %cst_14 [1] : vector<24x128xf32> to vector<24xf32>
    %26 = vector.shape_cast %25 : vector<24xf32> to vector<24x1xf32>
    %27 = math.log %26 : vector<24x1xf32>
    %28 = vector.broadcast %27 : vector<24x1xf32> to vector<24x128xf32>
    %29 = arith.subf %24, %28 : vector<24x128xf32>
    %30 = vector.shape_cast %29 : vector<24x128xf32> to vector<24x1x128xf32>
    %31 = vector.shape_cast %0 : vector<24x8xf32> to vector<24x8x1xf32>
    %32 = vector.shape_cast %3 : vector<1x128xf32> to vector<1x1x128xf32>
    %33 = vector.broadcast %31 : vector<24x8x1xf32> to vector<24x8x128xf32>
    %34 = vector.broadcast %32 : vector<1x1x128xf32> to vector<24x8x128xf32>
    %35 = arith.subf %33, %34 : vector<24x8x128xf32>
    %36 = math.absf %35 : vector<24x8x128xf32>
    %cst_15 = arith.constant -1.000000e+02 : f32
    %37 = vector.broadcast %cst_15 : f32 to vector<24x8x128xf32>
    %38 = arith.mulf %36, %37 : vector<24x8x128xf32>
    %c0_i32 = arith.constant 0 : i32
    %c4_i32 = arith.constant 4 : i32
    %39 = arith.addi %c0_i32, %c4_i32 : i32
    %c1_i32 = arith.constant 1 : i32
    %40 = scf.for %arg6 = %c0_i32 to %39 step %c1_i32 iter_args(%arg7 = %38) -> (vector<24x8x128xf32>)  : i32 {
      %cst_27 = arith.constant dense<0xFF800000> : vector<24x8xf32>
      %88 = vector.multi_reduction <maximumf>, %arg7, %cst_27 [2] : vector<24x8x128xf32> to vector<24x8xf32>
      %89 = vector.shape_cast %88 : vector<24x8xf32> to vector<24x8x1xf32>
      %90 = vector.broadcast %89 : vector<24x8x1xf32> to vector<24x8x128xf32>
      %91 = arith.subf %arg7, %90 : vector<24x8x128xf32>
      %92 = math.exp %91 : vector<24x8x128xf32>
      %93 = vector.shape_cast %92 : vector<24x8x128xf32> to vector<192x128xf32>
      %cst_28 = arith.constant dense<0.000000e+00> : vector<192x128xf32>
      %94 = tpu.matmul %93, %4, %cst_28 {dimension_numbers = #tpu.dot_dimension_numbers<[1], [0], [0], [1], [0, 0, 1, 1], [], []>} : vector<192x128xf32>, vector<128x128xf32>, vector<192x128xf32> -> vector<192x128xf32>
      %95 = vector.extract_strided_slice %94 {offsets = [0, 0], sizes = [192, 1], strides = [1, 1]} : vector<192x128xf32> to vector<192x1xf32>
      %96 = vector.shape_cast %95 : vector<192x1xf32> to vector<24x8x1xf32>
      %97 = math.log %96 : vector<24x8x1xf32>
      %98 = arith.addf %97, %89 : vector<24x8x1xf32>
      %99 = arith.subf %17, %98 : vector<24x8x1xf32>
      %100 = vector.broadcast %99 : vector<24x8x1xf32> to vector<24x8x128xf32>
      %101 = arith.addf %arg7, %100 : vector<24x8x128xf32>
      %cst_29 = arith.constant dense<0xFF800000> : vector<24x128xf32>
      %102 = vector.multi_reduction <maximumf>, %101, %cst_29 [1] : vector<24x8x128xf32> to vector<24x128xf32>
      %103 = vector.shape_cast %102 : vector<24x128xf32> to vector<24x1x128xf32>
      %104 = vector.broadcast %103 : vector<24x1x128xf32> to vector<24x8x128xf32>
      %105 = arith.subf %101, %104 : vector<24x8x128xf32>
      %106 = math.exp %105 : vector<24x8x128xf32>
      %cst_30 = arith.constant dense<0.000000e+00> : vector<24x128xf32>
      %107 = vector.multi_reduction <add>, %106, %cst_30 [1] : vector<24x8x128xf32> to vector<24x128xf32>
      %108 = vector.shape_cast %107 : vector<24x128xf32> to vector<24x1x128xf32>
      %109 = math.log %108 : vector<24x1x128xf32>
      %110 = arith.addf %109, %103 : vector<24x1x128xf32>
      %111 = arith.subf %30, %110 : vector<24x1x128xf32>
      %112 = vector.broadcast %111 : vector<24x1x128xf32> to vector<24x8x128xf32>
      %113 = arith.addf %101, %112 : vector<24x8x128xf32>
      scf.yield %113 : vector<24x8x128xf32>
    }
    %cst_16 = arith.constant dense<0xFF800000> : vector<24x8xf32>
    %41 = vector.multi_reduction <maximumf>, %40, %cst_16 [2] : vector<24x8x128xf32> to vector<24x8xf32>
    %42 = vector.shape_cast %41 : vector<24x8xf32> to vector<24x8x1xf32>
    %43 = vector.broadcast %42 : vector<24x8x1xf32> to vector<24x8x128xf32>
    %44 = arith.subf %40, %43 : vector<24x8x128xf32>
    %45 = math.exp %44 : vector<24x8x128xf32>
    %46 = vector.shape_cast %45 : vector<24x8x128xf32> to vector<192x128xf32>
    %cst_17 = arith.constant dense<0.000000e+00> : vector<192x128xf32>
    %47 = tpu.matmul %46, %4, %cst_17 {dimension_numbers = #tpu.dot_dimension_numbers<[1], [0], [0], [1], [0, 0, 1, 1], [], []>} : vector<192x128xf32>, vector<128x128xf32>, vector<192x128xf32> -> vector<192x128xf32>
    %48 = vector.extract_strided_slice %47 {offsets = [0, 0], sizes = [192, 1], strides = [1, 1]} : vector<192x128xf32> to vector<192x1xf32>
    %49 = vector.shape_cast %48 : vector<192x1xf32> to vector<24x8x1xf32>
    %50 = math.log %49 : vector<24x8x1xf32>
    %51 = arith.addf %50, %42 : vector<24x8x1xf32>
    %52 = arith.subf %17, %51 : vector<24x8x1xf32>
    %53 = vector.broadcast %52 : vector<24x8x1xf32> to vector<24x8x128xf32>
    %54 = arith.addf %40, %53 : vector<24x8x128xf32>
    %cst_18 = arith.constant dense<0xFF800000> : vector<24x128xf32>
    %55 = vector.multi_reduction <maximumf>, %54, %cst_18 [1] : vector<24x8x128xf32> to vector<24x128xf32>
    %56 = vector.shape_cast %55 : vector<24x128xf32> to vector<24x1x128xf32>
    %57 = vector.broadcast %56 : vector<24x1x128xf32> to vector<24x8x128xf32>
    %58 = arith.subf %54, %57 : vector<24x8x128xf32>
    %59 = math.exp %58 : vector<24x8x128xf32>
    %cst_19 = arith.constant dense<0.000000e+00> : vector<24x128xf32>
    %60 = vector.multi_reduction <add>, %59, %cst_19 [1] : vector<24x8x128xf32> to vector<24x128xf32>
    %61 = vector.shape_cast %60 : vector<24x128xf32> to vector<24x1x128xf32>
    %62 = math.log %61 : vector<24x1x128xf32>
    %63 = arith.addf %62, %56 : vector<24x1x128xf32>
    %64 = arith.subf %30, %63 : vector<24x1x128xf32>
    %65 = arith.addf %56, %64 : vector<24x1x128xf32>
    %66 = math.exp %65 : vector<24x1x128xf32>
    %67 = vector.broadcast %66 : vector<24x1x128xf32> to vector<24x8x128xf32>
    %68 = arith.mulf %59, %67 : vector<24x8x128xf32>
    %69 = vector.shape_cast %0 : vector<24x8xf32> to vector<24x8x1xf32>
    %70 = vector.shape_cast %3 : vector<1x128xf32> to vector<1x1x128xf32>
    %71 = vector.broadcast %69 : vector<24x8x1xf32> to vector<24x8x128xf32>
    %72 = vector.broadcast %70 : vector<1x1x128xf32> to vector<24x8x128xf32>
    %73 = arith.subf %71, %72 : vector<24x8x128xf32>
    %74 = math.absf %73 : vector<24x8x128xf32>
    %cst_20 = arith.constant -1.000000e+02 : f32
    %75 = vector.broadcast %cst_20 : f32 to vector<24x8x128xf32>
    %76 = arith.mulf %74, %75 : vector<24x8x128xf32>
    %77 = arith.mulf %68, %76 : vector<24x8x128xf32>
    %78 = vector.shape_cast %77 : vector<24x8x128xf32> to vector<192x128xf32>
    %cst_21 = arith.constant dense<0.000000e+00> : vector<192x128xf32>
    %79 = tpu.matmul %78, %4, %cst_21 {dimension_numbers = #tpu.dot_dimension_numbers<[1], [0], [0], [1], [0, 0, 1, 1], [], []>} : vector<192x128xf32>, vector<128x128xf32>, vector<192x128xf32> -> vector<192x128xf32>
    %80 = vector.extract_strided_slice %79 {offsets = [0, 0], sizes = [192, 1], strides = [1, 1]} : vector<192x128xf32> to vector<192x1xf32>
    %81 = vector.shape_cast %80 : vector<192x1xf32> to vector<24x8x1xf32>
    %82 = vector.shape_cast %81 : vector<24x8x1xf32> to vector<24x8xf32>
    %cst_22 = arith.constant dense<0.000000e+00> : vector<24xf32>
    %83 = vector.multi_reduction <add>, %82, %cst_22 [1] : vector<24x8xf32> to vector<24xf32>
    %cst_23 = arith.constant -0.00999999977 : f32
    %84 = vector.broadcast %cst_23 : f32 to vector<24xf32>
    %85 = arith.mulf %84, %83 : vector<24xf32>
    %86 = vector.shape_cast %85 : vector<24xf32> to vector<1x1x24xf32>
    %c0_24 = arith.constant 0 : index
    %c0_25 = arith.constant 0 : index
    %c0_26 = arith.constant 0 : index
    %87 = vector.load %arg5[%c0_24, %c0_25, %c0_26] : memref<1x1x24xf32, #tpu.memory_space<vmem>>, vector<1x1x24xf32>
    tpu.vector_store %arg5[%c0_24, %c0_25, %c0_26], %86 {strides = array<i32>} : memref<1x1x24xf32, #tpu.memory_space<vmem>>, vector<1x1x24xf32>,
    return
  }
  func.func @transform_0(%arg0: i32) -> (i32, i32) {
    %c0_i32 = arith.constant 0 : i32
    %c0_i32_0 = arith.constant 0 : i32
    return %arg0, %c0_i32 : i32, i32
  }
  func.func @transform_1(%arg0: i32) -> (i32, i32) {
    %c0_i32 = arith.constant 0 : i32
    %c0_i32_0 = arith.constant 0 : i32
    return %arg0, %c0_i32 : i32, i32
  }
  func.func @transform_2(%arg0: i32) -> (i32, i32) {
    %c0_i32 = arith.constant 0 : i32
    %c0_i32_0 = arith.constant 0 : i32
    return %arg0, %c0_i32 : i32, i32
  }
  func.func @transform_3(%arg0: i32) -> (i32, i32) {
    %c0_i32 = arith.constant 0 : i32
    %c0_i32_0 = arith.constant 0 : i32
    %c0_i32_1 = arith.constant 0 : i32
    return %c0_i32, %c0_i32_0 : i32, i32
  }
  func.func @transform_4(%arg0: i32) -> (i32, i32, i32) {
    %c0_i32 = arith.constant 0 : i32
    %c0_i32_0 = arith.constant 0 : i32
    %c0_i32_1 = arith.constant 0 : i32
    return %arg0, %c0_i32, %c0_i32_0 : i32, i32, i32
  }
}

</mosaic_0001>

<bundles_post_ra>
// kernel: tpu_custom_call.1
= control target key start
LH: loop header
LB: loop body
LE: loop exit
PB: predicated region body
PF: predicated region fallthrough
CT: control target
= control target key end

     0   :  { %vm43_vm0 = vcmask 64512   ;;  %s6877_s0 = inlined_call_operand.vmem [shape: f32[24,8], index: 0, kind: input, shape index: {}]   ;;  %s6878_s1 = inlined_call_operand.vmem [shape: f32[24,8], index: 1, kind: input, shape index: {}]   ;;  %s6879_s2 = inlined_call_operand.vmem [shape: f32[24,128], index: 2, kind: input, shape index: {}]   ;;  %s6880_s3 = inlined_call_operand.vmem [shape: f32[1,128], index: 3, kind: input, shape index: {}]   ;;  %s6881_s4 = inlined_call_operand.hbm [shape: f32[1,1,24], index: 4, kind: output, shape index: {}]  }
   0x1   :  { %v21_v0 = vld [vmem:[%s6878_s1] sm:$0xff]  ;;  %v22_v1 = vld [vmem:[%s6878_s1 + $0x8] sm:$0xff]  ;;  %v23_v2 = vld [vmem:[%s6878_s1 + $0x10] sm:$0xff] }
   0x2   :  { %v28_v3 = vmax.f32 %v21_v0, 0.0  ;;  %v29_v4 = vmax.f32 %v22_v1, 0.0  ;;  %v30_v5 = vmax.f32 %v23_v2, 0.0  ;;  %v24_v6 = vld [vmem:[%s6879_s2] sm:$0xff]  ;;  %v25_v7 = vld [vmem:[%s6879_s2 + $0x8] sm:$0xff]  ;;  %v26_v14 = vld [vmem:[%s6879_s2 + $0x10] sm:$0xff] }
   0x3   :  { %v231_v8 = vmax.f32 %v25_v7, 0.0  ;;  %v230_v12 = vmax.f32 %v24_v6, 0.0 }
   0x4   :  { %v31_v9 = vmin.f32 %v28_v3, 1e+09  ;;  %v32_v10 = vmin.f32 %v29_v4, 1e+09  ;;  %v33_v11 = vmin.f32 %v30_v5, 1e+09 }
   0x5   :  { %v234_v13 = vmin.f32 %v231_v8, 1e+09 }
   0x6   :  { %v4927_v15 = vadd.f32 1e-09, %v31_v9  ;;  %v4929_v16 = vadd.f32 1e-09, %v32_v10  ;;  %v4931_v17 = vadd.f32 1e-09, %v33_v11 }
   0x8   :  { %v44_v18 = vsel %vm43_vm0, %v4927_v15, 0.0  ;;  %v50_v19 = vsel %vm43_vm0, %v4931_v17, 0.0 }
   0x9   :  { %9 = vsyncpa [#allocation3], 0  ;;  %45 = vadd.xlane.f32.xlu0 %v44_v18  ;;  %51 = vadd.xlane.f32.xlu1 %v50_v19  ;;  %v233_v20 = vmin.f32 %v230_v12, 1e+09  ;;  %v4937_v21 = vadd.f32 1e-09, %v234_v13  ;;  %v6882_v26 = vlaneseq  ;;  %4196 = vlog2.f32 %v4927_v15 }
   0xa   :  { %v232_v22 = vmax.f32 %v26_v14, 0.0  ;;  %v47_v23 = vsel %vm43_vm0, %v4929_v16, 0.0  ;;  %v18_v30 = vld [vmem:[%s6877_s0] sm:$0xff]  ;;  %v19_v41 = vld [vmem:[%s6877_s0 + $0x8] sm:$0xff]  ;;  %v20_v52 = vld [vmem:[%s6877_s0 + $0x10] sm:$0xff]  ;;  %4198 = vlog2.f32 %v4929_v16 }
   0xb   :  { %v4941_v24 = vadd.f32 1e-09, %v233_v20  ;;  %v4948_v28 = vshrl.u32 %v6882_v26, 7  ;;  %4200 = vlog2.f32 %v4931_v17  ;;  %v5017_v4 = vld [vmem:[%s6880_s3] ss:$0 sm:$0xff]  ;;  %s5385_s3 = smov 0  }
   0xc   :  { %v235_v25 = vmin.f32 %v232_v22, 1e+09  ;;  %v4878_v12 = vmov 1966171168  }
   0xd   :  { %48 = vadd.xlane.f32.xlu0 %v47_v23  ;;  %247 = vadd.xlane.f32.xlu1 %v4937_v21  ;;  %6967 = vst [vmem:[#allocation5_spill] sm:$0xff] %v4948_v28  ;;  %v4952_v29 = vsub.s32 0, %v4948_v28  ;;  %v4959_v32 = vsub.s32 2, %v4948_v28  ;;  %v4963_v34 = vsub.s32 4, %v4948_v28  ;;  %v4967_v36 = vsub.s32 6, %v4948_v28 }
   0xe   :  { %v4945_v27 = vadd.f32 1e-09, %v235_v25  ;;  %v4970_v37 = vsub.s32 1, %v4948_v28  ;;  %v4975_v40 = vsub.s32 3, %v4948_v28  ;;  %v4983_v44 = vsub.s32 5, %v4948_v28 }
   0xf   :  { %6968 = vst [vmem:[#allocation6_spill] sm:$0xff] %v4952_v29  ;;  %v437_v31 = vrot.slane %v18_v30, %v4952_v29  ;;  %v451_v33 = vrot.slane %v18_v30, %v4959_v32  ;;  %v465_v35 = vrot.slane %v18_v30, %v4963_v34  ;;  %v479_v38 = vrot.slane %v18_v30, %v4967_v36 }
  0x10   :  { %v444_v39 = vrot.slane %v18_v30, %v4970_v37  ;;  %v493_v42 = vrot.slane %v19_v41, %v4952_v29  ;;  %v458_v43 = vrot.slane %v18_v30, %v4975_v40  ;;  %v507_v45 = vrot.slane %v19_v41, %v4959_v32 }
  0x11   :  { %245 = vadd.xlane.f32.xlu0 %v4941_v24  ;;  %v472_v46 = vrot.slane %v18_v30, %v4983_v44  ;;  %v4988_v47 = vsub.s32 7, %v4948_v28  ;;  %v521_v48 = vrot.slane %v19_v41, %v4963_v34  ;;  %v535_v50 = vrot.slane %v19_v41, %v4967_v36 }
  0x12   :  { %v500_v51 = vrot.slane %v19_v41, %v4970_v37  ;;  %v549_v53 = vrot.slane %v20_v52, %v4952_v29  ;;  %v514_v54 = vrot.slane %v19_v41, %v4975_v40  ;;  %v563_v55 = vrot.slane %v20_v52, %v4959_v32 }
  0x13   :  { %v486_v49 = vrot.slane %v18_v30, %v4988_v47  ;;  %v528_v56 = vrot.slane %v19_v41, %v4983_v44  ;;  %v577_v57 = vrot.slane %v20_v52, %v4963_v34  ;;  %v542_v58 = vrot.slane %v19_v41, %v4988_v47 }
  0x14   :  { %v591_v59 = vrot.slane %v20_v52, %v4967_v36  ;;  %v556_v60 = vrot.slane %v20_v52, %v4970_v37  ;;  %v570_v61 = vrot.slane %v20_v52, %v4975_v40  ;;  %v584_v62 = vrot.slane %v20_v52, %v4983_v44 }
  0x15   :  { %249 = vadd.xlane.f32.xlu0 %v4945_v27  ;;  %v598_v63 = vrot.slane %v20_v52, %v4988_v47  ;;  %4202 = vlog2.f32 %v4941_v24  ;;  %v265_v13 = vunpack.c.l.s4 %v4878_v12 }
  0x16   :  { %v4197_v8 = vpop.eup %4196 }
  0x17   :  { %v4199_v9 = vpop.eup %4198  ;;  %v38_v17 = vmul.f32 0.6931472, %v4197_v8  ;;  %v266_v25 = vunpack.c.0.s8 %v265_v13 }
  0x18   :  { %v4201_v11 = vpop.eup %4200 }
  0x19   :  { %v42_v41 = vmul.f32 0.6931472, %v4201_v11 }
  0x1e   :  { %439 = vbcast.lane.b32.xlu1 %v437_v31, 256 }
  0x22   :  { %453 = vbcast.lane.b32.xlu1 %v451_v33, 256  ;;  %v4203_v16 = vpop.eup %4202 }
  0x26   :  { %467 = vbcast.lane.b32.xlu1 %v465_v35, 256  ;;  %v40_v35 = vmul.f32 0.6931472, %v4199_v9 }
  0x2a   :  { %481 = vbcast.lane.b32.xlu1 %v479_v38, 256 }
  0x2b   :  { %446 = vbcast.lane.b32.xlu0 %v444_v39, 256 }
  0x2e   :  { %495 = vbcast.lane.b32.xlu1 %v493_v42, 256 }
  0x2f   :  { %460 = vbcast.lane.b32.xlu0 %v458_v43, 256 }
  0x32   :  { %509 = vbcast.lane.b32.xlu1 %v507_v45, 256 }
  0x33   :  { %474 = vbcast.lane.b32.xlu0 %v472_v46, 256 }
  0x36   :  { %523 = vbcast.lane.b32.xlu1 %v521_v48, 256 }
  0x37   :  { %488 = vbcast.lane.b32.xlu0 %v486_v49, 256  ;;  %v240_v49 = vmul.f32 0.6931472, %v4203_v16 }
  0x3a   :  { %537 = vbcast.lane.b32.xlu1 %v535_v50, 256  ;;  %v5032_v50 = vsub.s32 %v266_v25, %v4948_v28 }
  0x3b   :  { %502 = vbcast.lane.b32.xlu0 %v500_v51, 256 }
  0x3e   :  { %551 = vbcast.lane.b32.xlu1 %v549_v53, 256 }
  0x3f   :  { %516 = vbcast.lane.b32.xlu0 %v514_v54, 256 }
  0x42   :  { %565 = vbcast.lane.b32.xlu1 %v563_v55, 256 }
  0x43   :  { %530 = vbcast.lane.b32.xlu0 %v528_v56, 256 }
  0x46   :  { %579 = vbcast.lane.b32.xlu1 %v577_v57, 256 }
  0x47   :  { %544 = vbcast.lane.b32.xlu0 %v542_v58, 256 }
  0x4a   :  { %593 = vbcast.lane.b32.xlu1 %v591_v59, 256 }
  0x4b   :  { %558 = vbcast.lane.b32.xlu0 %v556_v60, 256 }
  0x4f   :  { %572 = vbcast.lane.b32.xlu0 %v570_v61, 256 }
  0x53   :  { %586 = vbcast.lane.b32.xlu0 %v584_v62, 256 }
  0x57   :  { %600 = vbcast.lane.b32.xlu0 %v598_v63, 256 }
  0x92   :  { %v46_v0 = vpop.xlane.xlu0 %45  ;;  %v52_v1 = vpop.xlane.xlu1 %51 }
  0x93   :  { %4204 = vlog2.f32 %v46_v0 }
  0x94   :  { %4206 = vlog2.f32 %v52_v1 }
  0x95   :  { %4208 = vlog2.f32 %v4937_v21 }
  0x96   :  { %4210 = vlog2.f32 %v4945_v27  ;;  %v49_v2 = vpop.xlane.xlu0 %48  ;;  %v248_v3 = vpop.xlane.xlu1 %247 }
  0x97   :  { %4212 = vlog2.f32 %v49_v2 }
  0x98   :  { %4214 = vlog2.f32 %v248_v3 }
  0x9a   :  { %v246_v5 = vpop.xlane.xlu0 %245  ;;  %v440_v6 = vpop.permute.xlu1 %439 }
  0x9b   :  { %4216 = vlog2.f32 %v246_v5  ;;  %v608_v7 = vsub.f32 %v440_v6, %v5017_v4 }
  0x9d   :  { %v632_v10 = vand.u32 2147483647, %v608_v7 }
  0x9e   :  { %v250_v14 = vpop.xlane.xlu0 %249  ;;  %v454_v15 = vpop.permute.xlu1 %453 }
  0x9f   :  { %4218 = vlog2.f32 %v250_v14  ;;  %v5020_v18 = vmul.f32 -100.0, %v632_v10   ;;  %v610_v19 = vsub.f32 %v454_v15, %v5017_v4 }
  0xa0   :  { %v4205_v20 = vpop.eup %4204 }
  0xa1   :  { %6969 = vst [vmem:[#allocation7_spill] sm:$0xff] %v5020_v18  ;;  %v4207_v21 = vpop.eup %4206  ;;  %v54_v22 = vmul.f32 0.6931472, %v4205_v20  ;;  %v634_v23 = vand.u32 2147483647, %v610_v19 }
  0xa2   :  { %v4209_v24 = vpop.eup %4208  ;;  %v447_v27 = vpop.permute.xlu0 %446  ;;  %v58_v42 = vmul.f32 0.6931472, %v4207_v21 }
  0xa3   :  { %v468_v30 = vpop.permute.xlu1 %467  ;;  %v4211_v31 = vpop.eup %4210  ;;  %v5023_v33 = vsub.f32 %v38_v17, %v54_v22  ;;  %v5025_v38 = vmul.f32 -100.0, %v634_v23   ;;  %v242_v53 = vmul.f32 0.6931472, %v4209_v24  ;;  %v609_v56 = vsub.f32 %v447_v27, %v5017_v4 }
  0xa4   :  { %v4213_v39 = vpop.eup %4212  ;;  %v244_v54 = vmul.f32 0.6931472, %v4211_v31  ;;  %v5041_v59 = vsub.f32 %v42_v41, %v58_v42  ;;  %v612_v61 = vsub.f32 %v468_v30, %v5017_v4 }
  0xa5   :  { %6970 = vst [vmem:[#allocation8_spill] sm:$0xff] %v5025_v38  ;;  %v4215_v43 = vpop.eup %4214  ;;  %v56_v45 = vmul.f32 0.6931472, %v4213_v39  ;;  %v72_v46 = vrot.slane %v5023_v33, %v4970_v37  ;;  %v65_v48 = vrot.slane %v5023_v33, %v4952_v29  ;;  %v100_v58 = vrot.slane %v5023_v33, %v4983_v44 }
  0xa6   :  { %v461_v51 = vpop.permute.xlu0 %460  ;;  %v254_v60 = vmul.f32 0.6931472, %v4215_v43  ;;  %v79_v62 = vrot.slane %v5023_v33, %v4959_v32  ;;  %v114_v63 = vrot.slane %v5023_v33, %v4988_v47  ;;  %v86_v0 = vrot.slane %v5023_v33, %v4975_v40 }
  0xa7   :  { %v5034_v52 = vpop.permute.xlu1 %481  ;;  %v5036_v55 = vsub.f32 %v40_v35, %v56_v45  ;;  %74 = vbcast.lane.b32.xlu0 %v72_v46, 256  ;;  %67 = vbcast.lane.b32.xlu1 %v65_v48, 256  ;;  %v93_v1 = vrot.slane %v5023_v33, %v4963_v34  ;;  %v107_v5 = vrot.slane %v5023_v33, %v4967_v36  ;;  %v633_v15 = vand.u32 2147483647, %v609_v56 }
  0xa8   :  { %v4217_v57 = vpop.eup %4216  ;;  %v258_v14 = vsub.f32 %v242_v53, %v254_v60  ;;  %v611_v16 = vsub.f32 %v461_v51, %v5017_v4  ;;  %v636_v21 = vand.u32 2147483647, %v612_v61  ;;  %v614_v22 = vsub.f32 %v5034_v52, %v5017_v4 }
  0xa9   :  { %v128_v2 = vrot.slane %v5036_v55, %v4970_v37  ;;  %v142_v3 = vrot.slane %v5036_v55, %v4975_v40  ;;  %v156_v6 = vrot.slane %v5036_v55, %v4983_v44  ;;  %v121_v9 = vrot.slane %v5036_v55, %v4952_v29 }
  0xaa   :  { %v475_v7 = vpop.permute.xlu0 %474  ;;  %v252_v12 = vmul.f32 0.6931472, %v4217_v57  ;;  %v312_v23 = vcombine.high %v258_v14, %v258_v14  ;;  %v319_v24 = vrot.slane %v258_v14, %v5032_v50  ;;  %v5073_v25 = vmul.f32 -100.0, %v633_v15  }
  0xab   :  { %v5060_v8 = vpop.permute.xlu1 %495  ;;  %102 = vbcast.lane.b32.xlu0 %v100_v58, 256  ;;  %81 = vbcast.lane.b32.xlu1 %v79_v62, 256  ;;  %v613_v17 = vsub.f32 %v475_v7, %v5017_v4  ;;  %v635_v27 = vand.u32 2147483647, %v611_v16 }
  0xac   :  { %v4219_v13 = vpop.eup %4218  ;;  %v257_v19 = vsub.f32 %v240_v49, %v252_v12  ;;  %6971 = vst [vmem:[#allocation9_spill] sm:$0xff] %v5073_v25  ;;  %v326_v43 = vrot.slane %v312_v23, %v5032_v50  ;;  %v327_v45 = vcombine.high %v319_v24, %v319_v24  ;;  %v5080_v46 = vrot.slane %v319_v24, %v5032_v50 }
  0xad   :  { %v256_v20 = vmul.f32 0.6931472, %v4219_v13  ;;  %v637_v42 = vand.u32 2147483647, %v613_v17  ;;  %v5082_v48 = vmul.f32 -100.0, %v635_v27   ;;  %v5138_v23 = vmul.f32 -100.0, %v636_v21  }
  0xae   :  { %v489_v30 = vpop.permute.xlu0 %488  ;;  %v263_v35 = vcombine.high %v257_v19, %v257_v19  ;;  %v270_v39 = vrot.slane %v257_v19, %v5032_v50  ;;  %6972 = vst [vmem:[#allocation10_spill] sm:$0xff] %v5080_v46  ;;  %v328_v56 = vcombine.high %v326_v43, %v326_v43  ;;  %v5089_v57 = vrot.slane %v326_v43, %v5032_v50 }
  0xaf   :  { %v5075_v31 = vpop.permute.xlu1 %509  ;;  %116 = vbcast.lane.b32.xlu0 %v114_v63, 256  ;;  %88 = vbcast.lane.b32.xlu1 %v86_v0, 256  ;;  %v259_v41 = vsub.f32 %v244_v54, %v256_v20  ;;  %6973 = vst [vmem:[#allocation11_spill] sm:$0xff] %v5082_v48  ;;  %v5092_v54 = vrot.slane %v327_v45, %v5032_v50  ;;  %v5104_v7 = vmul.f32 -100.0, %v637_v42   ;;  %6989 = vst [vmem:[#allocation27_spill] sm:$0xff] %v5138_v23 }
  0xb0   :  { %v277_v49 = vrot.slane %v263_v35, %v5032_v50  ;;  %v278_v51 = vcombine.high %v270_v39, %v270_v39  ;;  %v5086_v52 = vrot.slane %v270_v39, %v5032_v50  ;;  %6975 = vst [vmem:[#allocation13_spill] sm:$0xff] %v5089_v57  ;;  %v5096_v58 = vcombine.high %v5080_v46, %v5080_v46 }
  0xb1   :  { %v361_v53 = vcombine.high %v259_v41, %v259_v41  ;;  %6976 = vst [vmem:[#allocation14_spill] sm:$0xff] %v5092_v54  ;;  %6980 = vst [vmem:[#allocation18_spill] sm:$0xff] %v5104_v7  ;;  %v5111_v13 = vrot.slane %v328_v56, %v5032_v50  ;;  %v368_v17 = vrot.slane %v259_v41, %v5032_v50  ;;  %v638_v42 = vand.u32 2147483647, %v614_v22 }
  0xb2   :  { %6974 = vst [vmem:[#allocation12_spill] sm:$0xff] %v5086_v52  ;;  %6977 = vst [vmem:[#allocation15_spill] sm:$0xff] %v5096_v58  ;;  %v503_v60 = vpop.permute.xlu0 %502  ;;  %v279_v62 = vcombine.high %v277_v49, %v277_v49  ;;  %v5099_v63 = vrot.slane %v277_v49, %v5032_v50  ;;  %v5102_v0 = vrot.slane %v278_v51, %v5032_v50 }
  0xb3   :  { %v524_v61 = vpop.permute.xlu1 %523  ;;  %130 = vbcast.lane.b32.xlu0 %v128_v2, 256  ;;  %95 = vbcast.lane.b32.xlu1 %v93_v1, 256  ;;  %v5108_v12 = vcombine.high %v5086_v52, %v5086_v52  ;;  %6982 = vst [vmem:[#allocation20_spill] sm:$0xff] %v5111_v13  ;;  %v5115_v2 = vcombine.high %v5089_v57, %v5089_v57 }
  0xb4   :  { %6978 = vst [vmem:[#allocation16_spill] sm:$0xff] %v5099_v63  ;;  %6979 = vst [vmem:[#allocation17_spill] sm:$0xff] %v5102_v0  ;;  %v5119_v1 = vcombine.high %v5092_v54, %v5092_v54  ;;  %v5122_v14 = vrot.slane %v279_v62, %v5032_v50  ;;  %v5126_v15 = vcombine.high %v5099_v63, %v5099_v63 }
  0xb5   :  { %6981 = vst [vmem:[#allocation19_spill] sm:$0xff] %v5108_v12  ;;  %6983 = vst [vmem:[#allocation21_spill] sm:$0xff] %v5115_v2  ;;  %v5130_v16 = vcombine.high %v5102_v0, %v5102_v0  ;;  %v5135_v19 = vcombine.high %v5111_v13, %v5111_v13  ;;  %v375_v20 = vrot.slane %v361_v53, %v5032_v50 }
  0xb6   :  { %6984 = vst [vmem:[#allocation22_spill] sm:$0xff] %v5119_v1  ;;  %6985 = vst [vmem:[#allocation23_spill] sm:$0xff] %v5122_v14  ;;  %v615_v24 = vsub.f32 %v489_v30, %v5017_v4  ;;  %v517_v27 = vpop.permute.xlu0 %516  ;;  %v5149_v39 = vcombine.high %v5122_v14, %v5122_v14  ;;  %v376_v41 = vcombine.high %v368_v17, %v368_v17 }
  0xb7   :  { %6986 = vst [vmem:[#allocation24_spill] sm:$0xff] %v5126_v15  ;;  %6987 = vst [vmem:[#allocation25_spill] sm:$0xff] %v5130_v16  ;;  %v538_v35 = vpop.permute.xlu1 %537  ;;  %144 = vbcast.lane.b32.xlu0 %v142_v3, 256  ;;  %109 = vbcast.lane.b32.xlu1 %v107_v5, 256  ;;  %v5152_v21 = vrot.slane %v368_v17, %v5032_v50  ;;  %v377_v30 = vcombine.high %v375_v20, %v375_v20  ;;  %v5165_v5 = vmul.f32 -100.0, %v638_v42  }
  0xb8   :  { %6988 = vst [vmem:[#allocation26_spill] sm:$0xff] %v5135_v19  ;;  %6990 = vst [vmem:[#allocation28_spill] sm:$0xff] %v5149_v39  ;;  %v5155_v43 = vrot.slane %v375_v20, %v5032_v50  ;;  %v639_v45 = vand.u32 2147483647, %v615_v24  ;;  %v617_v3 = vsub.f32 %v503_v60, %v5017_v4  ;;  %v5159_v49 = vrot.slane %v376_v41, %v5032_v50 }
  0xb9   :  { %6991 = vst [vmem:[#allocation29_spill] sm:$0xff] %v5152_v21  ;;  %v5163_v33 = vcombine.high %v5152_v21, %v5152_v21  ;;  %6995 = vst [vmem:[#allocation33_spill] sm:$0xff] %v5165_v5  ;;  %v616_v51 = vsub.f32 %v5060_v8, %v5017_v4  ;;  %v5170_v22 = vrot.slane %v377_v30, %v5032_v50 }
  0xba   :  { %6992 = vst [vmem:[#allocation30_spill] sm:$0xff] %v5155_v43  ;;  %6993 = vst [vmem:[#allocation31_spill] sm:$0xff] %v5159_v49  ;;  %v5174_v53 = vcombine.high %v5155_v43, %v5155_v43  ;;  %v5176_v56 = vmul.f32 -100.0, %v639_v45   ;;  %v641_v60 = vand.u32 2147483647, %v617_v3  ;;  %v531_v62 = vpop.permute.xlu0 %530  ;;  %v5186_v50 = vcombine.high %v5159_v49, %v5159_v49 }
  0xbb   :  { %6994 = vst [vmem:[#allocation32_spill] sm:$0xff] %v5163_v33  ;;  %6996 = vst [vmem:[#allocation34_spill] sm:$0xff] %v5170_v22  ;;  %v552_v17 = vpop.permute.xlu1 %551  ;;  %158 = vbcast.lane.b32.xlu0 %v156_v6, 256  ;;  %123 = vbcast.lane.b32.xlu1 %v121_v9, 256  ;;  %v640_v8 = vand.u32 2147483647, %v616_v51  ;;  %v619_v20 = vsub.f32 %v517_v27, %v5017_v4  ;;  %v618_v24 = vsub.f32 %v5075_v31, %v5017_v4 }
  0xbc   :  { %6997 = vst [vmem:[#allocation35_spill] sm:$0xff] %v5174_v53  ;;  %6998 = vst [vmem:[#allocation36_spill] sm:$0xff] %v5176_v56  ;;  %v5193_v41 = vcombine.high %v5170_v22, %v5170_v22  ;;  %v5195_v42 = vmul.f32 -100.0, %v641_v60   ;;  %v621_v6 = vsub.f32 %v531_v62, %v5017_v4  ;;  %v620_v9 = vsub.f32 %v524_v61, %v5017_v4 }
  0xbd   :  { %6999 = vst [vmem:[#allocation37_spill] sm:$0xff] %v5186_v50  ;;  %v5199_v30 = vmul.f32 -100.0, %v640_v8   ;;  %v643_v45 = vand.u32 2147483647, %v619_v20  ;;  %v642_v3 = vand.u32 2147483647, %v618_v24  ;;  %v622_v51 = vsub.f32 %v538_v35, %v5017_v4 }
  0xbe   :  { %7000 = vst [vmem:[#allocation38_spill] sm:$0xff] %v5193_v41  ;;  %7001 = vst [vmem:[#allocation39_spill] sm:$0xff] %v5195_v42  ;;  %v191_v27 = vrot.slane %v5041_v59, %v4959_v32  ;;  %v645_v31 = vand.u32 2147483647, %v621_v6  ;;  %v644_v26 = vand.u32 2147483647, %v620_v9  ;;  %v545_v11 = vpop.permute.xlu0 %544  ;;  %v624_v10 = vsub.f32 %v552_v17, %v5017_v4 }
  0xbf   :  { %7002 = vst [vmem:[#allocation40_spill] sm:$0xff] %v5199_v30  ;;  %v566_v60 = vpop.permute.xlu1 %565  ;;  %v7003_v62 = vrot.slane %v5036_v55, %v4988_v47  ;;  %v7004_v61 = vrot.slane %v5036_v55, %v4959_v32  ;;  %v5211_v8 = vmul.f32 -100.0, %v643_v45   ;;  %v5213_v35 = vmul.f32 -100.0, %v642_v3  }
  0xc0   :  { %v623_v20 = vsub.f32 %v545_v11, %v5017_v4  ;;  %v646_v24 = vand.u32 2147483647, %v622_v51  ;;  %v5216_v6 = vmul.f32 -100.0, %v645_v31   ;;  %v5218_v9 = vmul.f32 -100.0, %v644_v26  }
  0xc1   :  { %172 = vbcast.lane.b32.xlu0 %v7003_v62, 256  ;;  %137 = vbcast.lane.b32.xlu1 %v7004_v61, 256  ;;  %7005 = vst [vmem:[#allocation41_spill] sm:$0xff] %v5211_v8  ;;  %7006 = vst [vmem:[#allocation42_spill] sm:$0xff] %v5213_v35  ;;  %v648_v17 = vand.u32 2147483647, %v624_v10  ;;  %v626_v28 = vsub.f32 %v566_v60, %v5017_v4  ;;  %v149_v62 = vrot.slane %v5036_v55, %v4963_v34 }
  0xc2   :  { %7007 = vst [vmem:[#allocation43_spill] sm:$0xff] %v5216_v6  ;;  %7008 = vst [vmem:[#allocation44_spill] sm:$0xff] %v5218_v9  ;;  %v647_v53 = vand.u32 2147483647, %v623_v20  ;;  %v5223_v32 = vmul.f32 -100.0, %v646_v24   ;;  %v559_v45 = vpop.permute.xlu0 %558  ;;  %v205_v26 = vrot.slane %v5041_v59, %v4963_v34  ;;  %v163_v60 = vrot.slane %v5036_v55, %v4967_v36 }
  0xc3   :  { %v5225_v61 = vmul.f32 -100.0, %v648_v17   ;;  %v650_v3 = vand.u32 2147483647, %v626_v28  ;;  %v580_v58 = vpop.permute.xlu1 %579  ;;  %v625_v10 = vsub.f32 %v559_v45, %v5017_v4  ;;  %v219_v28 = vrot.slane %v5041_v59, %v4967_v36 }
  0xc4   :  { %7009 = vst [vmem:[#allocation45_spill] sm:$0xff] %v5223_v32  ;;  %v5229_v11 = vmul.f32 -100.0, %v647_v53   ;;  %v628_v51 = vsub.f32 %v580_v58, %v5017_v4 }
  0xc5   :  { %7010 = vst [vmem:[#allocation46_spill] sm:$0xff] %v5225_v61  ;;  %193 = vbcast.lane.b32.xlu0 %v191_v27, 256  ;;  %151 = vbcast.lane.b32.xlu1 %v149_v62, 256  ;;  %v5233_v31 = vmul.f32 -100.0, %v650_v3   ;;  %v649_v20 = vand.u32 2147483647, %v625_v10  ;;  %v177_v27 = vrot.slane %v5041_v59, %v4952_v29 }
  0xc6   :  { %7011 = vst [vmem:[#allocation47_spill] sm:$0xff] %v5229_v11  ;;  %v652_v24 = vand.u32 2147483647, %v628_v51  ;;  %v573_v34 = vpop.permute.xlu0 %572 }
  0xc7   :  { %7012 = vst [vmem:[#allocation48_spill] sm:$0xff] %v5233_v31  ;;  %v594_v53 = vpop.permute.xlu1 %593  ;;  %v5241_v17 = vmul.f32 -100.0, %v649_v20   ;;  %v627_v58 = vsub.f32 %v573_v34, %v5017_v4  ;;  %v7044_v14 = vmov %v5233_v31  ;;  %v7051_v31 = vmov %v5211_v8 }
  0xc8   :  { %v5244_v62 = vmul.f32 -100.0, %v652_v24   ;;  %v630_v55 = vsub.f32 %v594_v53, %v5017_v4  ;;  %v7058_v8 = vmov %v5138_v23 }
  0xc9   :  { %207 = vbcast.lane.b32.xlu0 %v205_v26, 256  ;;  %165 = vbcast.lane.b32.xlu1 %v163_v60, 256  ;;  %7013 = vst [vmem:[#allocation49_spill] sm:$0xff] %v5241_v17  ;;  %v651_v45 = vand.u32 2147483647, %v627_v58  ;;  %v184_v26 = vrot.slane %v5041_v59, %v4970_v37  ;;  %v212_v58 = vrot.slane %v5041_v59, %v4983_v44  ;;  %v7045_v49 = vmov %v5241_v17 }
  0xca   :  { %7014 = vst [vmem:[#allocation50_spill] sm:$0xff] %v5244_v62  ;;  %v654_v3 = vand.u32 2147483647, %v630_v55  ;;  %v587_v10 = vpop.permute.xlu0 %586  ;;  %v226_v37 = vrot.slane %v5041_v59, %v4988_v47  ;;  %v7042_v63 = vmov %v5244_v62  ;;  %v7049_v62 = vmov %v5216_v6 }
  0xcb   :  { %v5247_v36 = vmul.f32 -100.0, %v651_v45   ;;  %v629_v51 = vsub.f32 %v587_v10, %v5017_v4  ;;  %v7052_v17 = vmov %v5213_v35  ;;  %v7056_v6 = vmov %v5165_v5 }
  0xcc   :  { %v5250_v43 = vmul.f32 -100.0, %v654_v3   ;;  %v7059_v35 = vmov %v5082_v48 }
  0xcd   :  { %221 = vbcast.lane.b32.xlu0 %v219_v28, 256  ;;  %179 = vbcast.lane.b32.xlu1 %v177_v27, 256  ;;  %7015 = vst [vmem:[#allocation51_spill] sm:$0xff] %v5247_v36  ;;  %v653_v60 = vand.u32 2147483647, %v629_v51  ;;  %v198_v28 = vrot.slane %v5041_v59, %v4975_v40  ;;  %v7043_v50 = vmov %v5247_v36  ;;  %v7050_v36 = vmov %v5218_v9 }
  0xce   :  { %7016 = vst [vmem:[#allocation52_spill] sm:$0xff] %v5250_v43  ;;  %v601_v20 = vpop.permute.xlu0 %600  ;;  %v7040_v54 = vmov %v5250_v43  ;;  %v7047_v43 = vmov %v5229_v11  ;;  %v7054_v11 = vmov %v5199_v30  ;;  %v7057_v9 = vmov %v5104_v7 }
  0xcf   :  { %v5254_v24 = vmul.f32 -100.0, %v653_v60   ;;  %v631_v34 = vsub.f32 %v601_v20, %v5017_v4  ;;  %v7061_v30 = vmov %v5073_v25 }
  0xd1   :  { %186 = vbcast.lane.b32.xlu1 %v184_v26, 256  ;;  %7017 = vst [vmem:[#allocation53_spill] sm:$0xff] %v5254_v24  ;;  %v655_v27 = vand.u32 2147483647, %v631_v34  ;;  %v7041_v21 = vmov %v5254_v24  ;;  %v7048_v24 = vmov %v5223_v32  ;;  %v7055_v32 = vmov %v5176_v56 }
  0xd2   :  { %v7062_v56 = vmov %v5020_v18 }
  0xd3   :  { %v5259_v53 = vmul.f32 -100.0, %v655_v27  }
  0xd5   :  { %200 = vbcast.lane.b32.xlu1 %v198_v28, 256  ;;  %7018 = vst [vmem:[#allocation54_spill] sm:$0xff] %v5259_v53  ;;  %v7039_v39 = vmov %v5259_v53  ;;  %v7046_v53 = vmov %v5225_v61  ;;  %v7053_v61 = vmov %v5195_v42  ;;  %v7060_v42 = vmov %v5025_v38 }
  0xd9   :  { %214 = vbcast.lane.b32.xlu1 %v212_v58, 256 }
  0xdd   :  { %228 = vbcast.lane.b32.xlu1 %v226_v37, 256 }
 0x119   :  { %v5265_v55 = vpop.permute.xlu0 %74  ;;  %v5267_v45 = vpop.permute.xlu1 %67 }
 0x11d   :  { %v5269_v4 = vpop.permute.xlu0 %102  ;;  %v5271_v3 = vpop.permute.xlu1 %81 }
 0x11e   :  { %7019 = vst [vmem:[#allocation55_spill] sm:$0xff] %v5269_v4 }
 0x121   :  { %v5273_v40 = vpop.permute.xlu0 %116  ;;  %v5275_v10 = vpop.permute.xlu1 %88 }
 0x122   :  { %7020 = vst [vmem:[#allocation56_spill] sm:$0xff] %v5273_v40 }
 0x125   :  { %v5277_v51 = vpop.permute.xlu0 %130  ;;  %v5279_v44 = vpop.permute.xlu1 %95 }
 0x126   :  { %7021 = vst [vmem:[#allocation57_spill] sm:$0xff] %v5277_v51  ;;  %7022 = vst [vmem:[#allocation58_spill] sm:$0xff] %v5279_v44 }
 0x129   :  { %v5281_v26 = vpop.permute.xlu0 %144  ;;  %v5283_v47 = vpop.permute.xlu1 %109 }
 0x12a   :  { %7023 = vst [vmem:[#allocation59_spill] sm:$0xff] %v5281_v26  ;;  %7024 = vst [vmem:[#allocation60_spill] sm:$0xff] %v5283_v47 }
 0x12d   :  { %v5285_v59 = vpop.permute.xlu0 %158  ;;  %v5287_v60 = vpop.permute.xlu1 %123 }
 0x12e   :  { %7025 = vst [vmem:[#allocation61_spill] sm:$0xff] %v5285_v59  ;;  %7026 = vst [vmem:[#allocation62_spill] sm:$0xff] %v5287_v60 }
 0x133   :  { %v5289_v20 = vpop.permute.xlu0 %172  ;;  %v5291_v34 = vpop.permute.xlu1 %137 }
 0x134   :  { %7027 = vst [vmem:[#allocation63_spill] sm:$0xff] %v5289_v20  ;;  %7028 = vst [vmem:[#allocation64_spill] sm:$0xff] %v5291_v34 }
 0x137   :  { %v5293_v28 = vpop.permute.xlu0 %193  ;;  %v5295_v27 = vpop.permute.xlu1 %151 }
 0x138   :  { %7029 = vst [vmem:[#allocation65_spill] sm:$0xff] %v5293_v28  ;;  %7030 = vst [vmem:[#allocation66_spill] sm:$0xff] %v5295_v27 }
 0x13b   :  { %v5297_v58 = vpop.permute.xlu0 %207  ;;  %v5299_v37 = vpop.permute.xlu1 %165 }
 0x13c   :  { %7031 = vst [vmem:[#allocation67_spill] sm:$0xff] %v5297_v58  ;;  %7032 = vst [vmem:[#allocation68_spill] sm:$0xff] %v5299_v37 }
 0x13f   :  { %v5301_v46 = vpop.permute.xlu0 %221  ;;  %v5303_v41 = vpop.permute.xlu1 %179 }
 0x140   :  { %7033 = vst [vmem:[#allocation69_spill] sm:$0xff] %v5301_v46  ;;  %7034 = vst [vmem:[#allocation70_spill] sm:$0xff] %v5303_v41 }
 0x143   :  { %v5305_v33 = vpop.permute.xlu1 %186 }
 0x144   :  { %7035 = vst [vmem:[#allocation71_spill] sm:$0xff] %v5305_v33 }
 0x147   :  { %v5307_v1 = vpop.permute.xlu1 %200 }
 0x148   :  { %7036 = vst [vmem:[#allocation72_spill] sm:$0xff] %v5307_v1 }
 0x14b   :  { %v5309_v15 = vpop.permute.xlu1 %214 }
 0x14c   :  { %7037 = vst [vmem:[#allocation73_spill] sm:$0xff] %v5309_v15 }
 0x14f   :  { %v5311_v22 = vpop.permute.xlu1 %228 }
 0x150   :  { %7038 = vst [vmem:[#allocation74_spill] sm:$0xff] %v5311_v22 }
 0x151 LB: > { %7063 = vst [vmem:[#allocation75_spill] sm:$0xff] %v4780_v39  ;;  %7064 = vst [vmem:[#allocation76_spill] sm:$0xff] %v4784_v54  ;;  %710 = vmax.xlane.f32.xlu0 %v4872_v56  ;;  %712 = vmax.xlane.f32.xlu1 %v4868_v30  ;;  %v4879_v5 = vmov 1.0   ;;  %v7086_v59 = vld [vmem:[#allocation61_spill] sm:$0xff]  ;;  %v7087_v27 = vld [vmem:[#allocation66_spill] sm:$0xff]  ;;  %s685_s3 = sadd.s32 1, %s4876_s3   ;;  %s4876_s3 = sphi %s5385_s3, %s685_s3   ;;  %v4872_v56 = vphi %v7062_v56, %v7203_v56   ;;  %v4868_v30 = vphi %v7061_v30, %v7202_v30   ;;  %v4864_v42 = vphi %v7060_v42, %v7201_v42   ;;  %v4860_v35 = vphi %v7059_v35, %v7200_v35   ;;  %v4856_v8 = vphi %v7058_v8, %v7199_v8   ;;  %v4852_v9 = vphi %v7057_v9, %v7198_v9   ;;  %v4848_v6 = vphi %v7056_v6, %v7197_v6   ;;  %v4844_v32 = vphi %v7055_v32, %v7196_v32   ;;  %v4840_v11 = vphi %v7054_v11, %v7195_v11   ;;  %v4836_v61 = vphi %v7053_v61, %v7194_v61   ;;  %v4832_v17 = vphi %v7052_v17, %v7193_v17   ;;  %v4828_v31 = vphi %v7051_v31, %v7192_v31   ;;  %v4824_v36 = vphi %v7050_v36, %v7191_v36   ;;  %v4820_v62 = vphi %v7049_v62, %v7190_v62   ;;  %v4816_v24 = vphi %v7048_v24, %v7189_v24   ;;  %v4812_v43 = vphi %v7047_v43, %v7188_v43   ;;  %v4808_v53 = vphi %v7046_v53, %v7187_v53   ;;  %v4804_v49 = vphi %v7045_v49, %v7186_v49   ;;  %v4800_v14 = vphi %v7044_v14, %v7185_v14   ;;  %v4796_v50 = vphi %v7043_v50, %v7184_v50   ;;  %v4792_v63 = vphi %v7042_v63, %v7183_v63   ;;  %v4788_v21 = vphi %v7041_v21, %v7182_v21   ;;  %v4784_v54 = vphi %v7040_v54, %v7181_v54   ;;  %v4780_v39 = vphi %v7039_v39, %v7180_v39  }
 0x152   : > { %7065 = vst [vmem:[#allocation77_spill] sm:$0xff] %v4788_v21  ;;  %7066 = vst [vmem:[#allocation78_spill] sm:$0xff] %v4792_v63  ;;  %3754 = vmatprep.subr.mxu0 %v4879_v5  ;;  %3958 = vmatprep.subr.mxu1 %v4879_v5  ;;  %v7088_v20 = vld [vmem:[#allocation63_spill] sm:$0xff]  ;;  %v7089_v37 = vld [vmem:[#allocation68_spill] sm:$0xff]  ;;  %p6066_p0 = scmp.ge.s32.totalorder %s685_s3, 4  }
 0x153   : > { %7067 = vst [vmem:[#allocation79_spill] sm:$0xff] %v4796_v50  ;;  %7068 = vst [vmem:[#allocation80_spill] sm:$0xff] %v4800_v14  ;;  %3755 = vmatpush3.msra.mxu0 %v4879_v5  ;;  %3974 = vmatpush3.msra.mxu1 %v4879_v5  ;;  %v7090_v33 = vld [vmem:[#allocation71_spill] sm:$0xff]  ;;  %v7092_v44 = vld [vmem:[#allocation58_spill] sm:$0xff]  ;;  %vm3475_vm1 = vcmask (%p6066_p0), 1041409   ;;  %vm3477_vm2 = vcmask (%p6066_p0), 1042434  }
 0x154   : > { %7069 = vst [vmem:[#allocation81_spill] sm:$0xff] %v4804_v49  ;;  %7070 = vst [vmem:[#allocation82_spill] sm:$0xff] %v4808_v53  ;;  %3756 = vmatprep.subr.mxu0 %v4879_v5  ;;  %3959 = vmatprep.subr.mxu1 %v4879_v5  ;;  %v7091_v4 = vld [vmem:[#allocation55_spill] sm:$0xff]  ;;  %v7093_v1 = vld [vmem:[#allocation72_spill] sm:$0xff]  ;;  %vm3479_vm3 = vcmask (%p6066_p0), 1043459   ;;  %vm3481_vm4 = vcmask (%p6066_p0), 1044484  }
 0x155   : > { %7071 = vst [vmem:[#allocation83_spill] sm:$0xff] %v4812_v43  ;;  %7072 = vst [vmem:[#allocation84_spill] sm:$0xff] %v4816_v24  ;;  %734 = vmax.xlane.f32.xlu0 %v4824_v36  ;;  %736 = vmax.xlane.f32.xlu1 %v4820_v62  ;;  %v7094_v41 = vld [vmem:[#allocation70_spill] sm:$0xff]  ;;  %v7095_v40 = vld [vmem:[#allocation56_spill] sm:$0xff]  ;;  %vm3483_vm5 = vcmask (%p6066_p0), 1045509   ;;  %vm3485_vm6 = vcmask (%p6066_p0), 1046534  }
 0x156   : > { %7073 = vst [vmem:[#allocation85_spill] sm:$0xff] %v4820_v62  ;;  %7074 = vst [vmem:[#allocation86_spill] sm:$0xff] %v4824_v36  ;;  %3757 = vmatpush3.msra.mxu0 %v4879_v5  ;;  %3975 = vmatpush3.msra.mxu1 %v4879_v5  ;;  %v7096_v51 = vld [vmem:[#allocation57_spill] sm:$0xff]  ;;  %v7098_v47 = vld [vmem:[#allocation60_spill] sm:$0xff]  ;;  %vm3487_vm7 = vcmask (%p6066_p0), 1047559   ;;  %vm3530_vm8 = vcmask (%p6066_p0), 130112  }
 0x157   : > { %7075 = vst [vmem:[#allocation87_spill] sm:$0xff] %v4828_v31  ;;  %7076 = vst [vmem:[#allocation88_spill] sm:$0xff] %v4832_v17  ;;  %3758 = vmatprep.subr.mxu0 %v4879_v5  ;;  %3960 = vmatprep.subr.mxu1 %v4879_v5  ;;  %v7097_v15 = vld [vmem:[#allocation73_spill] sm:$0xff]  ;;  %v7100_v26 = vld [vmem:[#allocation59_spill] sm:$0xff]  ;;  %s4883_s7 = smov (%p6066_p0), [#allocation2]   ;;  %vm3537_vm9 = vcmask (%p6066_p0), 195712  }
 0x158   : > { %7077 = vst [vmem:[#allocation89_spill] sm:$0xff] %v4836_v61  ;;  %7078 = vst [vmem:[#allocation90_spill] sm:$0xff] %v4840_v11  ;;  %3759 = vmatpush3.msra.mxu0 %v4879_v5  ;;  %3976 = vmatpush3.msra.mxu1 %v4879_v5  ;;  %v7099_v28 = vld [vmem:[#allocation65_spill] sm:$0xff]  ;;  %v7101_v60 = vld [vmem:[#allocation62_spill] sm:$0xff]  ;;  %s3548_s8 = sshll.u32 (%p6066_p0), %s4883_s7, 4  ;;  %vm3540_vm10 = vcmask (%p6066_p0), 188416   ;;  %s3549_s8 = int_to_ptr.vmem [resolvable:$true] %s3548_s8 }
 0x159   : > { %7079 = vst [vmem:[#allocation91_spill] sm:$0xff] %v4844_v32  ;;  %7080 = vst [vmem:[#allocation92_spill] sm:$0xff] %v4848_v6  ;;  %714 = vmax.xlane.f32.xlu0 %v4864_v42  ;;  %738 = vmax.xlane.f32.xlu1 %v4816_v24  ;;  %v7102_v22 = vld [vmem:[#allocation74_spill] sm:$0xff]  ;;  %v7103_v58 = vld [vmem:[#allocation67_spill] sm:$0xff]  ;;  %s4656_s9 = scalar_lea.vmem (%p6066_p0), %s3549_s8, 16  ;;  %s4660_s10 = scalar_lea.vmem (%p6066_p0), %s3549_s8, 32 }
 0x15a   : > { %7081 = vst [vmem:[#allocation93_spill] sm:$0xff] %v4852_v9  ;;  %7082 = vst [vmem:[#allocation94_spill] sm:$0xff] %v4856_v8  ;;  %3760 = vmatprep.subr.mxu0 %v4879_v5  ;;  %3961 = vmatprep.subr.mxu1 %v4879_v5  ;;  %v7104_v34 = vld [vmem:[#allocation64_spill] sm:$0xff]  ;;  %v7105_v46 = vld [vmem:[#allocation69_spill] sm:$0xff]  ;;  %p4657_p1 = scmp.ne.s32.totalorder (%p6066_p0), %s3549_s8, %s4656_s9  ;;  %p4661_p2 = scmp.lt.s32.totalorder (%p6066_p0), %s3549_s8, %s3549_s8 }
 0x15b   : > { %7083 = vst [vmem:[#allocation95_spill] sm:$0xff] %v4860_v35  ;;  %7084 = vst [vmem:[#allocation96_spill] sm:$0xff] %v4864_v42  ;;  %3761 = vmatpush3.msra.mxu0 %v4879_v5  ;;  %3977 = vmatpush3.msra.mxu1 %v4879_v5  ;;  %p4662_p3 = scmp.lt.s32.totalorder (%p6066_p0), %s4660_s10, %s4656_s9 }
 0x15c   : > { %7085 = vst [vmem:[#allocation97_spill] sm:$0xff] %v4872_v56  ;;  %3762 = vmatprep.subr.mxu0 %v4879_v5  ;;  %3962 = vmatprep.subr.mxu1 %v4879_v5 }
 0x15d   : > { %716 = vmax.xlane.f32.xlu0 %v4860_v35  ;;  %740 = vmax.xlane.f32.xlu1 %v4812_v43  ;;  %p4663_p4 = por (%p6066_p0), %p4662_p3, %p4661_p2 }
 0x15e   : > { %3763 = vmatpush3.msra.mxu0 %v4879_v5  ;;  %3978 = vmatpush3.msra.mxu1 %v4879_v5 }
 0x15f   : > { %3764 = vmatprep.subr.mxu0 %v4879_v5  ;;  %3963 = vmatprep.subr.mxu1 %v4879_v5  ;;  %p4664_p5 = pnand (%p6066_p0), %p4663_p4, %p4657_p1 }
 0x160   : > { %3765 = vmatpush3.msra.mxu0 %v4879_v5  ;;  %3979 = vmatpush3.msra.mxu1 %v4879_v5 }
 0x161   : > { %718 = vmax.xlane.f32.xlu0 %v4856_v8  ;;  %742 = vmax.xlane.f32.xlu1 %v4808_v53 }
 0x162   : > { %3766 = vmatprep.subr.mxu0 %v4879_v5  ;;  %3964 = vmatprep.subr.mxu1 %v4879_v5 }
 0x163   : > { %3767 = vmatpush3.msra.mxu0 %v4879_v5  ;;  %3980 = vmatpush3.msra.mxu1 %v4879_v5 }
 0x164   : > { %3768 = vmatprep.subr.mxu0 %v4879_v5  ;;  %3965 = vmatprep.subr.mxu1 %v4879_v5 }
 0x165   : > { %720 = vmax.xlane.f32.xlu0 %v4852_v9  ;;  %744 = vmax.xlane.f32.xlu1 %v4804_v49 }
 0x166   : > { %3769 = vmatpush3.msra.mxu0 %v4879_v5  ;;  %3981 = vmatpush3.msra.mxu1 %v4879_v5 }
 0x167   : > { %3770 = vmatprep.subr.mxu0 %v4879_v5  ;;  %3966 = vmatprep.subr.mxu1 %v4879_v5 }
 0x168   : > { %3771 = vmatpush3.msra.mxu0 %v4879_v5  ;;  %3982 = vmatpush3.msra.mxu1 %v4879_v5 }
 0x169   : > { %722 = vmax.xlane.f32.xlu0 %v4848_v6  ;;  %746 = vmax.xlane.f32.xlu1 %v4800_v14 }
 0x16a   : > { %3772 = vmatprep.subr.mxu0 %v4879_v5  ;;  %3967 = vmatprep.subr.mxu1 %v4879_v5 }
 0x16b   : > { %3773 = vmatpush3.msra.mxu0 %v4879_v5  ;;  %3983 = vmatpush3.msra.mxu1 %v4879_v5 }
 0x16c   : > { %3774 = vmatprep.subr.mxu0 %v4879_v5  ;;  %3968 = vmatprep.subr.mxu1 %v4879_v5 }
 0x16d   : > { %724 = vmax.xlane.f32.xlu0 %v4844_v32  ;;  %748 = vmax.xlane.f32.xlu1 %v4796_v50 }
 0x16e   : > { %3775 = vmatpush3.msra.mxu0 %v4879_v5  ;;  %3984 = vmatpush3.msra.mxu1 %v4879_v5 }
 0x16f   : > { %3776 = vmatprep.subr.mxu0 %v4879_v5  ;;  %3969 = vmatprep.subr.mxu1 %v4879_v5 }
 0x170   : > { %3777 = vmatpush3.msra.mxu0 %v4879_v5  ;;  %3985 = vmatpush3.msra.mxu1 %v4879_v5 }
 0x171   : > { %726 = vmax.xlane.f32.xlu0 %v4840_v11  ;;  %750 = vmax.xlane.f32.xlu1 %v4792_v63 }
 0x172   : > { %3778 = vmatprep.subr.mxu0 %v4879_v5  ;;  %3970 = vmatprep.subr.mxu1 %v4879_v5 }
 0x173   : > { %3779 = vmatpush3.msra.mxu0 %v4879_v5  ;;  %3986 = vmatpush3.msra.mxu1 %v4879_v5 }
 0x174   : > { %3780 = vmatprep.subr.mxu0 %v4879_v5  ;;  %3971 = vmatprep.subr.mxu1 %v4879_v5 }
 0x175   : > { %728 = vmax.xlane.f32.xlu0 %v4836_v61  ;;  %752 = vmax.xlane.f32.xlu1 %v4788_v21 }
 0x176   : > { %3781 = vmatpush3.msra.mxu0 %v4879_v5  ;;  %3987 = vmatpush3.msra.mxu1 %v4879_v5 }
 0x177   : > { %3782 = vmatprep.subr.mxu0 %v4879_v5  ;;  %3972 = vmatprep.subr.mxu1 %v4879_v5 }
 0x178   : > { %3783 = vmatpush3.msra.mxu0 %v4879_v5  ;;  %3988 = vmatpush3.msra.mxu1 %v4879_v5 }
 0x179   : > { %730 = vmax.xlane.f32.xlu0 %v4832_v17  ;;  %754 = vmax.xlane.f32.xlu1 %v4784_v54 }
 0x17a   : > { %3784 = vmatprep.subr.mxu0 %v4879_v5  ;;  %3973 = vmatprep.subr.mxu1 %v4879_v5 }
 0x17b   : > { %3785 = vmatpush3.msra.mxu0 %v4879_v5  ;;  %3989 = vmatpush3.msra.mxu1 %v4879_v5 }
 0x17d   : > { %732 = vmax.xlane.f32.xlu0 %v4828_v31  ;;  %756 = vmax.xlane.f32.xlu1 %v4780_v39 }
 0x1da   : > { %v5550_v7 = vpop.xlane.xlu0 %710  ;;  %v5552_v23 = vpop.xlane.xlu1 %712 }
 0x1db   : > { %v758_v48 = vsub.f32 %v4872_v56, %v5550_v7  ;;  %v759_v38 = vsub.f32 %v4868_v30, %v5552_v23 }
 0x1dd   : > { %v782_v25 = vmul.f32 1.442695, %v758_v48  ;;  %v784_v18 = vmul.f32 1.442695, %v759_v38 }
 0x1de   : > { %v5558_v2 = vpop.xlane.xlu0 %734  ;;  %v5560_v12 = vpop.xlane.xlu1 %736 }
 0x1df   : > { %4222 = vpow2.f32 %v782_v25  ;;  %v770_v5 = vsub.f32 %v4824_v36, %v5558_v2  ;;  %v771_v19 = vsub.f32 %v4820_v62, %v5560_v12 }
 0x1e0   : > { %4224 = vpow2.f32 %v784_v18 }
 0x1e1   : > { %v806_v16 = vmul.f32 1.442695, %v770_v5  ;;  %v808_v52 = vmul.f32 1.442695, %v771_v19 }
 0x1e2   : > { %v5566_v57 = vpop.xlane.xlu0 %714  ;;  %v5568_v13 = vpop.xlane.xlu1 %738 }
 0x1e3   : > { %4226 = vpow2.f32 %v806_v16  ;;  %v760_v38 = vsub.f32 %v4864_v42, %v5566_v57  ;;  %v772_v25 = vsub.f32 %v4816_v24, %v5568_v13 }
 0x1e4   : > { %4228 = vpow2.f32 %v808_v52 }
 0x1e5   : > { %v786_v48 = vmul.f32 1.442695, %v760_v38  ;;  %v810_v29 = vmul.f32 1.442695, %v772_v25 }
 0x1e6   : > { %v5574_v0 = vpop.xlane.xlu0 %716  ;;  %v5576_v56 = vpop.xlane.xlu1 %740 }
 0x1e7   : > { %4230 = vpow2.f32 %v786_v48  ;;  %v761_v18 = vsub.f32 %v4860_v35, %v5574_v0  ;;  %v773_v16 = vsub.f32 %v4812_v43, %v5576_v56 }
 0x1e8   : > { %4232 = vpow2.f32 %v810_v29 }
 0x1e9   : > { %v788_v19 = vmul.f32 1.442695, %v761_v18  ;;  %v812_v5 = vmul.f32 1.442695, %v773_v16 }
 0x1ea   : > { %v5582_v42 = vpop.xlane.xlu0 %718  ;;  %v5584_v24 = vpop.xlane.xlu1 %742 }
 0x1eb   : > { %4234 = vpow2.f32 %v788_v19  ;;  %v762_v52 = vsub.f32 %v4856_v8, %v5582_v42  ;;  %v774_v38 = vsub.f32 %v4808_v53, %v5584_v24 }
 0x1ec   : > { %v4223_v25 = vpop.eup %4222  ;;  %4236 = vpow2.f32 %v812_v5 }
 0x1ed   : > { %v4225_v48 = vpop.eup %4224  ;;  %v790_v35 = vmul.f32 1.442695, %v762_v52  ;;  %v814_v36 = vmul.f32 1.442695, %v774_v38  ;;  %3786 = vmatprep.mubr.f32.mxu0 %v4223_v25 }
 0x1ee   : > { %3787 = vmatmul.mubr.f32.vlgmr.msra.gmra.mxu0 %v4225_v48  ;;  %v5590_v29 = vpop.xlane.xlu0 %720  ;;  %v5592_v18 = vpop.xlane.xlu1 %744 }
 0x1ef   : > { %4238 = vpow2.f32 %v790_v35  ;;  %v763_v16 = vsub.f32 %v4852_v9, %v5590_v29  ;;  %v775_v19 = vsub.f32 %v4804_v49, %v5592_v18 }
 0x1f0   : > { %v4227_v8 = vpop.eup %4226  ;;  %4240 = vpow2.f32 %v814_v36 }
 0x1f1   : > { %v4229_v53 = vpop.eup %4228  ;;  %v792_v5 = vmul.f32 1.442695, %v763_v16  ;;  %v816_v43 = vmul.f32 1.442695, %v775_v19  ;;  %3804 = vmatprep.mubr.f32.mxu1 %v4227_v8 }
 0x1f2   : > { %v5598_v52 = vpop.xlane.xlu0 %722  ;;  %3805 = vmatmul.mubr.f32.vlgmr.msra.gmra.mxu1 %v4229_v53  ;;  %v5600_v38 = vpop.xlane.xlu1 %746 }
 0x1f3   : > { %4242 = vpow2.f32 %v792_v5  ;;  %v764_v35 = vsub.f32 %v4848_v6, %v5598_v52  ;;  %v776_v25 = vsub.f32 %v4800_v14, %v5600_v38 }
 0x1f4   : > { %v4231_v48 = vpop.eup %4230  ;;  %4244 = vpow2.f32 %v816_v43 }
 0x1f5   : > { %v4233_v9 = vpop.eup %4232  ;;  %v794_v36 = vmul.f32 1.442695, %v764_v35  ;;  %v818_v49 = vmul.f32 1.442695, %v776_v25  ;;  %3789 = vmatprep.mubr.f32.mxu0 %v4231_v48 }
 0x1f6   : > { %v5606_v16 = vpop.xlane.xlu0 %724  ;;  %v5608_v8 = vpop.xlane.xlu1 %748  ;;  %3807 = vmatprep.mubr.f32.mxu1 %v4233_v9 }
 0x1f7   : > { %4246 = vpow2.f32 %v794_v36  ;;  %v765_v53 = vsub.f32 %v4844_v32, %v5606_v16  ;;  %v777_v19 = vsub.f32 %v4796_v50, %v5608_v8 }
 0x1f8   : > { %v4235_v5 = vpop.eup %4234  ;;  %4248 = vpow2.f32 %v818_v49 }
 0x1f9   : > { %v4237_v14 = vpop.eup %4236  ;;  %v796_v43 = vmul.f32 1.442695, %v765_v53  ;;  %v820_v6 = vmul.f32 1.442695, %v777_v19  ;;  %3790 = vmatmul.mubr.f32.gmra.mxu0 %v4235_v5 }
 0x1fa   : > { %3808 = vmatmul.mubr.f32.gmra.mxu1 %v4237_v14  ;;  %v5614_v35 = vpop.xlane.xlu0 %726  ;;  %v5616_v25 = vpop.xlane.xlu1 %750 }
 0x1fb   : > { %4250 = vpow2.f32 %v796_v43  ;;  %v766_v9 = vsub.f32 %v4840_v11, %v5614_v35  ;;  %v778_v48 = vsub.f32 %v4792_v63, %v5616_v25 }
 0x1fc   : > { %v4239_v36 = vpop.eup %4238  ;;  %4252 = vpow2.f32 %v820_v6 }
 0x1fd   : > { %v4241_v32 = vpop.eup %4240  ;;  %v798_v49 = vmul.f32 1.442695, %v766_v9  ;;  %v822_v50 = vmul.f32 1.442695, %v778_v48  ;;  %3792 = vmatprep.mubr.f32.mxu0 %v4239_v36 }
 0x1fe   : > { %v5622_v53 = vpop.xlane.xlu0 %728  ;;  %v5624_v14 = vpop.xlane.xlu1 %752  ;;  %3810 = vmatprep.mubr.f32.mxu1 %v4241_v32 }
 0x1ff   : > { %4254 = vpow2.f32 %v798_v49  ;;  %v767_v19 = vsub.f32 %v4836_v61, %v5622_v53  ;;  %v779_v5 = vsub.f32 %v4788_v21, %v5624_v14 }
 0x200   : > { %v4243_v43 = vpop.eup %4242  ;;  %4256 = vpow2.f32 %v822_v50 }
 0x201   : > { %v4245_v63 = vpop.eup %4244  ;;  %v800_v6 = vmul.f32 1.442695, %v767_v19  ;;  %v824_v11 = vmul.f32 1.442695, %v779_v5  ;;  %3793 = vmatmul.mubr.f32.gmra.mxu0 %v4243_v43 }
 0x202   : > { %3811 = vmatmul.mubr.f32.gmra.mxu1 %v4245_v63  ;;  %v5630_v9 = vpop.xlane.xlu0 %730  ;;  %v5632_v48 = vpop.xlane.xlu1 %754 }
 0x203   : > { %4258 = vpow2.f32 %v800_v6  ;;  %v768_v32 = vsub.f32 %v4832_v17, %v5630_v9  ;;  %v780_v36 = vsub.f32 %v4784_v54, %v5632_v48 }
 0x204   : > { %v4247_v49 = vpop.eup %4246  ;;  %4260 = vpow2.f32 %v824_v11 }
 0x205   : > { %v4249_v21 = vpop.eup %4248  ;;  %v802_v50 = vmul.f32 1.442695, %v768_v32  ;;  %v826_v61 = vmul.f32 1.442695, %v780_v36  ;;  %3795 = vmatprep.mubr.f32.mxu0 %v4247_v49 }
 0x206   : > { %v5638_v19 = vpop.xlane.xlu0 %732  ;;  %v5640_v63 = vpop.xlane.xlu1 %756  ;;  %3813 = vmatprep.mubr.f32.mxu1 %v4249_v21 }
 0x207   : > { %4262 = vpow2.f32 %v802_v50  ;;  %v769_v5 = vsub.f32 %v4828_v31, %v5638_v19  ;;  %v781_v43 = vsub.f32 %v4780_v39, %v5640_v63 }
 0x208   : > { %v4251_v6 = vpop.eup %4250  ;;  %4264 = vpow2.f32 %v826_v61 }
 0x209   : > { %v4253_v54 = vpop.eup %4252  ;;  %v804_v11 = vmul.f32 1.442695, %v769_v5  ;;  %v828_v17 = vmul.f32 1.442695, %v781_v43  ;;  %3796 = vmatmul.mubr.f32.gmra.mxu0 %v4251_v6  ;;  %v4880_v5 = vmov 0  }
 0x20a   : > { %3814 = vmatmul.mubr.f32.gmra.mxu1 %v4253_v54  ;;  %4220 = vset.pattern.permute.xlu1 %v4880_v5 }
 0x20b   : > { %4266 = vpow2.f32 %v804_v11  ;;  %4221 = vset.pattern.permute.xlu0 %v4880_v5 }
 0x20c   : > { %v4255_v32 = vpop.eup %4254  ;;  %4268 = vpow2.f32 %v828_v17 }
 0x20d   : > { %v4257_v36 = vpop.eup %4256  ;;  %3798 = vmatprep.mubr.f32.mxu0 %v4255_v32 }
 0x20e   : > { %3816 = vmatprep.mubr.f32.mxu1 %v4257_v36 }
 0x210   : > { %v4259_v21 = vpop.eup %4258 }
 0x211   : > { %v4261_v49 = vpop.eup %4260  ;;  %3799 = vmatmul.mubr.f32.gmra.mxu0 %v4259_v21 }
 0x212   : > { %3817 = vmatmul.mubr.f32.gmra.mxu1 %v4261_v49 }
 0x214   : > { %v4263_v50 = vpop.eup %4262 }
 0x215   : > { %v4265_v31 = vpop.eup %4264  ;;  %3801 = vmatprep.mubr.f32.mxu0 %v4263_v50 }
 0x216   : > { %3819 = vmatprep.mubr.f32.mxu1 %v4265_v31 }
 0x218   : > { %v4267_v61 = vpop.eup %4266 }
 0x219   : > { %v4269_v39 = vpop.eup %4268  ;;  %3802 = vmatmul.mubr.f32.gmra.mxu0 %v4267_v61 }
 0x21a   : > { %3820 = vmatmul.mubr.f32.gmra.mxu1 %v4269_v39 }
 0x2ae   : > { %v3788_v54 = vpop.f32.mrf.mxu0 }
 0x2af   : > { %4270 = vlog2.f32 %v3788_v54 }
 0x2b0   : > { %v896_v17 = vpop.f32.mrf.mxu0 }
 0x2b1   : > { %4272 = vlog2.f32 %v896_v17 }
 0x2b2   : > { %v3806_v43 = vpop.f32.mrf.mxu1 }
 0x2b3   : > { %4274 = vlog2.f32 %v3806_v43 }
 0x2b4   : > { %v956_v6 = vpop.f32.mrf.mxu1 }
 0x2b5   : > { %4276 = vlog2.f32 %v956_v6 }
 0x2b9   : > { %v3791_v11 = vpop.f32.mrf.mxu0 }
 0x2ba   : > { %4278 = vlog2.f32 %v3791_v11  ;;  %v3809_v32 = vpop.f32.mrf.mxu1 }
 0x2bb   : > { %4280 = vlog2.f32 %v3809_v32  ;;  %v906_v31 = vpop.f32.mrf.mxu0 }
 0x2bc   : > { %v4271_v36 = vpop.eup %4270  ;;  %4282 = vlog2.f32 %v906_v31  ;;  %v966_v21 = vpop.f32.mrf.mxu1 }
 0x2bd   : > { %v1018_v39 = vmul.f32 0.6931472, %v4271_v36  ;;  %4284 = vlog2.f32 %v966_v21 }
 0x2be   : > { %v4273_v49 = vpop.eup %4272 }
 0x2bf   : > { %v1064_v50 = vadd.f32 %v1018_v39, %v5552_v23  ;;  %v1016_v5 = vmul.f32 0.6931472, %v4273_v49 }
 0x2c0   : > { %v4275_v61 = vpop.eup %4274 }
 0x2c1   : > { %v1042_v54 = vmul.f32 0.6931472, %v4275_v61  ;;  %v3794_v17 = vpop.f32.mrf.mxu0  ;;  %v1088_v43 = vsub.f32 %v5265_v55, %v1064_v50  ;;  %v1063_v39 = vadd.f32 %v1016_v5, %v5550_v7 }
 0x2c2   : > { %v4277_v6 = vpop.eup %4276  ;;  %4286 = vlog2.f32 %v3794_v17  ;;  %v3812_v11 = vpop.f32.mrf.mxu1 }
 0x2c3   : > { %v1040_v62 = vmul.f32 0.6931472, %v4277_v6  ;;  %4288 = vlog2.f32 %v3812_v11  ;;  %v916_v32 = vpop.f32.mrf.mxu0  ;;  %1118 = vperm.xlu1 %4220, %v1088_v43   ;;  %v1076_v31 = vadd.f32 %v1042_v54, %v5560_v12  ;;  %v1087_v12 = vsub.f32 %v5267_v45, %v1063_v39 }
 0x2c4   : > { %4290 = vlog2.f32 %v916_v32  ;;  %v976_v36 = vpop.f32.mrf.mxu1 }
 0x2c5   : > { %v1100_v21 = vsub.f32 %v7086_v59, %v1076_v31  ;;  %v1075_v23 = vadd.f32 %v1040_v62, %v5558_v2  ;;  %4292 = vlog2.f32 %v976_v36 }
 0x2c7   : > { %v4279_v49 = vpop.eup %4278  ;;  %1178 = vperm.xlu0 %4221, %v1100_v21   ;;  %v1099_v50 = vsub.f32 %v7087_v27, %v1075_v23 }
 0x2c8   : > { %v4281_v61 = vpop.eup %4280  ;;  %v1022_v17 = vmul.f32 0.6931472, %v4279_v49 }
 0x2c9   : > { %v4283_v6 = vpop.eup %4282  ;;  %v1046_v11 = vmul.f32 0.6931472, %v4281_v61  ;;  %v3797_v43 = vpop.f32.mrf.mxu0  ;;  %1173 = vperm.xlu1 %4220, %v1099_v50  }
 0x2ca   : > { %v4285_v54 = vpop.eup %4284  ;;  %v1020_v32 = vmul.f32 0.6931472, %v4283_v6  ;;  %4294 = vlog2.f32 %v3797_v43  ;;  %v3815_v31 = vpop.f32.mrf.mxu1  ;;  %v1066_v2 = vadd.f32 %v1022_v17, %v5574_v0 }
 0x2cb   : > { %4296 = vlog2.f32 %v3815_v31  ;;  %1113 = vperm.xlu0 %4221, %v1087_v12   ;;  %v1078_v7 = vadd.f32 %v1046_v11, %v5576_v56  ;;  %v1044_v62 = vmul.f32 0.6931472, %v4285_v54  ;;  %v926_v21 = vpop.f32.mrf.mxu0 }
 0x2cc   : > { %v1090_v5 = vsub.f32 %v5275_v10, %v1066_v2  ;;  %v1065_v36 = vadd.f32 %v1020_v32, %v5566_v57  ;;  %v986_v49 = vpop.f32.mrf.mxu1  ;;  %4298 = vlog2.f32 %v926_v21 }
 0x2cd   : > { %v1102_v23 = vsub.f32 %v7088_v20, %v1078_v7  ;;  %v1077_v17 = vadd.f32 %v1044_v62, %v5568_v13  ;;  %4300 = vlog2.f32 %v986_v49 }
 0x2ce   : > { %1128 = vperm.xlu1 %4220, %v1090_v5   ;;  %v1089_v0 = vsub.f32 %v5271_v3, %v1065_v36 }
 0x2cf   : > { %v4287_v39 = vpop.eup %4286  ;;  %1188 = vperm.xlu0 %4221, %v1102_v23   ;;  %v1101_v54 = vsub.f32 %v7089_v37, %v1077_v17 }
 0x2d0   : > { %v4289_v50 = vpop.eup %4288  ;;  %v1026_v61 = vmul.f32 0.6931472, %v4287_v39 }
 0x2d1   : > { %v4291_v56 = vpop.eup %4290  ;;  %v1050_v6 = vmul.f32 0.6931472, %v4289_v50  ;;  %v3800_v11 = vpop.f32.mrf.mxu0 }
 0x2d2   : > { %4302 = vlog2.f32 %v3800_v11  ;;  %v3818_v57 = vpop.f32.mrf.mxu1  ;;  %1123 = vperm.xlu1 %4220, %v1089_v0   ;;  %v1024_v12 = vmul.f32 0.6931472, %v4291_v56  ;;  %v1068_v32 = vadd.f32 %v1026_v61, %v5590_v29  ;;  %v4293_v31 = vpop.eup %4292 }
 0x2d3   : > { %4304 = vlog2.f32 %v3818_v57  ;;  %v1080_v43 = vadd.f32 %v1050_v6, %v5592_v18  ;;  %v936_v2 = vpop.f32.mrf.mxu0  ;;  %v1048_v5 = vmul.f32 0.6931472, %v4293_v31 }
 0x2d4   : > { %4306 = vlog2.f32 %v936_v2  ;;  %v996_v36 = vpop.f32.mrf.mxu1  ;;  %v1092_v21 = vsub.f32 %v7091_v4, %v1068_v32  ;;  %v1067_v18 = vadd.f32 %v1024_v12, %v5582_v42 }
 0x2d5   : > { %v1104_v7 = vsub.f32 %v7090_v33, %v1080_v43  ;;  %v1079_v0 = vadd.f32 %v1048_v5, %v5584_v24 }
 0x2d6   : > { %1183 = vperm.xlu1 %4220, %v1101_v54   ;;  %v1091_v61 = vsub.f32 %v7092_v44, %v1067_v18 }
 0x2d7   : > { %v4295_v13 = vpop.eup %4294  ;;  %1198 = vperm.xlu0 %4221, %v1104_v7  }
 0x2d8   : > { %v4297_v62 = vpop.eup %4296  ;;  %v1030_v29 = vmul.f32 0.6931472, %v4295_v13 }
 0x2d9   : > { %v1054_v23 = vmul.f32 0.6931472, %v4297_v62  ;;  %v3803_v49 = vpop.f32.mrf.mxu0  ;;  %v4299_v17 = vpop.eup %4298 }
 0x2da   : > { %4308 = vlog2.f32 %v3803_v49  ;;  %v3821_v39 = vpop.f32.mrf.mxu1  ;;  %1138 = vperm.xlu1 %4220, %v1092_v21   ;;  %v4301_v11 = vpop.eup %4300  ;;  %v1070_v57 = vadd.f32 %v1030_v29, %v5606_v16  ;;  %v1028_v12 = vmul.f32 0.6931472, %v4299_v17 }
 0x2db   : > { %4310 = vlog2.f32 %v3821_v39  ;;  %v1082_v50 = vadd.f32 %v1054_v23, %v5608_v8  ;;  %v946_v56 = vpop.f32.mrf.mxu0  ;;  %v1103_v8 = vsub.f32 %v7094_v41, %v1079_v0  ;;  %v1052_v2 = vmul.f32 0.6931472, %v4301_v11 }
 0x2dc   : > { %4312 = vlog2.f32 %v996_v36  ;;  %v1006_v31 = vpop.f32.mrf.mxu1  ;;  %v1094_v7 = vsub.f32 %v7095_v40, %v1070_v57  ;;  %v1069_v16 = vadd.f32 %v1028_v12, %v5598_v52 }
 0x2dd   : > { %v1106_v6 = vsub.f32 %v7093_v1, %v1082_v50  ;;  %4314 = vlog2.f32 %v946_v56  ;;  %v1081_v21 = vadd.f32 %v1052_v2, %v5600_v38 }
 0x2de   : > { %1133 = vperm.xlu1 %4220, %v1091_v61   ;;  %4316 = vlog2.f32 %v1006_v31  ;;  %v1093_v39 = vsub.f32 %v7098_v47, %v1069_v16  ;;  %v7107_v16 = vld [vmem:[#allocation86_spill] sm:$0xff] }
 0x2df   : > { %v4303_v42 = vpop.eup %4302  ;;  %1208 = vperm.xlu0 %4221, %v1106_v6   ;;  %v1105_v52 = vsub.f32 %v7099_v28, %v1081_v21 }
 0x2e0   : > { %v4305_v43 = vpop.eup %4304  ;;  %v1034_v54 = vmul.f32 0.6931472, %v4303_v42 }
 0x2e1   : > { %v1058_v32 = vmul.f32 0.6931472, %v4305_v43  ;;  %v4307_v5 = vpop.eup %4306 }
 0x2e2   : > { %1193 = vperm.xlu1 %4220, %v1103_v8   ;;  %v1072_v24 = vadd.f32 %v1034_v54, %v5622_v53  ;;  %v1032_v23 = vmul.f32 0.6931472, %v4307_v5 }
 0x2e3   : > { %v1084_v62 = vadd.f32 %v1058_v32, %v5624_v14 }
 0x2e4   : > { %v1096_v13 = vsub.f32 %v7096_v51, %v1072_v24  ;;  %v1071_v38 = vadd.f32 %v1032_v23, %v5614_v35  ;;  %v7108_v23 = vld [vmem:[#allocation97_spill] sm:$0xff] }
 0x2e5   : > { %v1108_v53 = vsub.f32 %v7097_v15, %v1084_v62 }
 0x2e6   : > { %1158 = vperm.xlu0 %4221, %v1096_v13   ;;  %1148 = vperm.xlu1 %4220, %v1094_v7   ;;  %v1095_v11 = vsub.f32 %v7101_v60, %v1071_v38  ;;  %v7106_v7 = vld [vmem:[#allocation85_spill] sm:$0xff] }
 0x2e7   : > { %v4309_v36 = vpop.eup %4308 }
 0x2e8   : > { %v4311_v18 = vpop.eup %4310  ;;  %v1038_v49 = vmul.f32 0.6931472, %v4309_v36 }
 0x2e9   : > { %v4313_v29 = vpop.eup %4312  ;;  %v1062_v50 = vmul.f32 0.6931472, %v4311_v18 }
 0x2ea   : > { %1218 = vperm.xlu0 %4221, %v1108_v53   ;;  %1143 = vperm.xlu1 %4220, %v1093_v39   ;;  %v1074_v14 = vadd.f32 %v1038_v49, %v5638_v19  ;;  %v1056_v61 = vmul.f32 0.6931472, %v4313_v29  ;;  %v4315_v56 = vpop.eup %4314 }
 0x2eb   : > { %v1086_v17 = vadd.f32 %v1062_v50, %v5640_v63  ;;  %v1036_v6 = vmul.f32 0.6931472, %v4315_v56  ;;  %v4317_v19 = vpop.eup %4316 }
 0x2ec   : > { %v1098_v0 = vsub.f32 %v7100_v26, %v1074_v14  ;;  %v1083_v57 = vadd.f32 %v1056_v61, %v5616_v25  ;;  %v1060_v43 = vmul.f32 0.6931472, %v4317_v19 }
 0x2ed   : > { %v1110_v42 = vsub.f32 %v7102_v22, %v1086_v17  ;;  %v1073_v35 = vadd.f32 %v1036_v6, %v5630_v9 }
 0x2ee   : > { %1168 = vperm.xlu0 %4221, %v1098_v0   ;;  %1203 = vperm.xlu1 %4220, %v1105_v52   ;;  %v1107_v12 = vsub.f32 %v7103_v58, %v1083_v57  ;;  %v1085_v54 = vadd.f32 %v1060_v43, %v5632_v48  ;;  %v7109_v52 = vld [vmem:[#allocation95_spill] sm:$0xff] }
 0x2ef   : > { %v1097_v63 = vsub.f32 %v7104_v34, %v1073_v35 }
 0x2f0   : > { %v1109_v8 = vsub.f32 %v7105_v46, %v1085_v54 }
 0x2f2   : > { %1153 = vperm.xlu1 %4220, %v1095_v11   ;;  %1228 = vperm.xlu0 %4221, %v1110_v42   ;;  %v7110_v42 = vld [vmem:[#allocation83_spill] sm:$0xff] }
 0x2f6   : > { %1213 = vperm.xlu1 %4220, %v1107_v12  }
 0x2fa   : > { %1163 = vperm.xlu1 %4220, %v1097_v63  }
 0x2fe   : > { %1223 = vperm.xlu1 %4220, %v1109_v8  }
 0x33e   : > { %v1119_v32 = vpop.permute.xlu1 %1118 }
 0x33f   : > { %v5695_v25 = vadd.f32 %v4868_v30, %v1119_v32  ;;  %v7111_v32 = vld [vmem:[#allocation96_spill] sm:$0xff] }
 0x341   : > { %v1261_v31 = vrot.slane %v5695_v25, 4 }
 0x342   : > { %v1179_v24 = vpop.permute.xlu0 %1178 }
 0x343   : > { %v1262_v2 = vmax.f32 %v5695_v25, %v1261_v31  ;;  %v5700_v9 = vadd.f32 %v7106_v7, %v1179_v24 }
 0x344   : > { %v1174_v13 = vpop.permute.xlu1 %1173 }
 0x345   : > { %v1263_v62 = vrot.slane %v1262_v2, 2  ;;  %v1333_v48 = vrot.slane %v5700_v9, 4  ;;  %v5704_v5 = vadd.f32 %v7107_v16, %v1174_v13 }
 0x346   : > { %v1114_v36 = vpop.permute.xlu0 %1113 }
 0x347   : > { %v1264_v21 = vmax.f32 %v1262_v2, %v1263_v62  ;;  %v1334_v30 = vmax.f32 %v5700_v9, %v1333_v48  ;;  %v1327_v18 = vrot.slane %v5704_v5, 4  ;;  %v5709_v49 = vadd.f32 %v7108_v23, %v1114_v36 }
 0x349   : > { %v1265_v53 = vrot.slane %v1264_v21, 1  ;;  %v1335_v39 = vrot.slane %v1334_v30, 2  ;;  %v1328_v29 = vmax.f32 %v5704_v5, %v1327_v18  ;;  %v1255_v50 = vrot.slane %v5709_v49, 4  ;;  %v1129_v14 = vpop.permute.xlu1 %1128 }
 0x34a   : > { %v5714_v61 = vadd.f32 %v7109_v52, %v1129_v14  ;;  %v1189_v0 = vpop.permute.xlu0 %1188 }
 0x34b   : > { %v5716_v38 = vmax.f32 %v1264_v21, %v1265_v53  ;;  %v1336_v17 = vmax.f32 %v1334_v30, %v1335_v39  ;;  %v1329_v56 = vrot.slane %v1328_v29, 2  ;;  %v1256_v6 = vmax.f32 %v5709_v49, %v1255_v50  ;;  %v7112_v50 = vld [vmem:[#allocation84_spill] sm:$0xff] }
 0x34c   : > { %v1273_v11 = vrot.slane %v5714_v61, 4  ;;  %v5721_v57 = vadd.f32 %v7110_v42, %v1189_v0 }
 0x34d   : > { %v1400_v19 = vsub.f32 %v5695_v25, %v5716_v38  ;;  %v1337_v43 = vrot.slane %v1336_v17, 1  ;;  %v1330_v12 = vmax.f32 %v1328_v29, %v1329_v56  ;;  %v1257_v35 = vrot.slane %v1256_v6, 2  ;;  %v1124_v63 = vpop.permute.xlu1 %1123  ;;  %v7113_v56 = vld [vmem:[#allocation81_spill] sm:$0xff] }
 0x34e   : > { %v1274_v54 = vmax.f32 %v5714_v61, %v1273_v11  ;;  %v1345_v8 = vrot.slane %v5721_v57, 4  ;;  %v5728_v31 = vadd.f32 %v7111_v32, %v1124_v63 }
 0x34f   : > { %v1425_v24 = vmul.f32 1.442695, %v1400_v19  ;;  %v5730_v2 = vmax.f32 %v1336_v17, %v1337_v43  ;;  %v1331_v7 = vrot.slane %v1330_v12, 1  ;;  %v1258_v13 = vmax.f32 %v1256_v6, %v1257_v35 }
 0x350   : > { %v1275_v62 = vrot.slane %v1274_v54, 2  ;;  %v1346_v48 = vmax.f32 %v5721_v57, %v1345_v8  ;;  %v1267_v16 = vrot.slane %v5728_v31, 4 }
 0x351   : > { %4318 = vpow2.f32 %v1425_v24  ;;  %v1412_v36 = vsub.f32 %v5700_v9, %v5730_v2  ;;  %v5736_v21 = vmax.f32 %v1330_v12, %v1331_v7  ;;  %v1259_v30 = vrot.slane %v1258_v13, 1  ;;  %v1184_v18 = vpop.permute.xlu1 %1183 }
 0x352   : > { %v1276_v23 = vmax.f32 %v1274_v54, %v1275_v62  ;;  %v1347_v53 = vrot.slane %v1346_v48, 2  ;;  %v1268_v39 = vmax.f32 %v5728_v31, %v1267_v16  ;;  %v1199_v29 = vpop.permute.xlu0 %1198  ;;  %v5740_v14 = vadd.f32 %v7112_v50, %v1184_v18 }
 0x353   : > { %v1449_v52 = vmul.f32 1.442695, %v1412_v36  ;;  %v1411_v0 = vsub.f32 %v5704_v5, %v5736_v21  ;;  %v5744_v17 = vmax.f32 %v1258_v13, %v1259_v30  ;;  %v5747_v6 = vadd.f32 %v7113_v56, %v1199_v29 }
 0x354   : > { %v1277_v11 = vrot.slane %v1276_v23, 1  ;;  %v1348_v42 = vmax.f32 %v1346_v48, %v1347_v53  ;;  %v1269_v19 = vrot.slane %v1268_v39, 2  ;;  %v1339_v43 = vrot.slane %v5740_v14, 4  ;;  %v7114_v48 = vld [vmem:[#allocation93_spill] sm:$0xff] }
 0x355   : > { %4320 = vpow2.f32 %v1449_v52  ;;  %v1447_v12 = vmul.f32 1.442695, %v1411_v0  ;;  %v1399_v35 = vsub.f32 %v5709_v49, %v5744_v17  ;;  %v1357_v63 = vrot.slane %v5747_v6, 4  ;;  %v1139_v54 = vpop.permute.xlu1 %1138 }
 0x356   : > { %v5753_v8 = vmax.f32 %v1276_v23, %v1277_v11  ;;  %v1349_v32 = vrot.slane %v1348_v42, 1  ;;  %v1270_v24 = vmax.f32 %v1268_v39, %v1269_v19  ;;  %v1340_v7 = vmax.f32 %v5740_v14, %v1339_v43 }
 0x357   : > { %4322 = vpow2.f32 %v1447_v12  ;;  %v1423_v13 = vmul.f32 1.442695, %v1399_v35  ;;  %v1358_v62 = vmax.f32 %v5747_v6, %v1357_v63  ;;  %v5758_v16 = vadd.f32 %v7114_v48, %v1139_v54  ;;  %v7116_v35 = vld [vmem:[#allocation94_spill] sm:$0xff] }
 0x358   : > { %v1402_v36 = vsub.f32 %v5714_v61, %v5753_v8  ;;  %v5762_v30 = vmax.f32 %v1348_v42, %v1349_v32  ;;  %v1271_v18 = vrot.slane %v1270_v24, 1  ;;  %v1341_v53 = vrot.slane %v1340_v7, 2  ;;  %v7115_v42 = vld [vmem:[#allocation79_spill] sm:$0xff] }
 0x359   : > { %4324 = vpow2.f32 %v1423_v13  ;;  %v1359_v23 = vrot.slane %v1358_v62, 2  ;;  %v1285_v39 = vrot.slane %v5758_v16, 4  ;;  %v1134_v29 = vpop.permute.xlu1 %1133 }
 0x35a   : > { %v1429_v50 = vmul.f32 1.442695, %v1402_v36  ;;  %v1414_v52 = vsub.f32 %v5721_v57, %v5762_v30  ;;  %v5767_v0 = vmax.f32 %v1270_v24, %v1271_v18  ;;  %v1342_v56 = vmax.f32 %v1340_v7, %v1341_v53  ;;  %v1209_v11 = vpop.permute.xlu0 %1208 }
 0x35b   : > { %v1360_v19 = vmax.f32 %v1358_v62, %v1359_v23  ;;  %v1286_v43 = vmax.f32 %v5758_v16, %v1285_v39  ;;  %v5771_v12 = vadd.f32 %v7115_v42, %v1209_v11  ;;  %v5774_v63 = vadd.f32 %v7116_v35, %v1134_v29  ;;  %v7117_v39 = vld [vmem:[#allocation82_spill] sm:$0xff] }
 0x35c   : > { %4326 = vpow2.f32 %v1429_v50  ;;  %v1453_v54 = vmul.f32 1.442695, %v1414_v52  ;;  %v1401_v32 = vsub.f32 %v5728_v31, %v5767_v0  ;;  %v1343_v13 = vrot.slane %v1342_v56, 1 }
 0x35d   : > { %v1361_v48 = vrot.slane %v1360_v19, 1  ;;  %v1287_v24 = vrot.slane %v1286_v43, 2  ;;  %v1369_v7 = vrot.slane %v5771_v12, 4  ;;  %v1279_v62 = vrot.slane %v5774_v63, 4  ;;  %v1194_v36 = vpop.permute.xlu1 %1193 }
 0x35e   : > { %v4319_v18 = vpop.eup %4318  ;;  %4328 = vpow2.f32 %v1453_v54  ;;  %v1427_v53 = vmul.f32 1.442695, %v1401_v32  ;;  %v5780_v23 = vmax.f32 %v1342_v56, %v1343_v13  ;;  %v5783_v29 = vadd.f32 %v7117_v39, %v1194_v36 }
 0x35f   : > { %v1477_v50 = vrot.slane %v4319_v18, 4  ;;  %v5785_v52 = vmax.f32 %v1360_v19, %v1361_v48  ;;  %v1288_v11 = vmax.f32 %v1286_v43, %v1287_v24  ;;  %v1370_v42 = vmax.f32 %v5771_v12, %v1369_v7  ;;  %v7118_v7 = vld [vmem:[#allocation89_spill] sm:$0xff] }
 0x360   : > { %4330 = vpow2.f32 %v1427_v53  ;;  %v1413_v35 = vsub.f32 %v5740_v14, %v5780_v23  ;;  %v1280_v46 = vmax.f32 %v5774_v63, %v1279_v62  ;;  %v1351_v54 = vrot.slane %v5783_v29, 4 }
 0x361   : > { %v1478_v32 = vadd.f32 %v4319_v18, %v1477_v50  ;;  %v1416_v56 = vsub.f32 %v5747_v6, %v5785_v52  ;;  %v1289_v13 = vrot.slane %v1288_v11, 1  ;;  %v1371_v36 = vrot.slane %v1370_v42, 2  ;;  %v1159_v39 = vpop.permute.xlu0 %1158 }
 0x362   : > { %v4321_v19 = vpop.eup %4320  ;;  %v1451_v48 = vmul.f32 1.442695, %v1413_v35  ;;  %v1281_v43 = vrot.slane %v1280_v46, 2  ;;  %v1352_v24 = vmax.f32 %v5783_v29, %v1351_v54  ;;  %v5796_v53 = vadd.f32 %v7118_v7, %v1159_v39 }
 0x363   : > { %v1479_v58 = vrot.slane %v1478_v32, 2  ;;  %v1549_v28 = vrot.slane %v4321_v19, 4  ;;  %v1457_v62 = vmul.f32 1.442695, %v1416_v56  ;;  %v5798_v22 = vmax.f32 %v1288_v11, %v1289_v13 }
 0x364   : > { %v4323_v18 = vpop.eup %4322  ;;  %4332 = vpow2.f32 %v1451_v48  ;;  %v1372_v50 = vmax.f32 %v1370_v42, %v1371_v36  ;;  %v1282_v41 = vmax.f32 %v1280_v46, %v1281_v43  ;;  %v1353_v15 = vrot.slane %v1352_v24, 2 }
 0x365   : > { %v1480_v37 = vadd.f32 %v1479_v58, %v1478_v32  ;;  %v1550_v1 = vadd.f32 %v4321_v19, %v1549_v28  ;;  %v1543_v27 = vrot.slane %v4323_v18, 4  ;;  %4334 = vpow2.f32 %v1457_v62 }
 0x366   : > { %v4325_v35 = vpop.eup %4324  ;;  %v1404_v54 = vsub.f32 %v5758_v16, %v5798_v22  ;;  %v1373_v39 = vrot.slane %v1372_v50, 1  ;;  %v1283_v7 = vrot.slane %v1282_v41, 1  ;;  %v1354_v33 = vmax.f32 %v1352_v24, %v1353_v15 }
 0x367   : > { %v1481_v34 = vrot.slane %v1480_v37, 1  ;;  %v1551_v56 = vrot.slane %v1550_v1, 2  ;;  %v1544_v11 = vadd.f32 %v4323_v18, %v1543_v27  ;;  %v1471_v13 = vrot.slane %v4325_v35, 4 }
 0x368   : > { %v1433_v20 = vmul.f32 1.442695, %v1404_v54  ;;  %v5802_v48 = vmax.f32 %v1372_v50, %v1373_v39  ;;  %v5804_v46 = vmax.f32 %v1282_v41, %v1283_v7  ;;  %v1355_v58 = vrot.slane %v1354_v33, 1 }
 0x369   : > { %v4327_v28 = vpop.eup %4326  ;;  %v1482_v42 = vadd.f32 %v1481_v34, %v1480_v37  ;;  %v1552_v32 = vadd.f32 %v1551_v56, %v1550_v1  ;;  %v1545_v36 = vrot.slane %v1544_v11, 2  ;;  %v1472_v19 = vadd.f32 %v4325_v35, %v1471_v13 }
 0x36a   : > { %v1489_v43 = vrot.slane %v4327_v28, 4  ;;  %4336 = vpow2.f32 %v1433_v20  ;;  %v1418_v15 = vsub.f32 %v5771_v12, %v5802_v48  ;;  %v1403_v27 = vsub.f32 %v5774_v63, %v5804_v46 }
 0x36b   : > { %v4329_v24 = vpop.eup %4328  ;;  %4338 = vlog2.f32 %v1482_v42  ;;  %v1553_v62 = vrot.slane %v1552_v32, 1  ;;  %v1546_v18 = vadd.f32 %v1545_v36, %v1544_v11  ;;  %v1473_v41 = vrot.slane %v1472_v19, 2 }
 0x36c   : > { %v1490_v50 = vadd.f32 %v4327_v28, %v1489_v43  ;;  %v1561_v54 = vrot.slane %v4329_v24, 4  ;;  %v1461_v39 = vmul.f32 1.442695, %v1418_v15  ;;  %v1431_v34 = vmul.f32 1.442695, %v1403_v27  ;;  %v1149_v15 = vpop.permute.xlu1 %1148 }
 0x36d   : > { %v4331_v1 = vpop.eup %4330  ;;  %v1554_v37 = vadd.f32 %v1553_v62, %v1552_v32  ;;  %v1547_v35 = vrot.slane %v1546_v18, 1  ;;  %v1474_v7 = vadd.f32 %v1473_v41, %v1472_v19  ;;  %v5810_v20 = vmax.f32 %v1354_v33, %v1355_v58 }
 0x36e   : > { %v1491_v56 = vrot.slane %v1490_v50, 2  ;;  %v1562_v13 = vadd.f32 %v4329_v24, %v1561_v54  ;;  %v1483_v60 = vrot.slane %v4331_v1, 4  ;;  %4340 = vpow2.f32 %v1461_v39 }
 0x36f   : > { %4342 = vlog2.f32 %v1554_v37  ;;  %v1548_v59 = vadd.f32 %v1547_v35, %v1546_v18  ;;  %v1475_v42 = vrot.slane %v1474_v7, 1  ;;  %v1415_v11 = vsub.f32 %v5783_v29, %v5810_v20  ;;  %v1219_v35 = vpop.permute.xlu0 %1218 }
 0x370   : > { %v1492_v28 = vadd.f32 %v1491_v56, %v1490_v50  ;;  %v1563_v36 = vrot.slane %v1562_v13, 2  ;;  %v1484_v43 = vadd.f32 %v4331_v1, %v1483_v60  ;;  %4344 = vpow2.f32 %v1431_v34  ;;  %v7119_v50 = vld [vmem:[#allocation91_spill] sm:$0xff] }
 0x371   : > { %v4333_v32 = vpop.eup %4332  ;;  %4346 = vlog2.f32 %v1548_v59  ;;  %v1476_v19 = vadd.f32 %v1475_v42, %v1474_v7  ;;  %v1455_v33 = vmul.f32 1.442695, %v1415_v11  ;;  %v1309_v58 = vrot.slane %v5796_v53, 4 }
 0x372   : > { %v4335_v27 = vpop.eup %4334  ;;  %v1493_v24 = vrot.slane %v1492_v28, 1  ;;  %v1564_v62 = vadd.f32 %v1563_v36, %v1562_v13  ;;  %v1485_v41 = vrot.slane %v1484_v43, 2  ;;  %v1555_v18 = vrot.slane %v4333_v32, 4 }
 0x373   : > { %4348 = vlog2.f32 %v1476_v19  ;;  %v1573_v54 = vrot.slane %v4335_v27, 4  ;;  %v1310_v39 = vmax.f32 %v5796_v53, %v1309_v58  ;;  %v5817_v37 = vadd.f32 %v7119_v50, %v1149_v15  ;;  %v7120_v50 = vld [vmem:[#allocation77_spill] sm:$0xff] }
 0x374   : > { %v1494_v60 = vadd.f32 %v1493_v24, %v1492_v28  ;;  %v1565_v34 = vrot.slane %v1564_v62, 1  ;;  %v1486_v1 = vadd.f32 %v1485_v41, %v1484_v43  ;;  %v1556_v59 = vadd.f32 %v4333_v32, %v1555_v18 }
 0x375   : > { %v1574_v7 = vadd.f32 %v4335_v27, %v1573_v54  ;;  %4350 = vpow2.f32 %v1455_v33  ;;  %v1311_v56 = vrot.slane %v1310_v39, 2  ;;  %v1297_v42 = vrot.slane %v5817_v37, 4 }
 0x376   : > { %4352 = vlog2.f32 %v1494_v60  ;;  %v1566_v13 = vadd.f32 %v1565_v34, %v1564_v62  ;;  %v1487_v11 = vrot.slane %v1486_v1, 1  ;;  %v1557_v36 = vrot.slane %v1556_v59, 2 }
 0x377   : > { %v4337_v19 = vpop.eup %4336  ;;  %v1575_v47 = vrot.slane %v1574_v7, 2  ;;  %v1312_v58 = vmax.f32 %v1310_v39, %v1311_v56  ;;  %v1298_v15 = vmax.f32 %v5817_v37, %v1297_v42  ;;  %v5822_v28 = vadd.f32 %v7120_v50, %v1219_v35 }
 0x378   : > { %v4339_v43 = vpop.eup %4338  ;;  %4354 = vlog2.f32 %v1566_v13  ;;  %v1488_v32 = vadd.f32 %v1487_v11, %v1486_v1  ;;  %v1558_v27 = vadd.f32 %v1557_v36, %v1556_v59  ;;  %v1501_v33 = vrot.slane %v4337_v19, 4  ;;  %v7121_v36 = vld [vmem:[#allocation17_spill] sm:$0xff] }
 0x379   : > { %v1618_v24 = vmul.f32 0.6931472, %v4339_v43  ;;  %v1576_v41 = vadd.f32 %v1575_v47, %v1574_v7  ;;  %v1313_v18 = vrot.slane %v1312_v58, 1  ;;  %v1299_v54 = vrot.slane %v1298_v15, 2 }
 0x37a   : > { %4356 = vlog2.f32 %v1488_v32  ;;  %v1559_v62 = vrot.slane %v1558_v27, 1  ;;  %v1502_v60 = vadd.f32 %v4337_v19, %v1501_v33  ;;  %v1381_v34 = vrot.slane %v5822_v28, 4 }
 0x37b   : > { %v4341_v39 = vpop.eup %4340  ;;  %v1664_v56 = vadd.f32 %v1618_v24, %v5716_v38  ;;  %v1577_v42 = vrot.slane %v1576_v41, 1  ;;  %v5826_v35 = vmax.f32 %v1312_v58, %v1313_v18  ;;  %v5828_v50 = vmax.f32 %v1298_v15, %v1299_v54  ;;  %v7122_v18 = vld [vmem:[#allocation6_spill] sm:$0xff] }
 0x37c   : > { %v4343_v1 = vpop.eup %4342  ;;  %v1560_v59 = vadd.f32 %v1559_v62, %v1558_v27  ;;  %v1503_v13 = vrot.slane %v1502_v60, 2  ;;  %v1585_v11 = vrot.slane %v4341_v39, 4  ;;  %v5831_v47 = vmax.f32 %v5822_v28, %v1381_v34 }
 0x37d   : > { %v4345_v7 = vpop.eup %4344  ;;  %v1688_v19 = vsub.f32 %v7121_v36, %v1664_v56  ;;  %v1642_v43 = vmul.f32 0.6931472, %v4343_v1  ;;  %v1578_v32 = vadd.f32 %v1577_v42, %v1576_v41  ;;  %v1408_v38 = vsub.f32 %v5796_v53, %v5826_v35  ;;  %v7123_v42 = vld [vmem:[#allocation20_spill] sm:$0xff] }
 0x37e   : > { %v4347_v33 = vpop.eup %4346  ;;  %4358 = vlog2.f32 %v1560_v59  ;;  %v1504_v58 = vadd.f32 %v1503_v13, %v1502_v60  ;;  %v1586_v15 = vadd.f32 %v4341_v39, %v1585_v11  ;;  %v1495_v24 = vrot.slane %v4345_v7, 4 }
 0x37f   : > { %v1742_v27 = vrot.slane %v1688_v19, %v7122_v18  ;;  %v1676_v54 = vadd.f32 %v1642_v43, %v5730_v2  ;;  %v1640_v62 = vmul.f32 0.6931472, %v4347_v33  ;;  %4360 = vlog2.f32 %v1578_v32  ;;  %v1144_v2 = vpop.permute.xlu1 %1143  ;;  %v7124_v33 = vld [vmem:[#allocation13_spill] sm:$0xff] }
 0x380   : > { %v4349_v34 = vpop.eup %4348  ;;  %v1505_v26 = vrot.slane %v1504_v58, 1  ;;  %v1587_v40 = vrot.slane %v1586_v15, 2  ;;  %v1496_v56 = vadd.f32 %v4345_v7, %v1495_v24  ;;  %v1441_v1 = vmul.f32 1.442695, %v1408_v38 }
 0x381   : > { %v5839_v41 = vadd.f32 %v1742_v27, %v5695_v25   ;;  %v1700_v36 = vsub.f32 %v7123_v42, %v1676_v54  ;;  %v1675_v60 = vadd.f32 %v1640_v62, %v5736_v21  ;;  %v1616_v39 = vmul.f32 0.6931472, %v4349_v34 }
 0x382   : > { %v4351_v59 = vpop.eup %4350  ;;  %v1506_v13 = vadd.f32 %v1505_v26, %v1504_v58  ;;  %v1588_v11 = vadd.f32 %v1587_v40, %v1586_v15  ;;  %v1497_v19 = vrot.slane %v1496_v56, 2  ;;  %4362 = vpow2.f32 %v1441_v1  ;;  %v7126_v58 = vld [vmem:[#allocation12_spill] sm:$0xff] }
 0x383   : > { %v4353_v43 = vpop.eup %4352  ;;  %v1790_v32 = vrot.slane %v1700_v36, %v7122_v18  ;;  %v1699_v7 = vsub.f32 %v7124_v33, %v1675_v60  ;;  %v1663_v38 = vadd.f32 %v1616_v39, %v5744_v17  ;;  %v1567_v25 = vrot.slane %v4351_v59, 4 }
 0x384   : > { %v1622_v24 = vmul.f32 0.6931472, %v4353_v43  ;;  %4364 = vlog2.f32 %v1506_v13  ;;  %v1589_v27 = vrot.slane %v1588_v11, 1  ;;  %v1498_v54 = vadd.f32 %v1497_v19, %v1496_v56 }
 0x385   : > { %v4355_v21 = vpop.eup %4354  ;;  %v5847_v62 = vadd.f32 %v1790_v32, %v5700_v9   ;;  %v1786_v40 = vrot.slane %v1699_v7, %v7122_v18  ;;  %v1687_v15 = vsub.f32 %v7126_v58, %v1663_v38  ;;  %v1568_v34 = vadd.f32 %v4351_v59, %v1567_v25  ;;  %v1204_v59 = vpop.permute.xlu1 %1203  ;;  %v7130_v25 = vld [vmem:[#allocation26_spill] sm:$0xff]  ;;  %v7131_v58 = vld [vmem:[#allocation92_spill] sm:$0xff] }
 0x386   : > { %v1666_v1 = vadd.f32 %v1622_v24, %v5753_v8  ;;  %v1646_v42 = vmul.f32 0.6931472, %v4355_v21  ;;  %v1590_v36 = vadd.f32 %v1589_v27, %v1588_v11  ;;  %v1499_v60 = vrot.slane %v1498_v54, 1 }
 0x387   : > { %v7125_v26 = vmov %v5847_v62  ;;  %v4357_v17 = vpop.eup %4356  ;;  %v5853_v39 = vadd.f32 %v1786_v40, %v5704_v5   ;;  %v1738_v56 = vrot.slane %v1687_v15, %v7122_v18  ;;  %v1569_v19 = vrot.slane %v1568_v34, 2  ;;  %v7128_v62 = vld [vmem:[#allocation25_spill] sm:$0xff] }
 0x388   : > { %v1301_v9 = vrot.slane %v5828_v50, 1  ;;  %v1690_v43 = vsub.f32 %v7128_v62, %v1666_v1  ;;  %v1678_v32 = vadd.f32 %v1646_v42, %v5762_v30  ;;  %v1620_v33 = vmul.f32 0.6931472, %v4357_v17  ;;  %v7133_v42 = vld [vmem:[#allocation19_spill] sm:$0xff] }
 0x389   : > { %v7127_v13 = vmov %v5853_v39  ;;  %4366 = vlog2.f32 %v1590_v36  ;;  %v5860_v56 = vadd.f32 %v1738_v56, %v5709_v49   ;;  %v1500_v8 = vadd.f32 %v1499_v60, %v1498_v54  ;;  %v1169_v60 = vpop.permute.xlu0 %1168  ;;  %v5886_v62 = vpop.permute.xlu1 %1153 }
 0x38a   : > { %v1570_v11 = vadd.f32 %v1569_v19, %v1568_v34  ;;  %v5863_v5 = vmax.f32 %v5828_v50, %v1301_v9  ;;  %v1750_v38 = vrot.slane %v1690_v43, %v7122_v18  ;;  %v1702_v24 = vsub.f32 %v7130_v25, %v1678_v32 }
 0x38b   : > { %v7129_v7 = vmov %v5860_v56  ;;  %v1665_v27 = vadd.f32 %v1620_v33, %v5767_v0  ;;  %v1383_v21 = vrot.slane %v5831_v47, 2  ;;  %v4359_v30 = vpop.eup %4358  ;;  %4368 = vlog2.f32 %v1500_v8 }
 0x38c   : > { %v1571_v40 = vrot.slane %v1570_v11, 1  ;;  %v1406_v49 = vsub.f32 %v5817_v37, %v5863_v5  ;;  %v5872_v54 = vadd.f32 %v7131_v58, %v1144_v2  ;;  %v4361_v15 = vpop.eup %4360  ;;  %v5875_v50 = vadd.f32 %v1750_v38, %v5714_v61   ;;  %1879 = vmax.xlane.f32.xlu0 (%p6066_p0), %v7129_v7 }
 0x38d   : > { %v1798_v1 = vrot.slane %v1702_v24, %v7122_v18  ;;  %v1689_v36 = vsub.f32 %v7133_v42, %v1665_v27  ;;  %v1644_v0 = vmul.f32 0.6931472, %v4359_v30  ;;  %v1650_v17 = vmul.f32 0.6931472, %v4361_v15  ;;  %v7138_v27 = vld [vmem:[#allocation31_spill] sm:$0xff] }
 0x38e   : > { %v7132_v34 = vmov %v5875_v50  ;;  %v1572_v39 = vadd.f32 %v1571_v40, %v1570_v11  ;;  %v1437_v56 = vmul.f32 1.442695, %v1406_v49  ;;  %v1384_v19 = vmax.f32 %v5831_v47, %v1383_v21  ;;  %v7135_v11 = vld [vmem:[#allocation87_spill] sm:$0xff]  ;;  %v7137_v47 = vld [vmem:[#allocation21_spill] sm:$0xff]  ;;  %v7139_v50 = vld [vmem:[#allocation80_spill] sm:$0xff] }
 0x38f   : > { %v5881_v43 = vadd.f32 %v1798_v1, %v5721_v57   ;;  %v1746_v2 = vrot.slane %v1689_v36, %v7122_v18  ;;  %v1677_v9 = vadd.f32 %v1644_v0, %v5780_v23  ;;  %v1291_v61 = vrot.slane %v5872_v54, 4  ;;  %v4363_v32 = vpop.eup %4362 }
 0x390   : > { %v1680_v8 = vadd.f32 %v1650_v17, %v5785_v52  ;;  %4370 = vlog2.f32 %v1572_v39  ;;  %v1385_v38 = vrot.slane %v1384_v19, 1  ;;  %v5890_v25 = vadd.f32 %v7135_v11, %v1169_v60  ;;  %1881 = vmax.xlane.f32.xlu0 (%p6066_p0), %v5839_v41 }
 0x391   : > { %v7134_v33 = vmov %v5881_v43  ;;  %v5893_v42 = vadd.f32 %v1746_v2, %v5728_v31   ;;  %v1701_v43 = vsub.f32 %v7137_v47, %v1677_v9  ;;  %v1525_v24 = vrot.slane %v4363_v32, 4  ;;  %v4365_v23 = vpop.eup %4364  ;;  %v1214_v2 = vpop.permute.xlu1 %1213 }
 0x392   : > { %4372 = vpow2.f32 %v1437_v56  ;;  %v1704_v21 = vsub.f32 %v7138_v27, %v1680_v8  ;;  %v5897_v30 = vmax.f32 %v1384_v19, %v1385_v38  ;;  %v1292_v40 = vmax.f32 %v5872_v54, %v1291_v61  ;;  %v1229_v19 = vpop.permute.xlu0 %1228  ;;  %v7142_v8 = vld [vmem:[#allocation23_spill] sm:$0xff] }
 0x393   : > { %v7136_v57 = vmov %v5893_v42  ;;  %v1321_v52 = vrot.slane %v5890_v25, 4  ;;  %v1794_v49 = vrot.slane %v1701_v43, %v7122_v18  ;;  %v1626_v58 = vmul.f32 0.6931472, %v4365_v23  ;;  %v7143_v23 = vld [vmem:[#allocation75_spill] sm:$0xff] }
 0x394   : > { %v1526_v15 = vadd.f32 %v4363_v32, %v1525_v24  ;;  %v5903_v31 = vadd.f32 %v7139_v50, %v1204_v59  ;;  %v1806_v1 = vrot.slane %v1704_v21, %v7122_v18  ;;  %v1420_v42 = vsub.f32 %v5822_v28, %v5897_v30  ;;  %1883 = vmax.xlane.f32.xlu1 (%p6066_p0), %v7136_v57 }
 0x395   : > { %v1293_v36 = vrot.slane %v1292_v40, 2  ;;  %v1322_v0 = vmax.f32 %v5890_v25, %v1321_v52  ;;  %v5910_v24 = vadd.f32 %v1794_v49, %v5740_v14   ;;  %v1668_v17 = vadd.f32 %v1626_v58, %v5798_v22 }
 0x396   : > { %v1527_v39 = vrot.slane %v1526_v15, 2  ;;  %v1363_v56 = vrot.slane %v5903_v31, 4  ;;  %v4367_v59 = vpop.eup %4366  ;;  %v5915_v49 = vadd.f32 %v1806_v1, %v5747_v6   ;;  %v1465_v9 = vmul.f32 1.442695, %v1420_v42  ;;  %v7145_v42 = vld [vmem:[#allocation37_spill] sm:$0xff] }
 0x397   : > { %v7140_v60 = vmov %v5910_v24  ;;  %v1294_v61 = vmax.f32 %v1292_v40, %v1293_v36  ;;  %v1323_v32 = vrot.slane %v1322_v0, 2  ;;  %v1692_v11 = vsub.f32 %v7142_v8, %v1668_v17 }
 0x398   : > { %v7141_v38 = vmov %v5915_v49  ;;  %v1654_v47 = vmul.f32 0.6931472, %v4367_v59  ;;  %v1528_v43 = vadd.f32 %v1527_v39, %v1526_v15  ;;  %v1364_v14 = vmax.f32 %v5903_v31, %v1363_v56  ;;  %v4369_v21 = vpop.eup %4368  ;;  %v1164_v39 = vpop.permute.xlu1 %1163  ;;  %1885 = vmax.xlane.f32.xlu1 (%p6066_p0), %v7132_v34 }
 0x399   : > { %4374 = vpow2.f32 %v1465_v9  ;;  %v1295_v22 = vrot.slane %v1294_v61, 1  ;;  %v1324_v24 = vmax.f32 %v1322_v0, %v1323_v32  ;;  %v5920_v27 = vadd.f32 %v7143_v23, %v1229_v19 }
 0x39a   : > { %v1758_v52 = vrot.slane %v1692_v11, %v7122_v18  ;;  %v1682_v6 = vadd.f32 %v1654_v47, %v5802_v48  ;;  %v1529_v49 = vrot.slane %v1528_v43, 1  ;;  %v1365_v40 = vrot.slane %v1364_v14, 2 }
 0x39b   : > { %v1624_v58 = vmul.f32 0.6931472, %v4369_v21  ;;  %v5924_v50 = vmax.f32 %v1294_v61, %v1295_v22  ;;  %v1325_v1 = vrot.slane %v1324_v24, 1  ;;  %v1393_v15 = vrot.slane %v5920_v27, 4 }
 0x39c   : > { %v5928_v9 = vadd.f32 %v1758_v52, %v5758_v16   ;;  %v1706_v36 = vsub.f32 %v7145_v42, %v1682_v6  ;;  %v1530_v0 = vadd.f32 %v1529_v49, %v1528_v43  ;;  %v1366_v17 = vmax.f32 %v1364_v14, %v1365_v40  ;;  %v7147_v43 = vld [vmem:[#allocation16_spill] sm:$0xff] }
 0x39d   : > { %v1667_v56 = vadd.f32 %v1624_v58, %v5804_v46  ;;  %v1405_v48 = vsub.f32 %v5872_v54, %v5924_v50  ;;  %v5934_v19 = vmax.f32 %v1324_v24, %v1325_v1  ;;  %v1394_v61 = vmax.f32 %v5920_v27, %v1393_v15  ;;  %v4371_v32 = vpop.eup %4370 }
 0x39e   : > { %v7144_v59 = vmov %v5928_v9  ;;  %v1814_v8 = vrot.slane %v1706_v36, %v7122_v18  ;;  %4376 = vlog2.f32 %v1530_v0  ;;  %v1367_v16 = vrot.slane %v1366_v17, 1  ;;  %v7146_v9 = vld [vmem:[#allocation90_spill] sm:$0xff]  ;;  %v1224_v36 = vpop.permute.xlu1 %1223  ;;  %v7149_v0 = vld [vmem:[#allocation29_spill] sm:$0xff] }
 0x39f   : > { %v5940_v11 = vadd.f32 %v7146_v9, %v5886_v62  ;;  %v4373_v47 = vpop.eup %4372  ;;  %v1691_v14 = vsub.f32 %v7147_v43, %v1667_v56  ;;  %v1648_v46 = vmul.f32 0.6931472, %v4371_v32  ;;  %v1435_v22 = vmul.f32 1.442695, %v1405_v48  ;;  %v7150_v56 = vld [vmem:[#allocation78_spill] sm:$0xff]  ;;  %v7151_v43 = vld [vmem:[#allocation88_spill] sm:$0xff]  ;;  %1889 = vmax.xlane.f32.xlu1 (%p6066_p0), %v7144_v59 }
 0x3a0   : > { %v1410_v24 = vsub.f32 %v5890_v25, %v5934_v19  ;;  %v5946_v23 = vadd.f32 %v1814_v8, %v5771_v12   ;;  %v1513_v21 = vrot.slane %v4373_v47, 4  ;;  %v5948_v52 = vmax.f32 %v1366_v17, %v1367_v16 }
 0x3a1   : > { %v1395_v6 = vrot.slane %v1394_v61, 2  ;;  %v1754_v49 = vrot.slane %v1691_v14, %v7122_v18  ;;  %v1679_v62 = vadd.f32 %v1648_v46, %v5810_v20  ;;  %4378 = vpow2.f32 %v1435_v22 }
 0x3a2   : > { %v1445_v40 = vmul.f32 1.442695, %v1410_v24  ;;  %v1514_v58 = vadd.f32 %v4373_v47, %v1513_v21  ;;  %v1417_v1 = vsub.f32 %v5903_v31, %v5948_v52  ;;  %v1303_v42 = vrot.slane %v5940_v11, 4 }
 0x3a3   : > { %v1396_v15 = vmax.f32 %v1394_v61, %v1395_v6  ;;  %v5956_v8 = vadd.f32 %v1754_v49, %v5774_v63   ;;  %v1703_v17 = vsub.f32 %v7149_v0, %v1679_v62  ;;  %v5960_v48 = vadd.f32 %v7150_v56, %v1214_v2  ;;  %v7152_v63 = vld [vmem:[#allocation76_spill] sm:$0xff] }
 0x3a4   : > { %4380 = vpow2.f32 %v1445_v40  ;;  %v1515_v20 = vrot.slane %v1514_v58, 2  ;;  %v1459_v32 = vmul.f32 1.442695, %v1417_v1  ;;  %v1304_v9 = vmax.f32 %v5940_v11, %v1303_v42 }
 0x3a5   : > { %v7148_v12 = vmov %v5956_v8  ;;  %v1397_v16 = vrot.slane %v1396_v15, 1  ;;  %v1802_v47 = vrot.slane %v1703_v17, %v7122_v18  ;;  %v1375_v61 = vrot.slane %v5960_v48, 4 }
 0x3a6   : > { %v5966_v14 = vadd.f32 %v7151_v43, %v1164_v39  ;;  %v5969_v8 = vadd.f32 %v7152_v63, %v1224_v36  ;;  %v4375_v46 = vpop.eup %4374  ;;  %v1516_v22 = vadd.f32 %v1515_v20, %v1514_v58  ;;  %4382 = vpow2.f32 %v1459_v32  ;;  %1887 = vmax.xlane.f32.xlu0 (%p6066_p0), %v7148_v12 }
 0x3a7   : > { %v5971_v2 = vmax.f32 %v1396_v15, %v1397_v16  ;;  %v1305_v24 = vrot.slane %v1304_v9, 2  ;;  %v5974_v21 = vadd.f32 %v1802_v47, %v5783_v29   ;;  %v1597_v6 = vrot.slane %v4375_v46, 4 }
 0x3a8   : > { %v1376_v49 = vmax.f32 %v5960_v48, %v1375_v61  ;;  %v1315_v62 = vrot.slane %v5966_v14, 4  ;;  %v1517_v1 = vrot.slane %v1516_v22, 1  ;;  %v1387_v36 = vrot.slane %v5969_v8, 4 }
 0x3a9   : > { %v7153_v40 = vmov %v5974_v21  ;;  %v1422_v39 = vsub.f32 %v5920_v27, %v5971_v2  ;;  %v1306_v42 = vmax.f32 %v1304_v9, %v1305_v24  ;;  %v1598_v58 = vadd.f32 %v4375_v46, %v1597_v6 }
 0x3aa   : > { %v1377_v0 = vrot.slane %v1376_v49, 2  ;;  %v1316_v15 = vmax.f32 %v5966_v14, %v1315_v62  ;;  %v1518_v17 = vadd.f32 %v1517_v1, %v1516_v22  ;;  %v1388_v20 = vmax.f32 %v5969_v8, %v1387_v36 }
 0x3ab   : > { %v1469_v56 = vmul.f32 1.442695, %v1422_v39  ;;  %v1307_v29 = vrot.slane %v1306_v42, 1  ;;  %v4377_v32 = vpop.eup %4376  ;;  %v1599_v16 = vrot.slane %v1598_v58, 2 }
 0x3ac   : > { %v1378_v47 = vmax.f32 %v1376_v49, %v1377_v0  ;;  %v1317_v61 = vrot.slane %v1316_v15, 2  ;;  %v1634_v43 = vmul.f32 0.6931472, %v4377_v32  ;;  %4384 = vlog2.f32 %v1518_v17 }
 0x3ad   : > { %v5983_v63 = vmax.f32 %v1306_v42, %v1307_v29  ;;  %v1389_v9 = vrot.slane %v1388_v20, 2  ;;  %v1600_v24 = vadd.f32 %v1599_v16, %v1598_v58  ;;  %4386 = vpow2.f32 %v1469_v56  ;;  %v7154_v42 = vld [vmem:[#allocation14_spill] sm:$0xff] }
 0x3ae   : > { %v1379_v46 = vrot.slane %v1378_v47, 1  ;;  %v1318_v21 = vmax.f32 %v1316_v15, %v1317_v61  ;;  %v4379_v6 = vpop.eup %4378  ;;  %v1672_v22 = vadd.f32 %v1634_v43, %v5826_v35 }
 0x3af   : > { %v1407_v62 = vsub.f32 %v5940_v11, %v5983_v63  ;;  %v1390_v1 = vmax.f32 %v1388_v20, %v1389_v9  ;;  %v1601_v39 = vrot.slane %v1600_v24, 1  ;;  %v1507_v36 = vrot.slane %v4379_v6, 4 }
 0x3b0   : > { %v5988_v49 = vmax.f32 %v1378_v47, %v1379_v46  ;;  %v1319_v0 = vrot.slane %v1318_v21, 1  ;;  %v1696_v29 = vsub.f32 %v7154_v42, %v1672_v22 }
 0x3b1   : > { %v4381_v17 = vpop.eup %4380  ;;  %v1439_v32 = vmul.f32 1.442695, %v1407_v62  ;;  %v1391_v58 = vrot.slane %v1390_v1, 1  ;;  %v1602_v56 = vadd.f32 %v1601_v39, %v1600_v24  ;;  %v1508_v16 = vadd.f32 %v4379_v6, %v1507_v36 }
 0x3b2   : > { %v1537_v15 = vrot.slane %v4381_v17, 4  ;;  %v1419_v35 = vsub.f32 %v5960_v48, %v5988_v49  ;;  %v1774_v61 = vrot.slane %v1696_v29, %v7122_v18  ;;  %v5994_v20 = vmax.f32 %v1318_v21, %v1319_v0 }
 0x3b3   : > { %4388 = vpow2.f32 %v1439_v32  ;;  %v5996_v43 = vmax.f32 %v1390_v1, %v1391_v58  ;;  %v4383_v47 = vpop.eup %4382  ;;  %v1509_v9 = vrot.slane %v1508_v16, 2 }
 0x3b4   : > { %4390 = vlog2.f32 %v1602_v56  ;;  %v1538_v46 = vadd.f32 %v4381_v17, %v1537_v15  ;;  %v1463_v22 = vmul.f32 1.442695, %v1419_v35  ;;  %v5999_v61 = vadd.f32 %v1774_v61, %v5796_v53  }
 0x3b5   : > { %v1579_v24 = vrot.slane %v4383_v47, 4  ;;  %v1409_v6 = vsub.f32 %v5966_v14, %v5994_v20  ;;  %v1421_v62 = vsub.f32 %v5969_v8, %v5996_v43  ;;  %v1510_v39 = vadd.f32 %v1509_v9, %v1508_v16 }
 0x3b6   : > { %v7155_v51 = vmov %v5999_v61  ;;  %v1539_v21 = vrot.slane %v1538_v46, 2  ;;  %4392 = vpow2.f32 %v1463_v22  ;;  %v7156_v22 = vld [vmem:[#allocation28_spill] sm:$0xff] }
 0x3b7   : > { %v1580_v1 = vadd.f32 %v4383_v47, %v1579_v24  ;;  %v1443_v36 = vmul.f32 1.442695, %v1409_v6  ;;  %v1467_v0 = vmul.f32 1.442695, %v1421_v62  ;;  %v1511_v42 = vrot.slane %v1510_v39, 1 }
 0x3b8   : > { %v1540_v29 = vadd.f32 %v1539_v21, %v1538_v46 }
 0x3b9   : > { %v1581_v17 = vrot.slane %v1580_v1, 2  ;;  %4394 = vpow2.f32 %v1443_v36  ;;  %v4385_v32 = vpop.eup %4384  ;;  %v1512_v53 = vadd.f32 %v1511_v42, %v1510_v39 }
 0x3ba   : > { %v1541_v58 = vrot.slane %v1540_v29, 1  ;;  %4396 = vpow2.f32 %v1467_v0  ;;  %v4387_v56 = vpop.eup %4386  ;;  %v1630_v15 = vmul.f32 0.6931472, %v4385_v32 }
 0x3bb   : > { %v1582_v35 = vadd.f32 %v1581_v17, %v1580_v1  ;;  %4398 = vlog2.f32 %v1512_v53  ;;  %v1609_v44 = vrot.slane %v4387_v56, 4 }
 0x3bc   : > { %v1542_v61 = vadd.f32 %v1541_v58, %v1540_v29  ;;  %v1670_v16 = vadd.f32 %v1630_v15, %v5863_v5  ;;  %v7158_v15 = vld [vmem:[#allocation34_spill] sm:$0xff] }
 0x3bd   : > { %v1583_v9 = vrot.slane %v1582_v35, 1  ;;  %v1610_v47 = vadd.f32 %v4387_v56, %v1609_v44 }
 0x3be   : > { %4400 = vlog2.f32 %v1542_v61  ;;  %v1694_v24 = vsub.f32 %v7156_v22, %v1670_v16 }
 0x3bf   : > { %v1584_v46 = vadd.f32 %v1583_v9, %v1582_v35  ;;  %v1611_v62 = vrot.slane %v1610_v47, 2 }
 0x3c0   : > { %v4389_v6 = vpop.eup %4388  ;;  %v1766_v39 = vrot.slane %v1694_v24, %v7122_v18 }
 0x3c1   : > { %v4391_v21 = vpop.eup %4390  ;;  %4402 = vlog2.f32 %v1584_v46  ;;  %v1519_v36 = vrot.slane %v4389_v6, 4  ;;  %v1612_v1 = vadd.f32 %v1611_v62, %v1610_v47 }
 0x3c2   : > { %v1658_v0 = vmul.f32 0.6931472, %v4391_v21  ;;  %v6009_v32 = vadd.f32 %v1766_v39, %v5817_v37  }
 0x3c3   : > { %v4393_v42 = vpop.eup %4392  ;;  %v1520_v5 = vadd.f32 %v4389_v6, %v1519_v36  ;;  %v1613_v44 = vrot.slane %v1612_v1, 1 }
 0x3c4   : > { %v7157_v29 = vmov %v6009_v32  ;;  %v1684_v17 = vadd.f32 %v1658_v0, %v5897_v30  ;;  %v1591_v53 = vrot.slane %v4393_v42, 4 }
 0x3c5   : > { %v1521_v58 = vrot.slane %v1520_v5, 2  ;;  %v1614_v61 = vadd.f32 %v1613_v44, %v1612_v1  ;;  %1893 = vmax.xlane.f32.xlu1 (%p6066_p0), %v7157_v29 }
 0x3c6   : > { %v4395_v56 = vpop.eup %4394  ;;  %v1708_v35 = vsub.f32 %v7158_v15, %v1684_v17  ;;  %v1592_v16 = vadd.f32 %v4393_v42, %v1591_v53 }
 0x3c7   : > { %v4397_v9 = vpop.eup %4396  ;;  %v1522_v22 = vadd.f32 %v1521_v58, %v1520_v5  ;;  %v1531_v24 = vrot.slane %v4395_v56, 4  ;;  %4404 = vlog2.f32 %v1614_v61  ;;  %v7160_v61 = vld [vmem:[#allocation24_spill] sm:$0xff] }
 0x3c8   : > { %v1822_v47 = vrot.slane %v1708_v35, %v7122_v18  ;;  %v1593_v46 = vrot.slane %v1592_v16, 2  ;;  %v1603_v37 = vrot.slane %v4397_v9, 4  ;;  %v4399_v32 = vpop.eup %4398 }
 0x3c9   : > { %v1523_v6 = vrot.slane %v1522_v22, 1  ;;  %v1532_v62 = vadd.f32 %v4395_v56, %v1531_v24  ;;  %v1628_v30 = vmul.f32 0.6931472, %v4399_v32  ;;  %1897 = vmax.xlane.f32.xlu1 (%p6066_p0), %v7155_v51 }
 0x3ca   : > { %v6015_v21 = vadd.f32 %v1822_v47, %v5822_v28   ;;  %v1594_v39 = vadd.f32 %v1593_v46, %v1592_v16  ;;  %v1604_v36 = vadd.f32 %v4397_v9, %v1603_v37 }
 0x3cb   : > { %v4401_v17 = vpop.eup %4400  ;;  %v1524_v1 = vadd.f32 %v1523_v6, %v1522_v22  ;;  %v1533_v42 = vrot.slane %v1532_v62, 2  ;;  %v1669_v5 = vadd.f32 %v1628_v30, %v5924_v50  ;;  %v7161_v22 = vld [vmem:[#allocation22_spill] sm:$0xff] }
 0x3cc   : > { %v7159_v0 = vmov %v6015_v21  ;;  %v1638_v44 = vmul.f32 0.6931472, %v4401_v17  ;;  %v1595_v53 = vrot.slane %v1594_v39, 1  ;;  %v1605_v58 = vrot.slane %v1604_v36, 2 }
 0x3cd   : > { %4406 = vlog2.f32 %v1524_v1  ;;  %v1534_v15 = vadd.f32 %v1533_v42, %v1532_v62  ;;  %v1693_v4 = vsub.f32 %v7160_v61, %v1669_v5  ;;  %v7166_v42 = vld [vmem:[#allocation38_spill] sm:$0xff] }
 0x3ce   : > { %v4403_v35 = vpop.eup %4402  ;;  %v1674_v56 = vadd.f32 %v1638_v44, %v5934_v19  ;;  %v1596_v28 = vadd.f32 %v1595_v53, %v1594_v39  ;;  %v1606_v21 = vadd.f32 %v1605_v58, %v1604_v36  ;;  %v7163_v19 = vld [vmem:[#allocation32_spill] sm:$0xff]  ;;  %v7169_v61 = vld [vmem:[#allocation10_spill] sm:$0xff] }
 0x3cf   : > { %v1652_v24 = vmul.f32 0.6931472, %v4403_v35  ;;  %v1535_v16 = vrot.slane %v1534_v15, 1  ;;  %v1762_v9 = vrot.slane %v1693_v4, %v7122_v18 }
 0x3d0   : > { %v1698_v47 = vsub.f32 %v7161_v22, %v1674_v56  ;;  %4408 = vlog2.f32 %v1596_v28  ;;  %v1607_v50 = vrot.slane %v1606_v21, 1 }
 0x3d1   : > { %v1681_v46 = vadd.f32 %v1652_v24, %v5948_v52  ;;  %v1536_v37 = vadd.f32 %v1535_v16, %v1534_v15  ;;  %v6024_v6 = vadd.f32 %v1762_v9, %v5872_v54   ;;  %v7170_v9 = vld [vmem:[#allocation30_spill] sm:$0xff] }
 0x3d2   : > { %v1782_v32 = vrot.slane %v1698_v47, %v7122_v18  ;;  %v1608_v62 = vadd.f32 %v1607_v50, %v1606_v21 }
 0x3d3   : > { %v7162_v1 = vmov %v6024_v6  ;;  %v1705_v30 = vsub.f32 %v7163_v19, %v1681_v46  ;;  %4410 = vlog2.f32 %v1536_v37  ;;  %v7172_v37 = vld [vmem:[#allocation15_spill] sm:$0xff] }
 0x3d4   : > { %v6029_v39 = vadd.f32 %v1782_v32, %v5890_v25   ;;  %4412 = vlog2.f32 %v1608_v62  ;;  %v4405_v4 = vpop.eup %4404  ;;  %1891 = vmax.xlane.f32.xlu0 (%p6066_p0), %v7162_v1 }
 0x3d5   : > { %v1810_v36 = vrot.slane %v1705_v30, %v7122_v18  ;;  %v1662_v17 = vmul.f32 0.6931472, %v4405_v4 }
 0x3d6   : > { %v7164_v5 = vmov %v6029_v39 }
 0x3d7   : > { %v6033_v52 = vadd.f32 %v1810_v36, %v5903_v31   ;;  %v1686_v54 = vadd.f32 %v1662_v17, %v5971_v2  ;;  %v7191_v36 = vmov %v7127_v13  ;;  %1901 = vmax.xlane.f32.xlu1 (%p6066_p0), %v7164_v5 }
 0x3d9   : > { %7165 = vst [vmem:[#allocation98_spill] sm:$0xff] %v6033_v52  ;;  %v1710_v44 = vsub.f32 %v7166_v42, %v1686_v54  ;;  %v7201_v42 = vmov %v7136_v57 }
 0x3da   : > { %v4407_v6 = vpop.eup %4406 }
 0x3db   : > { %v1632_v53 = vmul.f32 0.6931472, %v4407_v6  ;;  %v1830_v58 = vrot.slane %v1710_v44, %v7122_v18  ;;  %v7197_v6 = vmov %v7162_v1  ;;  %1905 = vmax.xlane.f32.xlu1 (%p6066_p0), %v7125_v26 }
 0x3dd   : > { %v4409_v15 = vpop.eup %4408  ;;  %v1671_v25 = vadd.f32 %v1632_v53, %v5983_v63  ;;  %v6040_v39 = vadd.f32 %v1830_v58, %v5920_v27   ;;  %v7187_v53 = vmov %v7153_v40 }
 0x3de   : > { %v1656_v35 = vmul.f32 0.6931472, %v4409_v15 }
 0x3df   : > { %7167 = vst [vmem:[#allocation99_spill] sm:$0xff] %v6040_v39  ;;  %v7168_v28 = vmov %v6040_v39  ;;  %v1695_v56 = vsub.f32 %v7169_v61, %v1671_v25  ;;  %v7194_v61 = vmov %v7155_v51  ;;  %1909 = vmax.xlane.f32.xlu1 (%p6066_p0), %v7134_v33 }
 0x3e0   : > { %v4411_v21 = vpop.eup %4410  ;;  %v1683_v31 = vadd.f32 %v1656_v35, %v5988_v49  ;;  %v7175_v49 = vld [vmem:[#allocation35_spill] sm:$0xff]  ;;  %v7200_v35 = vmov %v7132_v34 }
 0x3e1   : > { %v4413_v24 = vpop.eup %4412  ;;  %v1770_v2 = vrot.slane %v1695_v56, %v7122_v18  ;;  %v1636_v16 = vmul.f32 0.6931472, %v4411_v21  ;;  %v7182_v21 = vmov %v7159_v0  ;;  %v7203_v56 = vmov %v7129_v7 }
 0x3e2   : > { %v1707_v22 = vsub.f32 %v7170_v9, %v1683_v31  ;;  %v1660_v47 = vmul.f32 0.6931472, %v4413_v24  ;;  %v7189_v24 = vmov %v7140_v60  ;;  %v7192_v31 = vmov %v7164_v5 }
 0x3e3   : > { %v6047_v11 = vadd.f32 %v1770_v2, %v5940_v11   ;;  %v1673_v63 = vadd.f32 %v1636_v16, %v5994_v20  ;;  %v7198_v9 = vmov %v7144_v59  ;;  %1913 = vmax.xlane.f32.xlu1 (%p6066_p0), %v7141_v38 }
 0x3e4   : > { %v1818_v27 = vrot.slane %v1707_v22, %v7122_v18  ;;  %v1685_v50 = vadd.f32 %v1660_v47, %v5996_v43  ;;  %v7188_v43 = vmov %v7134_v33 }
 0x3e5   : > { %v7171_v46 = vmov %v6047_v11  ;;  %v1697_v32 = vsub.f32 %v7172_v37, %v1673_v63 }
 0x3e6   : > { %v6054_v63 = vadd.f32 %v1818_v27, %v5960_v48   ;;  %v1709_v62 = vsub.f32 %v7175_v49, %v1685_v50  ;;  %v7184_v50 = vmov %v5946_v23  ;;  %v7186_v49 = vmov %v7141_v38  ;;  %1895 = vmax.xlane.f32.xlu0 (%p6066_p0), %v7171_v46 }
 0x3e7   : > { %v1778_v30 = vrot.slane %v1697_v32, %v7122_v18  ;;  %v7195_v11 = vmov %v7171_v46  ;;  %v7196_v32 = vmov %v7157_v29  ;;  %1917 = vmax.xlane.f32.xlu1 (%p6066_p0), %v5946_v23 }
 0x3e8   : > { %7173 = vst [vmem:[#allocation100_spill] sm:$0xff] %v6054_v63  ;;  %v7174_v19 = vmov %v6054_v63  ;;  %v1826_v39 = vrot.slane %v1709_v62, %v7122_v18  ;;  %v7190_v62 = vmov %v7125_v26  ;;  %v4881_v18 = vmov (%p6066_p0), 1.0  }
 0x3e9   : > { %v6060_v17 = vadd.f32 %v1778_v30, %v5966_v14   ;;  %v7183_v63 = vmov %v7174_v19  ;;  %v7185_v14 = vmov %v6033_v52  ;;  %v7202_v30 = vmov %v5839_v41  ;;  %684 = sbr.rel (!%p6066_p0) target bundleno = 337 (0x151), region = 43  ;;  %3822 = vmatprep.subr.mxu0 (%p6066_p0), %v4881_v18  ;;  %3890 = vmatprep.subr.mxu1 (%p6066_p0), %v4881_v18 }
 0x3ea   : > { %v6063_v54 = vadd.f32 %v1826_v39, %v5969_v8   ;;  %v7180_v39 = vmov %v7168_v28  ;;  %v7199_v8 = vmov %v7148_v12  ;;  %3823 = vmatpush3.msra.mxu0 (%p6066_p0), %v4881_v18  ;;  %3891 = vmatpush3.msra.mxu1 (%p6066_p0), %v4881_v18 }
 0x3eb   : > { %v7176_v4 = vmov %v6060_v17  ;;  %3824 = vmatprep.subr.mxu0 (%p6066_p0), %v4881_v18  ;;  %3892 = vmatprep.subr.mxu1 (%p6066_p0), %v4881_v18 }
 0x3ec   : > { %7177 = vst [vmem:[#allocation101_spill] sm:$0xff] %v6063_v54  ;;  %v7178_v20 = vmov %v6063_v54  ;;  %v7193_v17 = vmov %v7176_v4  ;;  %3825 = vmatpush3.msra.mxu0 (%p6066_p0), %v4881_v18  ;;  %3893 = vmatpush3.msra.mxu1 (%p6066_p0), %v4881_v18 }
 0x3ed   : > { %v7181_v54 = vmov %v7178_v20  ;;  %3826 = vmatprep.subr.mxu0 (%p6066_p0), %v4881_v18  ;;  %3894 = vmatprep.subr.mxu1 (%p6066_p0), %v4881_v18 }
 0x3ee   :  { %3827 = vmatpush3.msra.mxu0 %v4881_v18  ;;  %3895 = vmatpush3.msra.mxu1 %v4881_v18 }
 0x3ef   :  { %3828 = vmatprep.subr.mxu0 %v4881_v18  ;;  %3896 = vmatprep.subr.mxu1 %v4881_v18 }
 0x3f0   :  { %3829 = vmatpush3.msra.mxu0 %v4881_v18  ;;  %3897 = vmatpush3.msra.mxu1 %v4881_v18 }
 0x3f1   :  { %3830 = vmatprep.subr.mxu0 %v4881_v18  ;;  %3898 = vmatprep.subr.mxu1 %v4881_v18 }
 0x3f2   :  { %3831 = vmatpush3.msra.mxu0 %v4881_v18  ;;  %3899 = vmatpush3.msra.mxu1 %v4881_v18 }
 0x3f3   :  { %3832 = vmatprep.subr.mxu0 %v4881_v18  ;;  %3900 = vmatprep.subr.mxu1 %v4881_v18 }
 0x3f4   :  { %3833 = vmatpush3.msra.mxu0 %v4881_v18  ;;  %3901 = vmatpush3.msra.mxu1 %v4881_v18 }
 0x3f5   :  { %3834 = vmatprep.subr.mxu0 %v4881_v18  ;;  %3902 = vmatprep.subr.mxu1 %v4881_v18 }
 0x3f6   :  { %3835 = vmatpush3.msra.mxu0 %v4881_v18  ;;  %3903 = vmatpush3.msra.mxu1 %v4881_v18 }
 0x3f7   :  { %3836 = vmatprep.subr.mxu0 %v4881_v18  ;;  %3904 = vmatprep.subr.mxu1 %v4881_v18 }
 0x3f8   :  { %1899 = vmax.xlane.f32.xlu0 %v7176_v4  ;;  %3837 = vmatpush3.msra.mxu0 %v4881_v18 }
 0x3f9   :  { %3905 = vmatpush3.msra.mxu1 %v4881_v18  ;;  %3838 = vmatprep.subr.mxu0 %v4881_v18 }
 0x3fa   :  { %3906 = vmatprep.subr.mxu1 %v4881_v18  ;;  %3839 = vmatpush3.msra.mxu0 %v4881_v18 }
 0x3fb   :  { %3907 = vmatpush3.msra.mxu1 %v4881_v18  ;;  %3840 = vmatprep.subr.mxu0 %v4881_v18 }
 0x3fc   :  { %1903 = vmax.xlane.f32.xlu0 %v7127_v13  ;;  %3908 = vmatprep.subr.mxu1 %v4881_v18 }
 0x3fd   :  { %3841 = vmatpush3.msra.mxu0 %v4881_v18  ;;  %3909 = vmatpush3.msra.mxu1 %v4881_v18 }
 0x3fe   :  { %3842 = vmatprep.subr.mxu0 %v4881_v18  ;;  %3910 = vmatprep.subr.mxu1 %v4881_v18 }
 0x3ff   :  { %3843 = vmatpush3.msra.mxu0 %v4881_v18  ;;  %3911 = vmatpush3.msra.mxu1 %v4881_v18 }
 0x400   :  { %1907 = vmax.xlane.f32.xlu0 %v7140_v60  ;;  %3844 = vmatprep.subr.mxu0 %v4881_v18 }
 0x401   :  { %3912 = vmatprep.subr.mxu1 %v4881_v18  ;;  %3845 = vmatpush3.msra.mxu0 %v4881_v18 }
 0x402   :  { %3913 = vmatpush3.msra.mxu1 %v4881_v18  ;;  %3846 = vmatprep.subr.mxu0 %v4881_v18 }
 0x403   :  { %3914 = vmatprep.subr.mxu1 %v4881_v18  ;;  %3847 = vmatpush3.msra.mxu0 %v4881_v18 }
 0x404   :  { %1911 = vmax.xlane.f32.xlu0 %v7153_v40  ;;  %3915 = vmatpush3.msra.mxu1 %v4881_v18 }
 0x405   :  { %3848 = vmatprep.subr.mxu0 %v4881_v18  ;;  %3916 = vmatprep.subr.mxu1 %v4881_v18 }
 0x406   :  { %3849 = vmatpush3.msra.mxu0 %v4881_v18  ;;  %3917 = vmatpush3.msra.mxu1 %v4881_v18 }
 0x407   :  { %3850 = vmatprep.subr.mxu0 %v4881_v18  ;;  %3918 = vmatprep.subr.mxu1 %v4881_v18 }
 0x408   :  { %1915 = vmax.xlane.f32.xlu0 %v6033_v52  ;;  %3851 = vmatpush3.msra.mxu0 %v4881_v18 }
 0x409   :  { %3919 = vmatpush3.msra.mxu1 %v4881_v18  ;;  %1921 = vmax.xlane.f32.xlu1 %v7159_v0 }
 0x40a   :  { %3852 = vmatprep.subr.mxu0 %v4881_v18  ;;  %3920 = vmatprep.subr.mxu1 %v4881_v18 }
 0x40b   :  { %3853 = vmatpush3.msra.mxu0 %v4881_v18  ;;  %3921 = vmatpush3.msra.mxu1 %v4881_v18 }
 0x40c   :  { %1919 = vmax.xlane.f32.xlu0 %v7174_v19 }
 0x40d   :  { %1925 = vmax.xlane.f32.xlu1 %v7168_v28 }
 0x410   :  { %1923 = vmax.xlane.f32.xlu0 %v7178_v20 }
 0x415   :  { %v6234_v11 = vpop.xlane.xlu0 %1879 }
 0x416   :  { %v1927_v14 = vsub.f32 %v7129_v7, %v6234_v11 }
 0x418   :  { %v1951_v43 = vmul.f32 1.442695, %v1927_v14 }
 0x419   :  { %v6242_v17 = vpop.xlane.xlu0 %1881 }
 0x41a   :  { %4416 = vpow2.f32 %v1951_v43  ;;  %v1928_v6 = vsub.f32 %v5839_v41, %v6242_v17 }
 0x41c   :  { %v1953_v44 = vmul.f32 1.442695, %v1928_v6 }
 0x41d   :  { %v6236_v48 = vpop.xlane.xlu1 %1883 }
 0x41e   :  { %v1929_v8 = vsub.f32 %v7136_v57, %v6236_v48 }
 0x420   :  { %v1955_v36 = vmul.f32 1.442695, %v1929_v8 }
 0x421   :  { %v6244_v54 = vpop.xlane.xlu1 %1885 }
 0x422   :  { %v1930_v42 = vsub.f32 %v7132_v34, %v6244_v54  ;;  %4418 = vpow2.f32 %v1955_v36 }
 0x423   :  { %4420 = vpow2.f32 %v1953_v44 }
 0x424   :  { %v1957_v53 = vmul.f32 1.442695, %v1930_v42 }
 0x426   :  { %4422 = vpow2.f32 %v1957_v53 }
 0x427   :  { %v4417_v50 = vpop.eup %4416 }
 0x428   :  { %v6252_v15 = vpop.xlane.xlu1 %1889  ;;  %3854 = vmatprep.mubr.f32.mxu0 %v4417_v50 }
 0x429   :  { %v1932_v35 = vsub.f32 %v7144_v59, %v6252_v15 }
 0x42b   :  { %v1961_v56 = vmul.f32 1.442695, %v1932_v35 }
 0x42f   :  { %v6250_v58 = vpop.xlane.xlu0 %1887  ;;  %v4419_v30 = vpop.eup %4418 }
 0x430   :  { %v1931_v25 = vsub.f32 %v7148_v12, %v6250_v58  ;;  %v4421_v14 = vpop.eup %4420 }
 0x431   :  { %3855 = vmatmul.mubr.f32.vlgmr.msra.gmra.mxu0 %v4421_v14 }
 0x432   :  { %v1959_v61 = vmul.f32 1.442695, %v1931_v25  ;;  %3857 = vmatprep.mubr.f32.mxu0 %v4419_v30 }
 0x433   :  { %v4423_v36 = vpop.eup %4422 }
 0x434   :  { %4424 = vpow2.f32 %v1959_v61 }
 0x435   :  { %4426 = vpow2.f32 %v1961_v56  ;;  %3858 = vmatmul.mubr.f32.gmra.mxu0 %v4423_v36 }
 0x441   :  { %v4425_v25 = vpop.eup %4424 }
 0x442   :  { %v4427_v56 = vpop.eup %4426  ;;  %3860 = vmatprep.mubr.f32.mxu0 %v4425_v25 }
 0x443   :  { %3861 = vmatmul.mubr.f32.gmra.mxu0 %v4427_v56 }
 0x44e   :  { %v6260_v31 = vpop.xlane.xlu1 %1893 }
 0x44f   :  { %v1934_v2 = vsub.f32 %v7157_v29, %v6260_v31 }
 0x451   :  { %v1965_v9 = vmul.f32 1.442695, %v1934_v2 }
 0x452   :  { %v6268_v47 = vpop.xlane.xlu1 %1897 }
 0x453   :  { %v1936_v27 = vsub.f32 %v7155_v51, %v6268_v47 }
 0x455   :  { %v1969_v32 = vmul.f32 1.442695, %v1936_v27 }
 0x45d   :  { %v6258_v21 = vpop.xlane.xlu0 %1891 }
 0x45e   :  { %v1933_v24 = vsub.f32 %v7162_v1, %v6258_v21 }
 0x460   :  { %v1963_v16 = vmul.f32 1.442695, %v1933_v24  ;;  %v6276_v62 = vpop.xlane.xlu1 %1901 }
 0x461   :  { %v1938_v18 = vsub.f32 %v7164_v5, %v6276_v62 }
 0x462   :  { %4428 = vpow2.f32 %v1963_v16 }
 0x463   :  { %4430 = vpow2.f32 %v1965_v9  ;;  %v1973_v43 = vmul.f32 1.442695, %v1938_v18 }
 0x464   :  { %v6284_v42 = vpop.xlane.xlu1 %1905 }
 0x465   :  { %v1940_v53 = vsub.f32 %v7125_v26, %v6284_v42 }
 0x467   :  { %v1977_v61 = vmul.f32 1.442695, %v1940_v53 }
 0x468   :  { %v6292_v2 = vpop.xlane.xlu1 %1909 }
 0x469   :  { %v1942_v9 = vsub.f32 %v7134_v33, %v6292_v2 }
 0x46b   :  { %v1981_v50 = vmul.f32 1.442695, %v1942_v9 }
 0x46c   :  { %v6300_v30 = vpop.xlane.xlu1 %1913 }
 0x46d   :  { %v1944_v18 = vsub.f32 %v7141_v38, %v6300_v30 }
 0x46f   :  { %v6266_v22 = vpop.xlane.xlu0 %1895 }
 0x470   :  { %v1935_v63 = vsub.f32 %v7171_v46, %v6266_v22  ;;  %v6308_v53 = vpop.xlane.xlu1 %1917 }
 0x472   :  { %v1967_v37 = vmul.f32 1.442695, %v1935_v63  ;;  %v4429_v63 = vpop.eup %4428 }
 0x473   :  { %3863 = vmatprep.mubr.f32.mxu0 %v4429_v63 }
 0x474   :  { %4432 = vpow2.f32 %v1967_v37  ;;  %v4431_v37 = vpop.eup %4430 }
 0x475   :  { %4434 = vpow2.f32 %v1969_v32  ;;  %3864 = vmatmul.mubr.f32.gmra.mxu0 %v4431_v37 }
 0x481   :  { %v6274_v49 = vpop.xlane.xlu0 %1899  ;;  %v4433_v14 = vpop.eup %4432 }
 0x482   :  { %v1937_v39 = vsub.f32 %v7176_v4, %v6274_v49  ;;  %v4435_v36 = vpop.eup %4434  ;;  %3866 = vmatprep.mubr.f32.mxu0 %v4433_v14 }
 0x483   :  { %3867 = vmatmul.mubr.f32.gmra.mxu0 %v4435_v36 }
 0x484   :  { %v1971_v8 = vmul.f32 1.442695, %v1937_v39 }
 0x485   :  { %v6282_v6 = vpop.xlane.xlu0 %1903 }
 0x486   :  { %4436 = vpow2.f32 %v1971_v8  ;;  %v1939_v44 = vsub.f32 %v7127_v13, %v6282_v6 }
 0x487   :  { %4438 = vpow2.f32 %v1973_v43  ;;  %v1985_v43 = vmul.f32 1.442695, %v1944_v18 }
 0x488   :  { %v1975_v35 = vmul.f32 1.442695, %v1939_v44 }
 0x489   :  { %v6290_v24 = vpop.xlane.xlu0 %1907 }
 0x48a   :  { %4440 = vpow2.f32 %v1975_v35  ;;  %v1941_v16 = vsub.f32 %v7140_v60, %v6290_v24  ;;  %v1946_v35 = vsub.f32 %v5946_v23, %v6308_v53 }
 0x48b   :  { %4442 = vpow2.f32 %v1977_v61 }
 0x48c   :  { %v1979_v27 = vmul.f32 1.442695, %v1941_v16  ;;  %v1989_v16 = vmul.f32 1.442695, %v1946_v35 }
 0x48d   :  { %v6298_v32 = vpop.xlane.xlu0 %1911 }
 0x48e   :  { %4444 = vpow2.f32 %v1979_v27  ;;  %v1943_v39 = vsub.f32 %v7153_v40, %v6298_v32 }
 0x48f   :  { %4446 = vpow2.f32 %v1981_v50 }
 0x490   :  { %v1983_v8 = vmul.f32 1.442695, %v1943_v39 }
 0x491   :  { %v6306_v44 = vpop.xlane.xlu0 %1915 }
 0x492   :  { %4448 = vpow2.f32 %v1983_v8  ;;  %v1945_v25 = vsub.f32 %v6033_v52, %v6306_v44  ;;  %v6316_v27 = vpop.xlane.xlu1 %1921 }
 0x493   :  { %v4437_v61 = vpop.eup %4436  ;;  %4450 = vpow2.f32 %v1985_v43  ;;  %v1948_v37 = vsub.f32 %v7159_v0, %v6316_v27 }
 0x494   :  { %v1987_v56 = vmul.f32 1.442695, %v1945_v25  ;;  %v4439_v9 = vpop.eup %4438  ;;  %3869 = vmatprep.mubr.f32.mxu0 %v4437_v61 }
 0x495   :  { %v6314_v63 = vpop.xlane.xlu0 %1919  ;;  %3870 = vmatmul.mubr.f32.gmra.mxu0 %v4439_v9  ;;  %v1993_v14 = vmul.f32 1.442695, %v1948_v37 }
 0x496   :  { %4452 = vpow2.f32 %v1987_v56  ;;  %v1947_v50 = vsub.f32 %v7174_v19, %v6314_v63  ;;  %v6324_v36 = vpop.xlane.xlu1 %1925 }
 0x497   :  { %v4441_v39 = vpop.eup %4440  ;;  %4454 = vpow2.f32 %v1989_v16  ;;  %v1950_v35 = vsub.f32 %v7168_v28, %v6324_v36 }
 0x498   :  { %v1991_v18 = vmul.f32 1.442695, %v1947_v50  ;;  %v4443_v8 = vpop.eup %4442  ;;  %3872 = vmatprep.mubr.f32.mxu0 %v4441_v39 }
 0x499   :  { %v6322_v43 = vpop.xlane.xlu0 %1923  ;;  %3873 = vmatmul.mubr.f32.gmra.mxu0 %v4443_v8  ;;  %v1997_v16 = vmul.f32 1.442695, %v1950_v35 }
 0x49a   :  { %4456 = vpow2.f32 %v1991_v18  ;;  %v1949_v25 = vsub.f32 %v7178_v20, %v6322_v43 }
 0x49b   :  { %v4445_v61 = vpop.eup %4444  ;;  %4458 = vpow2.f32 %v1993_v14 }
 0x49c   :  { %v1995_v56 = vmul.f32 1.442695, %v1949_v25  ;;  %v4447_v9 = vpop.eup %4446  ;;  %3875 = vmatprep.mubr.f32.mxu0 %v4445_v61  ;;  %v4882_v25 = vmov 0  }
 0x49d   :  { %3876 = vmatmul.mubr.f32.gmra.mxu0 %v4447_v9  ;;  %4415 = vset.pattern.permute.xlu1 %v4882_v25 }
 0x49e   :  { %4460 = vpow2.f32 %v1995_v56  ;;  %4414 = vset.pattern.permute.xlu0 %v4882_v25 }
 0x49f   :  { %v4449_v50 = vpop.eup %4448  ;;  %4462 = vpow2.f32 %v1997_v16 }
 0x4a0   :  { %v4451_v37 = vpop.eup %4450  ;;  %3878 = vmatprep.mubr.f32.mxu0 %v4449_v50 }
 0x4a1   :  { %3879 = vmatmul.mubr.f32.gmra.mxu0 %v4451_v37 }
 0x4a3   :  { %v4453_v39 = vpop.eup %4452 }
 0x4a4   :  { %v4455_v18 = vpop.eup %4454  ;;  %3881 = vmatprep.mubr.f32.mxu0 %v4453_v39 }
 0x4a5   :  { %3882 = vmatmul.mubr.f32.gmra.mxu0 %v4455_v18 }
 0x4a7   :  { %v4457_v20 = vpop.eup %4456 }
 0x4a8   :  { %v4459_v19 = vpop.eup %4458  ;;  %3884 = vmatprep.mubr.f32.mxu0 %v4457_v20 }
 0x4a9   :  { %3885 = vmatmul.mubr.f32.gmra.mxu0 %v4459_v19 }
 0x4ab   :  { %v4461_v14 = vpop.eup %4460 }
 0x4ac   :  { %v4463_v8 = vpop.eup %4462  ;;  %3887 = vmatprep.mubr.f32.mxu0 %v4461_v14 }
 0x4ad   :  { %3888 = vmatmul.mubr.f32.gmra.mxu0 %v4463_v8 }
 0x4f1   :  { %v3856_v35 = vpop.f32.mrf.mxu0 }
 0x4f2   :  { %4464 = vlog2.f32 %v3856_v35 }
 0x4f3   :  { %v2065_v61 = vpop.f32.mrf.mxu0 }
 0x4f4   :  { %4466 = vlog2.f32 %v2065_v61 }
 0x4f5   :  { %v3859_v56 = vpop.f32.mrf.mxu0 }
 0x4f6   :  { %4468 = vlog2.f32 %v3859_v56 }
 0x4f7   :  { %v2075_v16 = vpop.f32.mrf.mxu0 }
 0x4f8   :  { %4470 = vlog2.f32 %v2075_v16 }
 0x4ff   :  { %v4465_v19 = vpop.eup %4464 }
 0x500   :  { %v2187_v39 = vmul.f32 0.6931472, %v4465_v19 }
 0x501   :  { %v4467_v18 = vpop.eup %4466 }
 0x502   :  { %v2185_v8 = vmul.f32 0.6931472, %v4467_v18  ;;  %v2233_v25 = vadd.f32 %v2187_v39, %v6242_v17 }
 0x503   :  { %v3862_v9 = vpop.f32.mrf.mxu0  ;;  %v4469_v35 = vpop.eup %4468 }
 0x504   :  { %4472 = vlog2.f32 %v3862_v9  ;;  %v2191_v56 = vmul.f32 0.6931472, %v4469_v35  ;;  %v2257_v16 = vsub.f32 %v5265_v55, %v2233_v25  ;;  %v2232_v9 = vadd.f32 %v2185_v8, %v6234_v11 }
 0x505   :  { %v2085_v50 = vpop.f32.mrf.mxu0 }
 0x506   :  { %4474 = vlog2.f32 %v2085_v50  ;;  %v4471_v50 = vpop.eup %4470  ;;  %2287 = vperm.xlu1 %4415, %v2257_v16   ;;  %v2235_v19 = vadd.f32 %v2191_v56, %v6244_v54 }
 0x507   :  { %v2189_v28 = vmul.f32 0.6931472, %v4471_v50 }
 0x509   :  { %v2234_v55 = vadd.f32 %v2189_v28, %v6236_v48  ;;  %v7204_v28 = vld [vmem:[#allocation55_spill] sm:$0xff] }
 0x511   :  { %v4473_v18 = vpop.eup %4472 }
 0x512   :  { %v2195_v39 = vmul.f32 0.6931472, %v4473_v18 }
 0x514   :  { %v2237_v54 = vadd.f32 %v2195_v39, %v6252_v15 }
 0x516   :  { %v2261_v48 = vsub.f32 %v7204_v28, %v2237_v54  ;;  %v7207_v54 = vld [vmem:[#allocation56_spill] sm:$0xff] }
 0x535   :  { %v3865_v20 = vpop.f32.mrf.mxu0 }
 0x536   :  { %4476 = vlog2.f32 %v3865_v20  ;;  %v2256_v20 = vsub.f32 %v5267_v45, %v2232_v9  ;;  %v2258_v45 = vsub.f32 %v5271_v3, %v2234_v55  ;;  %v7205_v55 = vld [vmem:[#allocation58_spill] sm:$0xff] }
 0x537   :  { %v2095_v37 = vpop.f32.mrf.mxu0 }
 0x538   :  { %2282 = vperm.xlu0 %4414, %v2256_v20  }
 0x543   :  { %v3868_v14 = vpop.f32.mrf.mxu0 }
 0x544   :  { %4478 = vlog2.f32 %v3868_v14  ;;  %v4475_v14 = vpop.eup %4474 }
 0x545   :  { %v2105_v61 = vpop.f32.mrf.mxu0  ;;  %4480 = vlog2.f32 %v2095_v37  ;;  %v2259_v37 = vsub.f32 %v5275_v10, %v2235_v19  ;;  %v4477_v8 = vpop.eup %4476  ;;  %v2193_v25 = vmul.f32 0.6931472, %v4475_v14 }
 0x546   :  { %v2199_v56 = vmul.f32 0.6931472, %v4477_v8 }
 0x547   :  { %2297 = vperm.xlu1 %4415, %v2259_v37   ;;  %v2236_v9 = vadd.f32 %v2193_v25, %v6250_v58 }
 0x548   :  { %v2239_v18 = vadd.f32 %v2199_v56, %v6260_v31  ;;  %v7208_v56 = vld [vmem:[#allocation59_spill] sm:$0xff] }
 0x549   :  { %v2260_v14 = vsub.f32 %v7205_v55, %v2236_v9 }
 0x54b   :  { %2292 = vperm.xlu1 %4415, %v2258_v45  }
 0x54f   :  { %2307 = vperm.xlu1 %4415, %v2261_v48  }
 0x553   :  { %2302 = vperm.xlu1 %4415, %v2260_v14  }
 0x555   :  { %v3871_v52 = vpop.f32.mrf.mxu0 }
 0x556   :  { %4482 = vlog2.f32 %v3871_v52 }
 0x557   :  { %4484 = vlog2.f32 %v2105_v61  ;;  %v2115_v17 = vpop.f32.mrf.mxu0  ;;  %v4479_v61 = vpop.eup %4478 }
 0x558   :  { %v2203_v16 = vmul.f32 0.6931472, %v4479_v61  ;;  %v4481_v50 = vpop.eup %4480 }
 0x559   :  { %v3874_v11 = vpop.f32.mrf.mxu0  ;;  %v2197_v39 = vmul.f32 0.6931472, %v4481_v50 }
 0x55a   :  { %4486 = vlog2.f32 %v3874_v11  ;;  %v2241_v3 = vadd.f32 %v2203_v16, %v6268_v47  ;;  %v7206_v11 = vld [vmem:[#allocation57_spill] sm:$0xff] }
 0x55b   :  { %4488 = vlog2.f32 %v2115_v17  ;;  %v2125_v52 = vpop.f32.mrf.mxu0  ;;  %v2238_v16 = vadd.f32 %v2197_v39, %v6258_v21 }
 0x55d   :  { %v3877_v35 = vpop.f32.mrf.mxu0 }
 0x55e   :  { %4490 = vlog2.f32 %v3877_v35  ;;  %v2263_v35 = vsub.f32 %v7207_v54, %v2239_v18 }
 0x55f   :  { %v2135_v10 = vpop.f32.mrf.mxu0  ;;  %4492 = vlog2.f32 %v2125_v52  ;;  %v2265_v52 = vsub.f32 %v7206_v11, %v2241_v3 }
 0x560   :  { %2317 = vperm.xlu1 %4415, %v2263_v35  }
 0x561   :  { %v3880_v20 = vpop.f32.mrf.mxu0  ;;  %2327 = vperm.xlu0 %4414, %v2265_v52  }
 0x562   :  { %4494 = vlog2.f32 %v3880_v20 }
 0x563   :  { %v4483_v19 = vpop.eup %4482  ;;  %4496 = vlog2.f32 %v2135_v10  ;;  %v2145_v15 = vpop.f32.mrf.mxu0 }
 0x564   :  { %v4485_v17 = vpop.eup %4484  ;;  %v2207_v37 = vmul.f32 0.6931472, %v4483_v19  ;;  %v7209_v19 = vld [vmem:[#allocation60_spill] sm:$0xff] }
 0x565   :  { %v3883_v8 = vpop.f32.mrf.mxu0  ;;  %v2201_v47 = vmul.f32 0.6931472, %v4485_v17  ;;  %v2262_v18 = vsub.f32 %v7209_v19, %v2238_v16 }
 0x566   :  { %4498 = vlog2.f32 %v3883_v8  ;;  %v2243_v58 = vadd.f32 %v2207_v37, %v6276_v62 }
 0x567   :  { %v4487_v25 = vpop.eup %4486  ;;  %v2155_v45 = vpop.f32.mrf.mxu0  ;;  %4500 = vlog2.f32 %v2145_v15  ;;  %v2240_v20 = vadd.f32 %v2201_v47, %v6266_v22  ;;  %v7210_v15 = vld [vmem:[#allocation61_spill] sm:$0xff]  ;;  %2312 = vperm.xlu1 %4415, %v2262_v18  }
 0x568   :  { %v4489_v61 = vpop.eup %4488  ;;  %v2211_v31 = vmul.f32 0.6931472, %v4487_v25  ;;  %v2267_v10 = vsub.f32 %v7208_v56, %v2243_v58  ;;  %v7212_v58 = vld [vmem:[#allocation63_spill] sm:$0xff] }
 0x569   :  { %v3886_v28 = vpop.f32.mrf.mxu0  ;;  %v2205_v62 = vmul.f32 0.6931472, %v4489_v61  ;;  %v7213_v61 = vld [vmem:[#allocation64_spill] sm:$0xff]  ;;  %v7214_v56 = vld [vmem:[#allocation71_spill] sm:$0xff] }
 0x56a   :  { %4502 = vlog2.f32 %v3886_v28  ;;  %2337 = vperm.xlu0 %4414, %v2267_v10   ;;  %v2245_v48 = vadd.f32 %v2211_v31, %v6284_v42  ;;  %v7211_v42 = vld [vmem:[#allocation62_spill] sm:$0xff] }
 0x56b   :  { %v4491_v9 = vpop.eup %4490  ;;  %v2165_v50 = vpop.f32.mrf.mxu0  ;;  %4504 = vlog2.f32 %v2155_v45  ;;  %v2264_v14 = vsub.f32 %v7211_v42, %v2240_v20  ;;  %v2242_v11 = vadd.f32 %v2205_v62, %v6274_v49 }
 0x56c   :  { %v2215_v3 = vmul.f32 0.6931472, %v4491_v9  ;;  %v2269_v17 = vsub.f32 %v7210_v15, %v2245_v48  ;;  %v4493_v37 = vpop.eup %4492 }
 0x56d   :  { %v3889_v55 = vpop.f32.mrf.mxu0  ;;  %v2209_v22 = vmul.f32 0.6931472, %v4493_v37  ;;  %2322 = vperm.xlu1 %4415, %v2264_v14  }
 0x56e   :  { %4506 = vlog2.f32 %v3889_v55  ;;  %2347 = vperm.xlu0 %4414, %v2269_v17   ;;  %v2247_v21 = vadd.f32 %v2215_v3, %v6292_v2  ;;  %v2266_v2 = vsub.f32 %v7213_v61, %v2242_v11  ;;  %v7216_v3 = vld [vmem:[#allocation72_spill] sm:$0xff] }
 0x56f   :  { %v4495_v39 = vpop.eup %4494  ;;  %4508 = vlog2.f32 %v2165_v50  ;;  %v2175_v47 = vpop.f32.mrf.mxu0  ;;  %v2244_v49 = vadd.f32 %v2209_v22, %v6282_v6  ;;  %v7215_v50 = vld [vmem:[#allocation66_spill] sm:$0xff]  ;;  %v7217_v17 = vld [vmem:[#allocation68_spill] sm:$0xff] }
 0x570   :  { %v4497_v52 = vpop.eup %4496  ;;  %v2219_v8 = vmul.f32 0.6931472, %v4495_v39  ;;  %v2271_v25 = vsub.f32 %v7212_v58, %v2247_v21  ;;  %4510 = vlog2.f32 %v2175_v47 }
 0x571   :  { %v2213_v35 = vmul.f32 0.6931472, %v4497_v52  ;;  %2332 = vperm.xlu1 %4415, %v2266_v2   ;;  %v2268_v20 = vsub.f32 %v7215_v50, %v2244_v49  ;;  %v7219_v52 = vld [vmem:[#allocation70_spill] sm:$0xff]  ;;  %v7223_v2 = vld [vmem:[#allocation69_spill] sm:$0xff] }
 0x572   :  { %2357 = vperm.xlu0 %4414, %v2271_v25   ;;  %v2249_v45 = vadd.f32 %v2219_v8, %v6300_v30  ;;  %v7220_v8 = vld [vmem:[#allocation74_spill] sm:$0xff] }
 0x573   :  { %v4499_v54 = vpop.eup %4498  ;;  %v2246_v9 = vadd.f32 %v2213_v35, %v6290_v24  ;;  %v7222_v35 = vld [vmem:[#allocation67_spill] sm:$0xff] }
 0x574   :  { %v2223_v31 = vmul.f32 0.6931472, %v4499_v54  ;;  %v2273_v10 = vsub.f32 %v7214_v56, %v2249_v45  ;;  %v4501_v16 = vpop.eup %4500  ;;  %v7221_v45 = vld [vmem:[#allocation65_spill] sm:$0xff] }
 0x575   :  { %v2217_v62 = vmul.f32 0.6931472, %v4501_v16  ;;  %2342 = vperm.xlu1 %4415, %v2268_v20   ;;  %v2270_v37 = vsub.f32 %v7217_v17, %v2246_v9 }
 0x576   :  { %2367 = vperm.xlu0 %4414, %v2273_v10   ;;  %v2251_v28 = vadd.f32 %v2223_v31, %v6308_v53  ;;  %v7218_v53 = vld [vmem:[#allocation73_spill] sm:$0xff] }
 0x577   :  { %v4503_v48 = vpop.eup %4502  ;;  %v2248_v24 = vadd.f32 %v2217_v62, %v6298_v32 }
 0x578   :  { %v2227_v30 = vmul.f32 0.6931472, %v4503_v48  ;;  %v2275_v19 = vsub.f32 %v7216_v3, %v2251_v28  ;;  %v4505_v18 = vpop.eup %4504 }
 0x579   :  { %v2221_v55 = vmul.f32 0.6931472, %v4505_v18  ;;  %2352 = vperm.xlu1 %4415, %v2270_v37   ;;  %v2272_v22 = vsub.f32 %v7219_v52, %v2248_v24 }
 0x57a   :  { %2377 = vperm.xlu0 %4414, %v2275_v19   ;;  %v2253_v15 = vadd.f32 %v2227_v30, %v6316_v27 }
 0x57b   :  { %v4507_v6 = vpop.eup %4506  ;;  %v2250_v27 = vadd.f32 %v2221_v55, %v6306_v44 }
 0x57c   :  { %v2231_v21 = vmul.f32 0.6931472, %v4507_v6  ;;  %v2277_v39 = vsub.f32 %v7218_v53, %v2253_v15  ;;  %v4509_v42 = vpop.eup %4508 }
 0x57d   :  { %v2225_v11 = vmul.f32 0.6931472, %v4509_v42  ;;  %v4511_v25 = vpop.eup %4510  ;;  %2362 = vperm.xlu1 %4415, %v2272_v22   ;;  %v2274_v54 = vsub.f32 %v7221_v45, %v2250_v27 }
 0x57e   :  { %2387 = vperm.xlu0 %4414, %v2277_v39   ;;  %v2255_v14 = vadd.f32 %v2231_v21, %v6324_v36  ;;  %v2229_v47 = vmul.f32 0.6931472, %v4511_v25 }
 0x57f   :  { %v2252_v32 = vadd.f32 %v2225_v11, %v6314_v63 }
 0x580   :  { %v2279_v58 = vsub.f32 %v7220_v8, %v2255_v14  ;;  %v2254_v36 = vadd.f32 %v2229_v47, %v6322_v43 }
 0x581   :  { %2372 = vperm.xlu1 %4415, %v2274_v54   ;;  %v2276_v61 = vsub.f32 %v7222_v35, %v2252_v32  ;;  %v2288_v56 = vpop.permute.xlu1 %2287 }
 0x582   :  { %2397 = vperm.xlu0 %4414, %v2279_v58   ;;  %v2278_v31 = vsub.f32 %v7223_v2, %v2254_v36  ;;  %v2401_v44 = vadd.f32 %v2288_v56, %v5839_v41 }
 0x584   :  { %v2430_v49 = vrot.slane %v2401_v44, 4 }
 0x585   :  { %2382 = vperm.xlu1 %4415, %v2276_v61  }
 0x586   :  { %v2431_v48 = vmax.f32 %v2401_v44, %v2430_v49 }
 0x588   :  { %v2432_v62 = vrot.slane %v2431_v48, 2 }
 0x589   :  { %2392 = vperm.xlu1 %4415, %v2278_v31  }
 0x58a   :  { %v2433_v20 = vmax.f32 %v2431_v48, %v2432_v62 }
 0x58c   :  { %v2434_v15 = vrot.slane %v2433_v20, 1 }
 0x5b3   :  { %v2283_v10 = vpop.permute.xlu0 %2282 }
 0x5b4   :  { %v2400_v16 = vadd.f32 %v2283_v10, %v7129_v7  ;;  %v6382_v7 = vmax.f32 %v2433_v20, %v2434_v15 }
 0x5b6   :  { %v2424_v9 = vrot.slane %v2400_v16, 4  ;;  %v2569_v39 = vsub.f32 %v2401_v44, %v6382_v7 }
 0x5b8   :  { %v2425_v30 = vmax.f32 %v2400_v16, %v2424_v9  ;;  %v2594_v22 = vmul.f32 1.442695, %v2569_v39 }
 0x5ba   :  { %v2426_v3 = vrot.slane %v2425_v30, 2  ;;  %4512 = vpow2.f32 %v2594_v22 }
 0x5bc   :  { %v2427_v41 = vmax.f32 %v2425_v30, %v2426_v3 }
 0x5be   :  { %v2428_v55 = vrot.slane %v2427_v41, 1 }
 0x5c0   :  { %v6388_v24 = vmax.f32 %v2427_v41, %v2428_v55 }
 0x5c2   :  { %v2298_v28 = vpop.permute.xlu1 %2297  ;;  %v2568_v8 = vsub.f32 %v2400_v16, %v6388_v24 }
 0x5c3   :  { %v2403_v63 = vadd.f32 %v2298_v28, %v7132_v34 }
 0x5c4   :  { %v2592_v45 = vmul.f32 1.442695, %v2568_v8 }
 0x5c5   :  { %v2442_v50 = vrot.slane %v2403_v63, 4 }
 0x5c6   :  { %v2293_v43 = vpop.permute.xlu1 %2292  ;;  %4514 = vpow2.f32 %v2592_v45 }
 0x5c7   :  { %v2443_v19 = vmax.f32 %v2403_v63, %v2442_v50  ;;  %v2402_v18 = vadd.f32 %v2293_v43, %v7136_v57 }
 0x5c9   :  { %v2444_v6 = vrot.slane %v2443_v19, 2  ;;  %v2436_v17 = vrot.slane %v2402_v18, 4 }
 0x5ca   :  { %v2308_v37 = vpop.permute.xlu1 %2307 }
 0x5cb   :  { %v2445_v21 = vmax.f32 %v2443_v19, %v2444_v6  ;;  %v2437_v53 = vmax.f32 %v2402_v18, %v2436_v17  ;;  %v6385_v34 = vadd.f32 %v2308_v37, %v7144_v59 }
 0x5cd   :  { %v2446_v42 = vrot.slane %v2445_v21, 1  ;;  %v2438_v14 = vrot.slane %v2437_v53, 2  ;;  %v2454_v57 = vrot.slane %v6385_v34, 4 }
 0x5ce   :  { %v2303_v11 = vpop.permute.xlu1 %2302 }
 0x5cf   :  { %v6392_v58 = vmax.f32 %v2445_v21, %v2446_v42  ;;  %v2439_v27 = vmax.f32 %v2437_v53, %v2438_v14  ;;  %v2455_v25 = vmax.f32 %v6385_v34, %v2454_v57  ;;  %v6396_v59 = vadd.f32 %v2303_v11, %v7148_v12 }
 0x5d1   :  { %v2571_v54 = vsub.f32 %v2403_v63, %v6392_v58  ;;  %v2440_v32 = vrot.slane %v2439_v27, 1  ;;  %v2456_v35 = vrot.slane %v2455_v25, 2  ;;  %v2448_v61 = vrot.slane %v6396_v59, 4 }
 0x5d3   :  { %v2598_v56 = vmul.f32 1.442695, %v2571_v54  ;;  %v6404_v44 = vmax.f32 %v2439_v27, %v2440_v32  ;;  %v2449_v10 = vmax.f32 %v6396_v59, %v2448_v61 }
 0x5d5   :  { %4516 = vpow2.f32 %v2598_v56  ;;  %v2570_v28 = vsub.f32 %v2402_v18, %v6404_v44  ;;  %v2450_v63 = vrot.slane %v2449_v10, 2 }
 0x5d7   :  { %v2596_v43 = vmul.f32 1.442695, %v2570_v28  ;;  %v2451_v18 = vmax.f32 %v2449_v10, %v2450_v63 }
 0x5d9   :  { %4518 = vpow2.f32 %v2596_v43 }
 0x5db   :  { %v2318_v2 = vpop.permute.xlu1 %2317 }
 0x5dc   :  { %v2328_v52 = vpop.permute.xlu0 %2327  ;;  %v6407_v12 = vadd.f32 %v2318_v2, %v7157_v29  ;;  %v6445_v2 = vpop.eup %4512 }
 0x5dd   :  { %v6399_v47 = vadd.f32 %v2328_v52, %v7155_v51  ;;  %v2457_v51 = vmax.f32 %v2455_v25, %v2456_v35 }
 0x5de   :  { %v2466_v48 = vrot.slane %v6407_v12, 4 }
 0x5df   :  { %v2478_v36 = vrot.slane %v6399_v47, 4  ;;  %v2458_v9 = vrot.slane %v2457_v51, 1 }
 0x5e0   :  { %v2467_v20 = vmax.f32 %v6407_v12, %v2466_v48 }
 0x5e1   :  { %v2479_v49 = vmax.f32 %v6399_v47, %v2478_v36  ;;  %v6424_v19 = vmax.f32 %v2457_v51, %v2458_v9 }
 0x5e2   :  { %v2313_v29 = vpop.permute.xlu1 %2312  ;;  %v2468_v6 = vrot.slane %v2467_v20, 2 }
 0x5e3   :  { %v2480_v62 = vrot.slane %v2479_v49, 2  ;;  %v6419_v3 = vadd.f32 %v2313_v29, %v7162_v1  ;;  %v2573_v55 = vsub.f32 %v6385_v34, %v6424_v19  ;;  %v2452_v1 = vrot.slane %v2451_v18, 1 }
 0x5e4   :  { %v2469_v42 = vmax.f32 %v2467_v20, %v2468_v6 }
 0x5e5   :  { %v2338_v31 = vpop.permute.xlu0 %2337  ;;  %v2481_v15 = vmax.f32 %v2479_v49, %v2480_v62  ;;  %v2460_v17 = vrot.slane %v6419_v3, 4  ;;  %v2602_v52 = vmul.f32 1.442695, %v2573_v55  ;;  %v6436_v22 = vmax.f32 %v2451_v18, %v2452_v1  ;;  %v6450_v49 = vpop.eup %4514 }
 0x5e6   :  { %v6412_v16 = vadd.f32 %v2338_v31, %v7164_v5  ;;  %v2470_v34 = vrot.slane %v2469_v42, 1  ;;  %v6459_v29 = vpop.eup %4516 }
 0x5e7   :  { %v2482_v21 = vrot.slane %v2481_v15, 1  ;;  %v2461_v14 = vmax.f32 %v6419_v3, %v2460_v17  ;;  %4520 = vpow2.f32 %v2602_v52  ;;  %v2572_v32 = vsub.f32 %v6396_v59, %v6436_v22 }
 0x5e8   :  { %v2490_v30 = vrot.slane %v6412_v16, 4  ;;  %v6447_v31 = vmax.f32 %v2469_v42, %v2470_v34 }
 0x5e9   :  { %v2348_v50 = vpop.permute.xlu0 %2347  ;;  %v6438_v8 = vmax.f32 %v2481_v15, %v2482_v21  ;;  %v2462_v25 = vrot.slane %v2461_v14, 2  ;;  %v2600_v28 = vmul.f32 1.442695, %v2572_v32  ;;  %v6480_v21 = vpop.eup %4518 }
 0x5ea   :  { %v6422_v5 = vadd.f32 %v2348_v50, %v7125_v26  ;;  %v2491_v41 = vmax.f32 %v6412_v16, %v2490_v30  ;;  %v2323_v26 = vpop.permute.xlu1 %2322 }
 0x5eb   :  { %v6434_v11 = vadd.f32 %v2323_v26, %v7171_v46  ;;  %v2577_v35 = vsub.f32 %v6399_v47, %v6438_v8  ;;  %v2463_v56 = vmax.f32 %v2461_v14, %v2462_v25  ;;  %v2575_v47 = vsub.f32 %v6407_v12, %v6447_v31 }
 0x5ec   :  { %v2502_v37 = vrot.slane %v6422_v5, 4  ;;  %v2492_v53 = vrot.slane %v2491_v41, 2  ;;  %4522 = vpow2.f32 %v2600_v28 }
 0x5ed   :  { %v2358_v39 = vpop.permute.xlu0 %2357  ;;  %v2472_v54 = vrot.slane %v6434_v11, 4  ;;  %v2610_v48 = vmul.f32 1.442695, %v2577_v35  ;;  %v2464_v63 = vrot.slane %v2463_v56, 1 }
 0x5ee   :  { %v2503_v57 = vmax.f32 %v6422_v5, %v2502_v37  ;;  %v2493_v27 = vmax.f32 %v2491_v41, %v2492_v53  ;;  %v2333_v61 = vpop.permute.xlu1 %2332  ;;  %v6455_v59 = vadd.f32 %v2358_v39, %v7134_v33  ;;  %v2606_v33 = vmul.f32 1.442695, %v2575_v47 }
 0x5ef   :  { %v2473_v10 = vmax.f32 %v6434_v11, %v2472_v54  ;;  %v6465_v20 = vadd.f32 %v2333_v61, %v7176_v4  ;;  %4524 = vpow2.f32 %v2610_v48  ;;  %v6467_v15 = vmax.f32 %v2463_v56, %v2464_v63 }
 0x5f0   :  { %v2504_v45 = vrot.slane %v2503_v57, 2  ;;  %v2494_v46 = vrot.slane %v2493_v27, 1  ;;  %v2514_v43 = vrot.slane %v6455_v59, 4  ;;  %4526 = vpow2.f32 %v2606_v33 }
 0x5f1   :  { %v2368_v36 = vpop.permute.xlu0 %2367  ;;  %v2474_v30 = vrot.slane %v2473_v10, 2  ;;  %v2484_v55 = vrot.slane %v6465_v20, 4 }
 0x5f2   :  { %v2505_v51 = vmax.f32 %v2503_v57, %v2504_v45  ;;  %v6452_v9 = vmax.f32 %v2493_v27, %v2494_v46  ;;  %v2343_v18 = vpop.permute.xlu1 %2342  ;;  %v2515_v37 = vmax.f32 %v6455_v59, %v2514_v43  ;;  %v6478_v1 = vadd.f32 %v2368_v36, %v7141_v38 }
 0x5f3   :  { %v2475_v17 = vmax.f32 %v2473_v10, %v2474_v30  ;;  %v2485_v39 = vmax.f32 %v6465_v20, %v2484_v55 }
 0x5f4   :  { %v2506_v62 = vrot.slane %v2505_v51, 1  ;;  %v2579_v50 = vsub.f32 %v6412_v16, %v6452_v9  ;;  %v2574_v16 = vsub.f32 %v6419_v3, %v6467_v15  ;;  %v2516_v26 = vrot.slane %v2515_v37, 2  ;;  %v6499_v36 = vpop.eup %4520 }
 0x5f5   :  { %v2378_v41 = vpop.permute.xlu0 %2377  ;;  %v2476_v53 = vrot.slane %v2475_v17, 1  ;;  %v2526_v52 = vrot.slane %v6478_v1, 4  ;;  %v6485_v3 = vadd.f32 %v2343_v18, %v7127_v13  ;;  %v2486_v38 = vrot.slane %v2485_v39, 2 }
 0x5f6   :  { %v6469_v12 = vmax.f32 %v2505_v51, %v2506_v62  ;;  %v2614_v6 = vmul.f32 1.442695, %v2579_v50  ;;  %v2353_v42 = vpop.permute.xlu1 %2352  ;;  %v2604_v14 = vmul.f32 1.442695, %v2574_v16  ;;  %v6490_v34 = vadd.f32 %v2378_v41, %v5946_v23 }
 0x5f7   :  { %v6487_v27 = vmax.f32 %v2475_v17, %v2476_v53  ;;  %v2527_v25 = vmax.f32 %v6478_v1, %v2526_v52  ;;  %v2496_v45 = vrot.slane %v6485_v3, 4  ;;  %v6495_v54 = vadd.f32 %v2353_v42, %v7140_v60 }
 0x5f8   :  { %v2581_v4 = vsub.f32 %v6422_v5, %v6469_v12  ;;  %4528 = vpow2.f32 %v2614_v6  ;;  %v2517_v5 = vmax.f32 %v2515_v37, %v2516_v26  ;;  %v2487_v46 = vmax.f32 %v2485_v39, %v2486_v38 }
 0x5f9   :  { %4530 = vpow2.f32 %v2604_v14  ;;  %v2388_v32 = vpop.permute.xlu0 %2387  ;;  %v2576_v13 = vsub.f32 %v6434_v11, %v6487_v27  ;;  %v2528_v23 = vrot.slane %v2527_v25, 2  ;;  %v2497_v56 = vmax.f32 %v6485_v3, %v2496_v45  ;;  %v6516_v41 = vpop.eup %4522 }
 0x5fa   :  { %v2618_v57 = vmul.f32 1.442695, %v2581_v4  ;;  %v2518_v35 = vrot.slane %v2517_v5, 1  ;;  %v2363_v61 = vpop.permute.xlu1 %2362  ;;  %v2538_v51 = vrot.slane %v6490_v34, 4  ;;  %v2508_v10 = vrot.slane %v6495_v54, 4 }
 0x5fb   :  { %v2608_v28 = vmul.f32 1.442695, %v2576_v13  ;;  %v2488_v48 = vrot.slane %v2487_v46, 1  ;;  %v6507_v47 = vadd.f32 %v2388_v32, %v7159_v0  ;;  %v2529_v11 = vmax.f32 %v2527_v25, %v2528_v23  ;;  %v7225_v23 = vld [vmem:[#allocation99_spill] sm:$0xff] }
 0x5fc   :  { %4532 = vpow2.f32 %v2618_v57  ;;  %v6504_v60 = vmax.f32 %v2517_v5, %v2518_v35  ;;  %v2498_v63 = vrot.slane %v2497_v56, 2  ;;  %v2539_v62 = vmax.f32 %v6490_v34, %v2538_v51  ;;  %v6518_v55 = vpop.eup %4524 }
 0x5fd   :  { %v2509_v30 = vmax.f32 %v6495_v54, %v2508_v10  ;;  %4534 = vpow2.f32 %v2608_v28  ;;  %v6513_v43 = vmax.f32 %v2487_v46, %v2488_v48  ;;  %v2550_v18 = vrot.slane %v6507_v47, 4  ;;  %v2398_v57 = vpop.permute.xlu0 %2397  ;;  %v6528_v52 = vpop.eup %4526 }
 0x5fe   :  { %v2583_v50 = vsub.f32 %v6455_v59, %v6504_v60  ;;  %v2373_v33 = vpop.permute.xlu1 %2372  ;;  %v2530_v6 = vrot.slane %v2529_v11, 1  ;;  %v2499_v0 = vmax.f32 %v2497_v56, %v2498_v63  ;;  %v2540_v17 = vrot.slane %v2539_v62, 2 }
 0x5ff   :  { %v2510_v37 = vrot.slane %v2509_v30, 2  ;;  %v2578_v4 = vsub.f32 %v6465_v20, %v6513_v43  ;;  %v2551_v53 = vmax.f32 %v6507_v47, %v2550_v18  ;;  %v6524_v59 = vadd.f32 %v2363_v61, %v7153_v40 }
 0x600   :  { %v2622_v16 = vmul.f32 1.442695, %v2583_v50  ;;  %v6526_v26 = vmax.f32 %v2529_v11, %v2530_v6  ;;  %v2500_v39 = vrot.slane %v2499_v0, 1  ;;  %v2541_v42 = vmax.f32 %v2539_v62, %v2540_v17 }
 0x601   :  { %v2511_v14 = vmax.f32 %v2509_v30, %v2510_v37  ;;  %v2612_v5 = vmul.f32 1.442695, %v2578_v4  ;;  %v2552_v38 = vrot.slane %v2551_v53, 2  ;;  %v2520_v25 = vrot.slane %v6524_v59, 4  ;;  %v7227_v30 = vld [vmem:[#allocation98_spill] sm:$0xff] }
 0x602   :  { %7224 = vst [vmem:[#allocation55_spill] sm:$0xff] %v6526_v26  ;;  %4536 = vpow2.f32 %v2622_v16  ;;  %v2383_v45 = vpop.permute.xlu1 %2382  ;;  %v2585_v40 = vsub.f32 %v6478_v1, %v6526_v26  ;;  %v6535_v32 = vmax.f32 %v2499_v0, %v2500_v39  ;;  %v2542_v13 = vrot.slane %v2541_v42, 1 }
 0x603   :  { %v2512_v35 = vrot.slane %v2511_v14, 1  ;;  %4538 = vpow2.f32 %v2612_v5  ;;  %v2553_v46 = vmax.f32 %v2551_v53, %v2552_v38  ;;  %v2521_v61 = vmax.f32 %v6524_v59, %v2520_v25 }
 0x604   :  { %v6539_v56 = vadd.f32 %v2398_v57, %v7225_v23  ;;  %v2626_v51 = vmul.f32 1.442695, %v2585_v40  ;;  %v2580_v10 = vsub.f32 %v6485_v3, %v6535_v32  ;;  %v6543_v28 = vmax.f32 %v2541_v42, %v2542_v13  ;;  %v7229_v42 = vld [vmem:[#allocation100_spill] sm:$0xff]  ;;  %v7230_v40 = vld [vmem:[#allocation101_spill] sm:$0xff] }
 0x605   :  { %v6531_v20 = vpop.eup %4528  ;;  %v6545_v48 = vmax.f32 %v2511_v14, %v2512_v35  ;;  %v2554_v11 = vrot.slane %v2553_v46, 1  ;;  %v2522_v63 = vrot.slane %v2521_v61, 2  ;;  %v6551_v50 = vadd.f32 %v2373_v33, %v7227_v30 }
 0x606   :  { %7226 = vst [vmem:[#allocation58_spill] sm:$0xff] %v6543_v28  ;;  %v6547_v1 = vpop.eup %4530  ;;  %v2562_v62 = vrot.slane %v6539_v56, 4  ;;  %4540 = vpow2.f32 %v2626_v51  ;;  %v2616_v6 = vmul.f32 1.442695, %v2580_v10  ;;  %v2587_v3 = vsub.f32 %v6490_v34, %v6543_v28  ;;  %v2393_v53 = vpop.permute.xlu1 %2392 }
 0x607   :  { %v2582_v0 = vsub.f32 %v6495_v54, %v6545_v48  ;;  %v6559_v17 = vmax.f32 %v2553_v46, %v2554_v11  ;;  %v2523_v37 = vmax.f32 %v2521_v61, %v2522_v63  ;;  %v2532_v4 = vrot.slane %v6551_v50, 4 }
 0x608   :  { %v2563_v16 = vmax.f32 %v6539_v56, %v2562_v62  ;;  %4542 = vpow2.f32 %v2616_v6  ;;  %v2630_v33 = vmul.f32 1.442695, %v2587_v3  ;;  %v6564_v14 = vadd.f32 %v2383_v45, %v7229_v42 }
 0x609   :  { %v6553_v18 = vpop.eup %4532  ;;  %7228 = vst [vmem:[#allocation57_spill] sm:$0xff] %v6559_v17  ;;  %v2620_v39 = vmul.f32 1.442695, %v2582_v0  ;;  %v2589_v34 = vsub.f32 %v6507_v47, %v6559_v17  ;;  %v2524_v57 = vrot.slane %v2523_v37, 1  ;;  %v2533_v54 = vmax.f32 %v6551_v50, %v2532_v4 }
 0x60a   :  { %v2564_v5 = vrot.slane %v2563_v16, 2  ;;  %v6569_v38 = vpop.eup %4534  ;;  %4544 = vpow2.f32 %v2630_v33  ;;  %v2544_v25 = vrot.slane %v6564_v14, 4  ;;  %v6573_v13 = vadd.f32 %v2393_v53, %v7230_v40 }
 0x60b   :  { %v2640_v35 = vrot.slane %v6450_v49, 4  ;;  %4546 = vpow2.f32 %v2620_v39  ;;  %v2634_v45 = vmul.f32 1.442695, %v2589_v34  ;;  %v6576_v46 = vmax.f32 %v2523_v37, %v2524_v57 }
 0x60c   :  { %v2565_v61 = vmax.f32 %v2563_v16, %v2564_v5  ;;  %v2534_v47 = vrot.slane %v2533_v54, 2  ;;  %v2545_v23 = vmax.f32 %v6564_v14, %v2544_v25  ;;  %v2556_v51 = vrot.slane %v6573_v13, 4 }
 0x60d   :  { %7231 = vst [vmem:[#allocation56_spill] sm:$0xff] %v6576_v46  ;;  %v2641_v10 = vadd.f32 %v6450_v49, %v2640_v35  ;;  %4548 = vpow2.f32 %v2634_v45  ;;  %v2584_v11 = vsub.f32 %v6524_v59, %v6576_v46  ;;  %v2646_v62 = vrot.slane %v6445_v2, 4 }
 0x60e   :  { %v2566_v63 = vrot.slane %v2565_v61, 1  ;;  %v2535_v6 = vmax.f32 %v2533_v54, %v2534_v47  ;;  %v2546_v3 = vrot.slane %v2545_v23, 2  ;;  %v2557_v0 = vmax.f32 %v6573_v13, %v2556_v51 }
 0x60f   :  { %v6584_v30 = vpop.eup %4536  ;;  %v2642_v37 = vrot.slane %v2641_v10, 2  ;;  %v2624_v16 = vmul.f32 1.442695, %v2584_v11  ;;  %v2647_v53 = vadd.f32 %v6445_v2, %v2646_v62  ;;  %v2652_v33 = vrot.slane %v6480_v21, 4 }
 0x610   :  { %v6587_v4 = vmax.f32 %v2565_v61, %v2566_v63  ;;  %v6591_v39 = vpop.eup %4538  ;;  %v2536_v59 = vrot.slane %v2535_v6, 1  ;;  %v2547_v42 = vmax.f32 %v2545_v23, %v2546_v3  ;;  %v2558_v34 = vrot.slane %v2557_v0, 2 }
 0x611   :  { %v2643_v57 = vadd.f32 %v2642_v37, %v2641_v10  ;;  %4550 = vpow2.f32 %v2624_v16  ;;  %v2648_v54 = vrot.slane %v2647_v53, 2  ;;  %v2653_v25 = vadd.f32 %v6480_v21, %v2652_v33 }
 0x612   :  { %7232 = vst [vmem:[#allocation59_spill] sm:$0xff] %v6587_v4  ;;  %v2591_v5 = vsub.f32 %v6539_v56, %v6587_v4  ;;  %v6596_v40 = vmax.f32 %v2535_v6, %v2536_v59  ;;  %v2548_v35 = vrot.slane %v2547_v42, 1  ;;  %v2559_v45 = vmax.f32 %v2557_v0, %v2558_v34 }
 0x613   :  { %v2644_v61 = vrot.slane %v2643_v57, 1  ;;  %v6598_v47 = vpop.eup %4540  ;;  %v2649_v11 = vadd.f32 %v2648_v54, %v2647_v53  ;;  %v2654_v63 = vrot.slane %v2653_v25, 2  ;;  %v2658_v23 = vrot.slane %v6459_v29, 4 }
 0x614   :  { %7233 = vst [vmem:[#allocation60_spill] sm:$0xff] %v6596_v40  ;;  %v2638_v51 = vmul.f32 1.442695, %v2591_v5  ;;  %v2586_v10 = vsub.f32 %v6551_v50, %v6596_v40  ;;  %v6603_v62 = vmax.f32 %v2547_v42, %v2548_v35  ;;  %v2560_v56 = vrot.slane %v2559_v45, 1 }
 0x615   :  { %v2645_v3 = vadd.f32 %v2644_v61, %v2643_v57  ;;  %v6605_v37 = vpop.eup %4542  ;;  %v2650_v6 = vrot.slane %v2649_v11, 1  ;;  %v2655_v0 = vadd.f32 %v2654_v63, %v2653_v25  ;;  %v2659_v16 = vadd.f32 %v6459_v29, %v2658_v23 }
 0x616   :  { %7234 = vst [vmem:[#allocation61_spill] sm:$0xff] %v6603_v62  ;;  %4552 = vpow2.f32 %v2638_v51  ;;  %v2628_v33 = vmul.f32 1.442695, %v2586_v10  ;;  %v2588_v53 = vsub.f32 %v6564_v14, %v6603_v62  ;;  %v6610_v59 = vmax.f32 %v2559_v45, %v2560_v56 }
 0x617   :  { %4554 = vlog2.f32 %v2645_v3  ;;  %v6612_v34 = vpop.eup %4544  ;;  %v2651_v50 = vadd.f32 %v2650_v6, %v2649_v11  ;;  %v2656_v42 = vrot.slane %v2655_v0, 1  ;;  %v2660_v5 = vrot.slane %v2659_v16, 2 }
 0x618   :  { %7235 = vst [vmem:[#allocation62_spill] sm:$0xff] %v6610_v59  ;;  %v2664_v57 = vrot.slane %v6516_v41, 4  ;;  %v6615_v54 = vpop.eup %4546  ;;  %4556 = vpow2.f32 %v2628_v33  ;;  %v2632_v25 = vmul.f32 1.442695, %v2588_v53  ;;  %v2590_v35 = vsub.f32 %v6573_v13, %v6610_v59 }
 0x619   :  { %v2670_v61 = vrot.slane %v6499_v36, 4  ;;  %4558 = vlog2.f32 %v2651_v50  ;;  %v2657_v14 = vadd.f32 %v2656_v42, %v2655_v0  ;;  %v2661_v45 = vadd.f32 %v2660_v5, %v2659_v16 }
 0x61a   :  { %v2665_v51 = vadd.f32 %v6516_v41, %v2664_v57  ;;  %v6621_v63 = vpop.eup %4548  ;;  %4560 = vpow2.f32 %v2632_v25  ;;  %v2636_v11 = vmul.f32 1.442695, %v2590_v35  ;;  %v2676_v10 = vrot.slane %v6547_v1, 4 }
 0x61b   :  { %v2671_v23 = vadd.f32 %v6499_v36, %v2670_v61  ;;  %4562 = vlog2.f32 %v2657_v14  ;;  %v2662_v56 = vrot.slane %v2661_v45, 1  ;;  %v2682_v13 = vrot.slane %v6528_v52, 4 }
 0x61c   :  { %v2666_v3 = vrot.slane %v2665_v51, 2  ;;  %4564 = vpow2.f32 %v2636_v11  ;;  %v2677_v0 = vadd.f32 %v6547_v1, %v2676_v10  ;;  %v2688_v16 = vrot.slane %v6569_v38, 4 }
 0x61d   :  { %v2672_v6 = vrot.slane %v2671_v23, 2  ;;  %v2663_v33 = vadd.f32 %v2662_v56, %v2661_v45  ;;  %v2683_v50 = vadd.f32 %v6528_v52, %v2682_v13  ;;  %v2694_v42 = vrot.slane %v6518_v55, 4 }
 0x61e   :  { %v2667_v53 = vadd.f32 %v2666_v3, %v2665_v51  ;;  %v6630_v5 = vpop.eup %4550  ;;  %v2678_v25 = vrot.slane %v2677_v0, 2  ;;  %v2689_v35 = vadd.f32 %v6569_v38, %v2688_v16  ;;  %v2700_v61 = vrot.slane %v6591_v39, 4 }
 0x61f   :  { %v2673_v57 = vadd.f32 %v2672_v6, %v2671_v23  ;;  %4566 = vlog2.f32 %v2663_v33  ;;  %v2684_v11 = vrot.slane %v2683_v50, 2  ;;  %v2695_v10 = vadd.f32 %v6518_v55, %v2694_v42 }
 0x620   :  { %v2668_v14 = vrot.slane %v2667_v53, 1  ;;  %v2679_v45 = vadd.f32 %v2678_v25, %v2677_v0  ;;  %v2690_v51 = vrot.slane %v2689_v35, 2  ;;  %v2701_v56 = vadd.f32 %v6591_v39, %v2700_v61 }
 0x621   :  { %v2674_v4 = vrot.slane %v2673_v57, 1  ;;  %v2685_v13 = vadd.f32 %v2684_v11, %v2683_v50  ;;  %v2696_v59 = vrot.slane %v2695_v10, 2  ;;  %v2706_v23 = vrot.slane %v6531_v20, 4 }
 0x622   :  { %v2669_v3 = vadd.f32 %v2668_v14, %v2667_v53  ;;  %v2680_v17 = vrot.slane %v2679_v45, 1  ;;  %v2691_v62 = vadd.f32 %v2690_v51, %v2689_v35  ;;  %v2702_v33 = vrot.slane %v2701_v56, 2 }
 0x623   :  { %v6637_v6 = vpop.eup %4552  ;;  %v2675_v16 = vadd.f32 %v2674_v4, %v2673_v57  ;;  %v2686_v40 = vrot.slane %v2685_v13, 1  ;;  %v2697_v42 = vadd.f32 %v2696_v59, %v2695_v10  ;;  %v2707_v0 = vadd.f32 %v6531_v20, %v2706_v23 }
 0x624   :  { %v4555_v28 = vpop.eup %4554  ;;  %4568 = vlog2.f32 %v2669_v3  ;;  %v2681_v61 = vadd.f32 %v2680_v17, %v2679_v45  ;;  %v2692_v53 = vrot.slane %v2691_v62, 1  ;;  %v2703_v26 = vadd.f32 %v2702_v33, %v2701_v56  ;;  %v7236_v3 = vld [vmem:[#allocation12_spill] sm:$0xff] }
 0x625   :  { %v2785_v25 = vmul.f32 0.6931472, %v4555_v28  ;;  %4570 = vlog2.f32 %v2675_v16  ;;  %v6640_v50 = vpop.eup %4556  ;;  %v2687_v14 = vadd.f32 %v2686_v40, %v2685_v13  ;;  %v2698_v11 = vrot.slane %v2697_v42, 1 }
 0x626   :  { %v2708_v46 = vrot.slane %v2707_v0, 2  ;;  %v4559_v4 = vpop.eup %4558  ;;  %4572 = vlog2.f32 %v2681_v61  ;;  %v2693_v35 = vadd.f32 %v2692_v53, %v2691_v62  ;;  %v2712_v51 = vrot.slane %v6605_v37, 4 }
 0x627   :  { %v2832_v57 = vadd.f32 %v2785_v25, %v6388_v24  ;;  %v6644_v59 = vpop.eup %4560  ;;  %v2787_v10 = vmul.f32 0.6931472, %v4559_v4  ;;  %4574 = vlog2.f32 %v2687_v14  ;;  %v2699_v28 = vadd.f32 %v2698_v11, %v2697_v42  ;;  %v7237_v14 = vld [vmem:[#allocation17_spill] sm:$0xff] }
 0x628   :  { %v2704_v17 = vrot.slane %v2703_v26, 1  ;;  %v4563_v45 = vpop.eup %4562  ;;  %4576 = vlog2.f32 %v2693_v35  ;;  %v2709_v40 = vadd.f32 %v2708_v46, %v2707_v0  ;;  %v2713_v56 = vadd.f32 %v6605_v37, %v2712_v51 }
 0x629   :  { %v2856_v23 = vsub.f32 %v7236_v3, %v2832_v57  ;;  %v6648_v13 = vpop.eup %4564  ;;  %v2833_v16 = vadd.f32 %v2787_v10, %v6382_v7  ;;  %v2789_v62 = vmul.f32 0.6931472, %v4563_v45  ;;  %4578 = vlog2.f32 %v2699_v28 }
 0x62a   :  { %v2705_v33 = vadd.f32 %v2704_v17, %v2703_v26  ;;  %v2710_v61 = vrot.slane %v2709_v40, 1  ;;  %v2714_v53 = vrot.slane %v2713_v56, 2  ;;  %v2718_v42 = vrot.slane %v6553_v18, 4 }
 0x62b   :  { %v2880_v25 = vadd.f32 %v2856_v23, %v6388_v24  ;;  %v2857_v11 = vsub.f32 %v7237_v14, %v2833_v16  ;;  %v2834_v4 = vadd.f32 %v2789_v62, %v6404_v44  ;;  %v2724_v46 = vrot.slane %v6615_v54, 4  ;;  %v7238_v24 = vld [vmem:[#allocation19_spill] sm:$0xff] }
 0x62c   :  { %4580 = vlog2.f32 %v2705_v33  ;;  %v4567_v0 = vpop.eup %4566  ;;  %v2711_v35 = vadd.f32 %v2710_v61, %v2709_v40  ;;  %v2715_v51 = vadd.f32 %v2714_v53, %v2713_v56  ;;  %v2719_v10 = vadd.f32 %v6553_v18, %v2718_v42 }
 0x62d   :  { %v2904_v57 = vmul.f32 1.442695, %v2880_v25  ;;  %v2881_v26 = vadd.f32 %v2857_v11, %v6382_v7  ;;  %v2858_v28 = vsub.f32 %v7238_v24, %v2834_v4  ;;  %v2791_v17 = vmul.f32 0.6931472, %v4567_v0  ;;  %v7239_v11 = vld [vmem:[#allocation25_spill] sm:$0xff] }
 0x62e   :  { %v2725_v45 = vadd.f32 %v6615_v54, %v2724_v46  ;;  %v2716_v3 = vrot.slane %v2715_v51, 1  ;;  %v2720_v23 = vrot.slane %v2719_v10, 2  ;;  %v2730_v16 = vrot.slane %v6584_v30, 4 }
 0x62f   :  { %4582 = vpow2.f32 %v2904_v57  ;;  %v2906_v62 = vmul.f32 1.442695, %v2881_v26  ;;  %v2882_v33 = vadd.f32 %v2858_v28, %v6404_v44  ;;  %v2835_v40 = vadd.f32 %v2791_v17, %v6392_v58 }
 0x630   :  { %4584 = vlog2.f32 %v2711_v35  ;;  %v2717_v25 = vadd.f32 %v2716_v3, %v2715_v51  ;;  %v2721_v61 = vadd.f32 %v2720_v23, %v2719_v10  ;;  %v2726_v7 = vrot.slane %v2725_v45, 2 }
 0x631   :  { %v4569_v56 = vpop.eup %4568  ;;  %v2731_v53 = vadd.f32 %v6584_v30, %v2730_v16  ;;  %4586 = vpow2.f32 %v2906_v62  ;;  %v2908_v14 = vmul.f32 1.442695, %v2882_v33  ;;  %v2859_v4 = vsub.f32 %v7239_v11, %v2835_v40  ;;  %v7240_v33 = vld [vmem:[#allocation16_spill] sm:$0xff] }
 0x632   :  { %v4571_v42 = vpop.eup %4570  ;;  %v2793_v46 = vmul.f32 0.6931472, %v4569_v56  ;;  %4588 = vlog2.f32 %v2717_v25  ;;  %v2722_v57 = vrot.slane %v2721_v61, 1  ;;  %v2727_v26 = vadd.f32 %v2726_v7, %v2725_v45  ;;  %v7241_v7 = vld [vmem:[#allocation23_spill] sm:$0xff] }
 0x633   :  { %v2795_v0 = vmul.f32 0.6931472, %v4571_v42  ;;  %v4573_v44 = vpop.eup %4572  ;;  %4590 = vpow2.f32 %v2908_v14  ;;  %v2883_v35 = vadd.f32 %v2859_v4, %v6392_v58  ;;  %v2732_v10 = vrot.slane %v2731_v53, 2 }
 0x634   :  { %v2836_v51 = vadd.f32 %v2793_v46, %v6436_v22  ;;  %v4575_v24 = vpop.eup %4574  ;;  %v2797_v17 = vmul.f32 0.6931472, %v4573_v44  ;;  %v2723_v3 = vadd.f32 %v2722_v57, %v2721_v61  ;;  %v2728_v23 = vrot.slane %v2727_v26, 1  ;;  %v7242_v57 = vld [vmem:[#allocation24_spill] sm:$0xff] }
 0x635   :  { %v2837_v28 = vadd.f32 %v2795_v0, %v6424_v19  ;;  %v4577_v16 = vpop.eup %4576  ;;  %v2910_v62 = vmul.f32 1.442695, %v2883_v35  ;;  %v2799_v56 = vmul.f32 0.6931472, %v4575_v24  ;;  %v2733_v25 = vadd.f32 %v2732_v10, %v2731_v53  ;;  %v7243_v10 = vld [vmem:[#allocation28_spill] sm:$0xff] }
 0x636   :  { %v2860_v40 = vsub.f32 %v7240_v33, %v2836_v51  ;;  %v4579_v45 = vpop.eup %4578  ;;  %v2838_v58 = vadd.f32 %v2797_v17, %v6467_v15  ;;  %v2801_v14 = vmul.f32 0.6931472, %v4577_v16  ;;  %4592 = vlog2.f32 %v2723_v3  ;;  %v7244_v16 = vld [vmem:[#allocation10_spill] sm:$0xff] }
 0x637   :  { %v2861_v42 = vsub.f32 %v7241_v7, %v2837_v28  ;;  %4594 = vpow2.f32 %v2910_v62  ;;  %v2839_v4 = vadd.f32 %v2799_v56, %v6447_v31  ;;  %v2803_v61 = vmul.f32 0.6931472, %v4579_v45  ;;  %v7246_v45 = vld [vmem:[#allocation6_spill] sm:$0xff] }
 0x638   :  { %v2884_v11 = vadd.f32 %v2860_v40, %v6436_v22  ;;  %v2862_v44 = vsub.f32 %v7242_v57, %v2838_v58  ;;  %v2840_v53 = vadd.f32 %v2801_v14, %v6487_v27  ;;  %v2729_v35 = vadd.f32 %v2728_v23, %v2727_v26  ;;  %v7245_v40 = vld [vmem:[#allocation14_spill] sm:$0xff] }
 0x639   :  { %v4581_v46 = vpop.eup %4580  ;;  %v2885_v0 = vadd.f32 %v2861_v42, %v6424_v19  ;;  %v2863_v24 = vsub.f32 %v7243_v10, %v2839_v4  ;;  %v2841_v28 = vadd.f32 %v2803_v61, %v6438_v8  ;;  %v2734_v57 = vrot.slane %v2733_v25, 1  ;;  %v7248_v10 = vld [vmem:[#allocation7_spill] sm:$0xff] }
 0x63a   :  { %v2912_v51 = vmul.f32 1.442695, %v2884_v11  ;;  %v2805_v17 = vmul.f32 0.6931472, %v4581_v46  ;;  %v2886_v22 = vadd.f32 %v2862_v44, %v6467_v15  ;;  %v2864_v62 = vsub.f32 %v7244_v16, %v2840_v53  ;;  %v7247_v11 = vld [vmem:[#allocation15_spill] sm:$0xff] }
 0x63b   :  { %v2914_v3 = vmul.f32 1.442695, %v2885_v0  ;;  %4596 = vlog2.f32 %v2729_v35  ;;  %v2887_v19 = vadd.f32 %v2863_v24, %v6447_v31  ;;  %v2865_v56 = vsub.f32 %v7245_v40, %v2841_v28  ;;  %v7250_v40 = vld [vmem:[#allocation9_spill] sm:$0xff] }
 0x63c   :  { %v4583_v33 = vpop.eup %4582  ;;  %4598 = vpow2.f32 %v2912_v51  ;;  %v2842_v26 = vadd.f32 %v2805_v17, %v6513_v43  ;;  %v2916_v42 = vmul.f32 1.442695, %v2886_v22  ;;  %v2888_v58 = vadd.f32 %v2864_v62, %v6487_v27  ;;  %v7249_v22 = vld [vmem:[#allocation22_spill] sm:$0xff] }
 0x63d   :  { %v4585_v23 = vpop.eup %4584  ;;  %v2955_v7 = vrot.slane %v4583_v33, %v7246_v45  ;;  %4600 = vpow2.f32 %v2914_v3  ;;  %v2918_v14 = vmul.f32 1.442695, %v2887_v19  ;;  %v2889_v15 = vadd.f32 %v2865_v56, %v6438_v8 }
 0x63e   :  { %v2866_v4 = vsub.f32 %v7247_v11, %v2842_v26  ;;  %v2807_v61 = vmul.f32 0.6931472, %v4585_v23  ;;  %v4587_v46 = vpop.eup %4586  ;;  %4602 = vpow2.f32 %v2916_v42  ;;  %v2920_v0 = vmul.f32 1.442695, %v2888_v58  ;;  %v7251_v42 = vld [vmem:[#allocation13_spill] sm:$0xff] }
 0x63f   :  { %v3048_v31 = vmul.f32 %v6450_v49, %v2955_v7  ;;  %v4589_v44 = vpop.eup %4588  ;;  %v2959_v53 = vrot.slane %v4587_v46, %v7246_v45  ;;  %4604 = vpow2.f32 %v2918_v14  ;;  %v2922_v35 = vmul.f32 1.442695, %v2889_v15  ;;  %v7252_v15 = vld [vmem:[#allocation8_spill] sm:$0xff] }
 0x640   :  { %v2890_v51 = vadd.f32 %v2866_v4, %v6513_v43  ;;  %v4591_v27 = vpop.eup %4590  ;;  %4606 = vpow2.f32 %v2920_v0  ;;  %v2843_v8 = vadd.f32 %v2807_v61, %v6452_v9  ;;  %v2809_v28 = vmul.f32 0.6931472, %v4589_v44 }
 0x641   :  { %v3072_v24 = vmul.f32 %v3048_v31, %v7248_v10  ;;  %v3049_v17 = vmul.f32 %v6445_v2, %v2959_v53  ;;  %v2963_v49 = vrot.slane %v4591_v27, %v7246_v45  ;;  %4608 = vpow2.f32 %v2922_v35  ;;  %v7253_v10 = vld [vmem:[#allocation20_spill] sm:$0xff] }
 0x642   :  { %v2924_v3 = vmul.f32 1.442695, %v2890_v51  ;;  %v2867_v16 = vsub.f32 %v7249_v22, %v2843_v8  ;;  %v2844_v62 = vadd.f32 %v2809_v28, %v6535_v32  ;;  %v2735_v33 = vadd.f32 %v2734_v57, %v2733_v25 }
 0x643   :  { %3922 = vmatprep.mubr.f32.mxu1 %v3072_v24  ;;  %v2736_v43 = vrot.slane %v6630_v5, 4  ;;  %v4593_v19 = vpop.eup %4592  ;;  %v3073_v56 = vmul.f32 %v3049_v17, %v7250_v40  ;;  %v3050_v26 = vmul.f32 %v6480_v21, %v2963_v49  ;;  %v2742_v2 = vrot.slane %v6598_v47, 4 }
 0x644   :  { %4610 = vpow2.f32 %v2924_v3  ;;  %v4595_v23 = vpop.eup %4594  ;;  %v2891_v7 = vadd.f32 %v2867_v16, %v6452_v9  ;;  %v2868_v58 = vsub.f32 %v7251_v42, %v2844_v62  ;;  %v2811_v14 = vmul.f32 0.6931472, %v4593_v19  ;;  %v7255_v42 = vld [vmem:[#allocation21_spill] sm:$0xff] }
 0x645   :  { %4612 = vlog2.f32 %v2735_v33  ;;  %3923 = vmatmul.mubr.f32.vlgmr.msra.gmra.mxu1 %v3073_v56  ;;  %v3074_v25 = vmul.f32 %v3050_v26, %v7252_v15  ;;  %v2967_v11 = vrot.slane %v4595_v23, %v7246_v45  ;;  %v2737_v4 = vadd.f32 %v6630_v5, %v2736_v43 }
 0x646   :  { %v2743_v61 = vadd.f32 %v6598_v47, %v2742_v2  ;;  %v2926_v21 = vmul.f32 1.442695, %v2891_v7  ;;  %v2892_v46 = vadd.f32 %v2868_v58, %v6535_v32  ;;  %v2845_v31 = vadd.f32 %v2811_v14, %v6469_v12  ;;  %v7254_v32 = vld [vmem:[#allocation11_spill] sm:$0xff] }
 0x647   :  { %v2748_v9 = vrot.slane %v6640_v50, 4  ;;  %3925 = vmatprep.mubr.f32.mxu1 %v3074_v25  ;;  %v3051_v57 = vmul.f32 %v6459_v29, %v2967_v11  ;;  %v2738_v44 = vrot.slane %v2737_v4, 2  ;;  %v2754_v35 = vrot.slane %v6612_v34, 4 }
 0x648   :  { %v4597_v0 = vpop.eup %4596  ;;  %v2744_v53 = vrot.slane %v2743_v61, 2  ;;  %4614 = vpow2.f32 %v2926_v21  ;;  %v2928_v27 = vmul.f32 1.442695, %v2892_v46  ;;  %v2869_v24 = vsub.f32 %v7253_v10, %v2845_v31  ;;  %v7259_v10 = vld [vmem:[#allocation36_spill] sm:$0xff] }
 0x649   :  { %v4599_v51 = vpop.eup %4598  ;;  %v2813_v8 = vmul.f32 0.6931472, %v4597_v0  ;;  %v3075_v17 = vmul.f32 %v3051_v57, %v7254_v32  ;;  %v2739_v3 = vadd.f32 %v2738_v44, %v2737_v4  ;;  %v2749_v56 = vadd.f32 %v6640_v50, %v2748_v9  ;;  %v7258_v44 = vld [vmem:[#allocation33_spill] sm:$0xff]  ;;  %v7260_v32 = vld [vmem:[#allocation40_spill] sm:$0xff] }
 0x64a   :  { %v4601_v28 = vpop.eup %4600  ;;  %v2971_v49 = vrot.slane %v4599_v51, %v7246_v45  ;;  %v2745_v22 = vadd.f32 %v2744_v53, %v2743_v61  ;;  %4616 = vpow2.f32 %v2928_v27  ;;  %v2893_v29 = vadd.f32 %v2869_v24, %v6469_v12  ;;  %v7256_v12 = vld [vmem:[#allocation27_spill] sm:$0xff]  ;;  %v7257_v61 = vld [vmem:[#allocation18_spill] sm:$0xff] }
 0x64b   :  { %v2975_v16 = vrot.slane %v4601_v28, %v7246_v45  ;;  %v2846_v62 = vadd.f32 %v2813_v8, %v6545_v48  ;;  %v4603_v33 = vpop.eup %4602  ;;  %3926 = vmatmul.mubr.f32.gmra.mxu1 %v3075_v17  ;;  %v2740_v19 = vrot.slane %v2739_v3, 1  ;;  %v2750_v27 = vrot.slane %v2749_v56, 2 }
 0x64c   :  { %v3052_v43 = vmul.f32 %v6516_v41, %v2971_v49  ;;  %v2746_v40 = vrot.slane %v2745_v22, 1  ;;  %v4605_v26 = vpop.eup %4604  ;;  %v2979_v23 = vrot.slane %v4603_v33, %v7246_v45  ;;  %v2930_v7 = vmul.f32 1.442695, %v2893_v29 }
 0x64d   :  { %v3053_v2 = vmul.f32 %v6499_v36, %v2975_v16  ;;  %v2870_v58 = vsub.f32 %v7255_v42, %v2846_v62  ;;  %v4607_v14 = vpop.eup %4606  ;;  %v2983_v25 = vrot.slane %v4605_v26, %v7246_v45  ;;  %v2741_v11 = vadd.f32 %v2740_v19, %v2739_v3 }
 0x64e   :  { %v3076_v15 = vmul.f32 %v3052_v43, %v7256_v12  ;;  %v2747_v4 = vadd.f32 %v2746_v40, %v2745_v22  ;;  %v4609_v41 = vpop.eup %4608  ;;  %v3054_v46 = vmul.f32 %v6547_v1, %v2979_v23  ;;  %v2987_v31 = vrot.slane %v4607_v14, %v7246_v45  ;;  %v7261_v22 = vld [vmem:[#allocation39_spill] sm:$0xff]  ;;  %v7262_v40 = vld [vmem:[#allocation42_spill] sm:$0xff] }
 0x64f   :  { %v3077_v21 = vmul.f32 %v3053_v2, %v7257_v61  ;;  %4618 = vpow2.f32 %v2930_v7  ;;  %v3055_v36 = vmul.f32 %v6528_v52, %v2983_v25  ;;  %v2991_v9 = vrot.slane %v4609_v41, %v7246_v45  ;;  %v7263_v23 = vld [vmem:[#allocation26_spill] sm:$0xff] }
 0x650   :  { %3928 = vmatprep.mubr.f32.mxu1 %v3076_v15  ;;  %v2894_v0 = vadd.f32 %v2870_v58, %v6545_v48  ;;  %4620 = vlog2.f32 %v2741_v11  ;;  %v3078_v53 = vmul.f32 %v3054_v46, %v7258_v44  ;;  %v3056_v51 = vmul.f32 %v6569_v38, %v2987_v31 }
 0x651   :  { %v4611_v57 = vpop.eup %4610  ;;  %3929 = vmatmul.mubr.f32.gmra.mxu1 %v3077_v21  ;;  %4622 = vlog2.f32 %v2747_v4  ;;  %v3079_v24 = vmul.f32 %v3055_v36, %v7259_v10  ;;  %v3057_v8 = vmul.f32 %v6518_v55, %v2991_v9  ;;  %v2751_v49 = vadd.f32 %v2750_v27, %v2749_v56  ;;  %v7264_v9 = vld [vmem:[#allocation41_spill] sm:$0xff] }
 0x652   :  { %v4613_v1 = vpop.eup %4612  ;;  %v2995_v52 = vrot.slane %v4611_v57, %v7246_v45  ;;  %v2932_v28 = vmul.f32 1.442695, %v2894_v0  ;;  %3931 = vmatprep.mubr.f32.mxu1 %v3078_v53  ;;  %v3080_v48 = vmul.f32 %v3056_v51, %v7260_v32  ;;  %v2755_v3 = vadd.f32 %v6612_v34, %v2754_v35 }
 0x653   :  { %v2815_v17 = vmul.f32 0.6931472, %v4613_v1  ;;  %v3081_v16 = vmul.f32 %v3057_v8, %v7261_v22  ;;  %v2760_v29 = vrot.slane %v6644_v59, 4  ;;  %v2752_v62 = vrot.slane %v2751_v49, 1 }
 0x654   :  { %v3058_v38 = vmul.f32 %v6591_v39, %v2995_v52  ;;  %4624 = vpow2.f32 %v2932_v28  ;;  %v2756_v33 = vrot.slane %v2755_v3, 2  ;;  %v2766_v43 = vrot.slane %v6621_v63, 4 }
 0x655   :  { %3932 = vmatmul.mubr.f32.gmra.mxu1 %v3079_v24  ;;  %v2847_v55 = vadd.f32 %v2815_v17, %v6504_v60  ;;  %v4615_v19 = vpop.eup %4614  ;;  %v2761_v35 = vadd.f32 %v6644_v59, %v2760_v29  ;;  %v2772_v26 = vrot.slane %v6648_v13, 4  ;;  %v2778_v39 = vrot.slane %v6637_v6, 4 }
 0x656   :  { %3934 = vmatprep.mubr.f32.mxu1 %v3080_v48  ;;  %v3082_v56 = vmul.f32 %v3058_v38, %v7262_v40  ;;  %v2999_v2 = vrot.slane %v4615_v19, %v7246_v45  ;;  %v2753_v42 = vadd.f32 %v2752_v62, %v2751_v49  ;;  %v2757_v58 = vadd.f32 %v2756_v33, %v2755_v3  ;;  %v7266_v38 = vld [vmem:[#allocation56_spill] sm:$0xff]  ;;  %v7267_v33 = vld [vmem:[#allocation43_spill] sm:$0xff] }
 0x657   :  { %v2871_v7 = vsub.f32 %v7263_v23, %v2847_v55  ;;  %v4617_v14 = vpop.eup %4616  ;;  %v2762_v12 = vrot.slane %v2761_v35, 2  ;;  %v2767_v15 = vadd.f32 %v6621_v63, %v2766_v43  ;;  %v2773_v25 = vadd.f32 %v6648_v13, %v2772_v26  ;;  %v7268_v19 = vld [vmem:[#allocation55_spill] sm:$0xff] }
 0x658   :  { %v2779_v11 = vadd.f32 %v6637_v6, %v2778_v39  ;;  %v3059_v4 = vmul.f32 %v6531_v20, %v2999_v2  ;;  %v3003_v41 = vrot.slane %v4617_v14, %v7246_v45  ;;  %4626 = vlog2.f32 %v2753_v42  ;;  %v7269_v39 = vld [vmem:[#allocation29_spill] sm:$0xff] }
 0x659   :  { %3935 = vmatmul.mubr.f32.gmra.mxu1 %v3081_v16  ;;  %v2895_v61 = vadd.f32 %v2871_v7, %v6504_v60  ;;  %v2758_v21 = vrot.slane %v2757_v58, 1  ;;  %v2763_v46 = vadd.f32 %v2762_v12, %v2761_v35  ;;  %v2768_v31 = vrot.slane %v2767_v15, 2  ;;  %v7265_v60 = vld [vmem:[#allocation44_spill] sm:$0xff]  ;;  %v7271_v12 = vld [vmem:[#allocation45_spill] sm:$0xff] }
 0x65a   :  { %3937 = vmatprep.mubr.f32.mxu1 %v3082_v56  ;;  %v2774_v36 = vrot.slane %v2773_v25, 2  ;;  %v3083_v0 = vmul.f32 %v3059_v4, %v7264_v9  ;;  %v3060_v57 = vmul.f32 %v6605_v37, %v3003_v41  ;;  %v2780_v53 = vrot.slane %v2779_v11, 2  ;;  %v7272_v41 = vld [vmem:[#allocation60_spill] sm:$0xff] }
 0x65b   :  { %v2934_v44 = vmul.f32 1.442695, %v2895_v61  ;;  %v2759_v27 = vadd.f32 %v2758_v21, %v2757_v58  ;;  %v2764_v1 = vrot.slane %v2763_v46, 1  ;;  %v2769_v20 = vadd.f32 %v2768_v31, %v2767_v15  ;;  %v7273_v31 = vld [vmem:[#allocation32_spill] sm:$0xff] }
 0x65c   :  { %v4619_v51 = vpop.eup %4618  ;;  %v2775_v10 = vadd.f32 %v2774_v36, %v2773_v25  ;;  %v3084_v8 = vmul.f32 %v3060_v57, %v7265_v60  ;;  %v2781_v28 = vadd.f32 %v2780_v53, %v2779_v11  ;;  %v7274_v53 = vld [vmem:[#allocation58_spill] sm:$0xff] }
 0x65d   :  { %v4621_v24 = vpop.eup %4620  ;;  %3938 = vmatmul.mubr.f32.gmra.mxu1 %v3083_v0  ;;  %v3007_v52 = vrot.slane %v4619_v51, %v7246_v45  ;;  %4628 = vpow2.f32 %v2934_v44  ;;  %v2765_v17 = vadd.f32 %v2764_v1, %v2763_v46  ;;  %v2770_v37 = vrot.slane %v2769_v20, 1 }
 0x65e   :  { %v4623_v32 = vpop.eup %4622  ;;  %v2817_v48 = vmul.f32 0.6931472, %v4621_v24  ;;  %4630 = vlog2.f32 %v2759_v27  ;;  %3940 = vmatprep.mubr.f32.mxu1 %v3084_v8  ;;  %v2776_v22 = vrot.slane %v2775_v10, 1  ;;  %v2782_v16 = vrot.slane %v2781_v28, 1  ;;  %v7276_v8 = vld [vmem:[#allocation37_spill] sm:$0xff] }
 0x65f   :  { %v3061_v49 = vmul.f32 %v6553_v18, %v3007_v52  ;;  %v2819_v3 = vmul.f32 0.6931472, %v4623_v32  ;;  %4632 = vlog2.f32 %v2765_v17  ;;  %v2771_v55 = vadd.f32 %v2770_v37, %v2769_v20  ;;  %v7270_v18 = vld [vmem:[#allocation31_spill] sm:$0xff] }
 0x660   :  { %v2848_v29 = vadd.f32 %v2817_v48, %v7266_v38  ;;  %v2777_v56 = vadd.f32 %v2776_v22, %v2775_v10  ;;  %v2783_v35 = vadd.f32 %v2782_v16, %v2781_v28  ;;  %v7275_v20 = vld [vmem:[#allocation47_spill] sm:$0xff]  ;;  %v7277_v28 = vld [vmem:[#allocation61_spill] sm:$0xff] }
 0x661   :  { %v4625_v62 = vpop.eup %4624  ;;  %v3085_v43 = vmul.f32 %v3061_v49, %v7267_v33  ;;  %v2849_v40 = vadd.f32 %v2819_v3, %v7268_v19  ;;  %4634 = vlog2.f32 %v2771_v55  ;;  %v7278_v49 = vld [vmem:[#allocation30_spill] sm:$0xff]  ;;  %v7279_v22 = vld [vmem:[#allocation57_spill] sm:$0xff] }
 0x662   :  { %v3011_v26 = vrot.slane %v4625_v62, %v7246_v45  ;;  %v2872_v2 = vsub.f32 %v7269_v39, %v2848_v29  ;;  %4636 = vlog2.f32 %v2777_v56  ;;  %v7280_v29 = vld [vmem:[#allocation62_spill] sm:$0xff] }
 0x663   :  { %3941 = vmatmul.mubr.f32.gmra.mxu1 %v3085_v43  ;;  %v2873_v23 = vsub.f32 %v7270_v18, %v2849_v40  ;;  %4638 = vlog2.f32 %v2783_v35  ;;  %v7281_v43 = vld [vmem:[#allocation34_spill] sm:$0xff]  ;;  %v7282_v40 = vld [vmem:[#allocation59_spill] sm:$0xff] }
 0x664   :  { %v3062_v7 = vmul.f32 %v6615_v54, %v3011_v26  ;;  %v2896_v42 = vadd.f32 %v2872_v2, %v7266_v38  ;;  %v7283_v26 = vld [vmem:[#allocation35_spill] sm:$0xff] }
 0x665   :  { %v2897_v58 = vadd.f32 %v2873_v23, %v7268_v19  ;;  %v4627_v14 = vpop.eup %4626 }
 0x666   :  { %v3086_v15 = vmul.f32 %v3062_v7, %v7271_v12  ;;  %v2936_v25 = vmul.f32 1.442695, %v2896_v42  ;;  %v2821_v4 = vmul.f32 0.6931472, %v4627_v14  ;;  %v7284_v14 = vld [vmem:[#allocation38_spill] sm:$0xff] }
 0x667   :  { %v2938_v11 = vmul.f32 1.442695, %v2897_v58 }
 0x668   :  { %3943 = vmatprep.mubr.f32.mxu1 %v3086_v15  ;;  %4640 = vpow2.f32 %v2936_v25  ;;  %v2850_v61 = vadd.f32 %v2821_v4, %v7272_v41 }
 0x669   :  { %4642 = vpow2.f32 %v2938_v11 }
 0x66a   :  { %v4629_v21 = vpop.eup %4628  ;;  %v2874_v36 = vsub.f32 %v7273_v31, %v2850_v61  ;;  %v7285_v61 = vld [vmem:[#allocation46_spill] sm:$0xff] }
 0x66b   :  { %v4631_v46 = vpop.eup %4630  ;;  %v3015_v54 = vrot.slane %v4629_v21, %v7246_v45 }
 0x66c   :  { %v2823_v9 = vmul.f32 0.6931472, %v4631_v46  ;;  %v4633_v0 = vpop.eup %4632  ;;  %v2898_v44 = vadd.f32 %v2874_v36, %v7272_v41  ;;  %v7286_v46 = vld [vmem:[#allocation49_spill] sm:$0xff] }
 0x66d   :  { %v3063_v57 = vmul.f32 %v6584_v30, %v3015_v54  ;;  %v2825_v27 = vmul.f32 0.6931472, %v4633_v0 }
 0x66e   :  { %v2851_v51 = vadd.f32 %v2823_v9, %v7274_v53  ;;  %v4635_v1 = vpop.eup %4634  ;;  %v2940_v24 = vmul.f32 1.442695, %v2898_v44 }
 0x66f   :  { %v3087_v10 = vmul.f32 %v3063_v57, %v7275_v20  ;;  %v4637_v60 = vpop.eup %4636  ;;  %v2852_v32 = vadd.f32 %v2825_v27, %v7277_v28  ;;  %v2827_v48 = vmul.f32 0.6931472, %v4635_v1 }
 0x670   :  { %v2875_v52 = vsub.f32 %v7276_v8, %v2851_v51  ;;  %v4639_v17 = vpop.eup %4638  ;;  %4644 = vpow2.f32 %v2940_v24  ;;  %v2829_v37 = vmul.f32 0.6931472, %v4637_v60 }
 0x671   :  { %3944 = vmatmul.mubr.f32.gmra.mxu1 %v3087_v10  ;;  %v2876_v3 = vsub.f32 %v7278_v49, %v2852_v32  ;;  %v2853_v16 = vadd.f32 %v2827_v48, %v7279_v22  ;;  %v2831_v38 = vmul.f32 0.6931472, %v4639_v17  ;;  %v7288_v10 = vld [vmem:[#allocation51_spill] sm:$0xff]  ;;  %v7291_v49 = vld [vmem:[#allocation52_spill] sm:$0xff] }
 0x672   :  { %v2899_v30 = vadd.f32 %v2875_v52, %v7274_v53  ;;  %v2854_v55 = vadd.f32 %v2829_v37, %v7280_v29  ;;  %v7290_v37 = vld [vmem:[#allocation53_spill] sm:$0xff] }
 0x673   :  { %v2900_v33 = vadd.f32 %v2876_v3, %v7277_v28  ;;  %v2877_v19 = vsub.f32 %v7281_v43, %v2853_v16  ;;  %v2855_v56 = vadd.f32 %v2831_v38, %v7282_v40  ;;  %v7289_v28 = vld [vmem:[#allocation50_spill] sm:$0xff] }
 0x674   :  { %v2942_v62 = vmul.f32 1.442695, %v2899_v30  ;;  %v2878_v39 = vsub.f32 %v7283_v26, %v2854_v55 }
 0x675   :  { %v4641_v35 = vpop.eup %4640  ;;  %v2944_v23 = vmul.f32 1.442695, %v2900_v33  ;;  %v2901_v7 = vadd.f32 %v2877_v19, %v7279_v22  ;;  %v2879_v12 = vsub.f32 %v7284_v14, %v2855_v56  ;;  %v7292_v22 = vld [vmem:[#allocation54_spill] sm:$0xff] }
 0x676   :  { %v4643_v2 = vpop.eup %4642  ;;  %v3019_v18 = vrot.slane %v4641_v35, %v7246_v45  ;;  %4646 = vpow2.f32 %v2942_v62  ;;  %v2902_v58 = vadd.f32 %v2878_v39, %v7280_v29 }
 0x677   :  { %v3023_v42 = vrot.slane %v4643_v2, %v7246_v45  ;;  %4648 = vpow2.f32 %v2944_v23  ;;  %v2946_v25 = vmul.f32 1.442695, %v2901_v7  ;;  %v2903_v41 = vadd.f32 %v2879_v12, %v7282_v40 }
 0x678   :  { %v3064_v15 = vmul.f32 %v6630_v5, %v3019_v18  ;;  %v2948_v4 = vmul.f32 1.442695, %v2902_v58 }
 0x679   :  { %v3065_v11 = vmul.f32 %v6598_v47, %v3023_v42  ;;  %4650 = vpow2.f32 %v2946_v25  ;;  %v2950_v31 = vmul.f32 1.442695, %v2903_v41  ;;  %v7287_v47 = vld [vmem:[#allocation48_spill] sm:$0xff] }
 0x67a   :  { %v3088_v21 = vmul.f32 %v3064_v15, %v7285_v61  ;;  %4652 = vpow2.f32 %v2948_v4  ;;  %v7293_v15 = vlaneseq  ;;  %v7294_v4 = vld [vmem:[#allocation5_spill] sm:$0xff] }
 0x67b   :  { %v3089_v54 = vmul.f32 %v3065_v11, %v7286_v46  ;;  %4654 = vpow2.f32 %v2950_v31 }
 0x67c   :  { %3946 = vmatprep.mubr.f32.mxu1 %v3088_v21  ;;  %v6815_v25 = vand.u32 127, %v7293_v15 }
 0x67d   :  { %3947 = vmatmul.mubr.f32.gmra.mxu1 %v3089_v54  ;;  %v4645_v36 = vpop.eup %4644 }
 0x67e   :  { %v3027_v5 = vrot.slane %v4645_v36, %v7246_v45  ;;  %v6819_v41 = vsub.s32 %v6815_v25, %v7294_v4 }
 0x680   :  { %v3066_v9 = vmul.f32 %v6640_v50, %v3027_v5 }
 0x682   :  { %v3090_v57 = vmul.f32 %v3066_v9, %v7287_v47 }
 0x683   :  { %v4647_v0 = vpop.eup %4646 }
 0x684   :  { %v3031_v44 = vrot.slane %v4647_v0, %v7246_v45  ;;  %v4649_v53 = vpop.eup %4648  ;;  %3949 = vmatprep.mubr.f32.mxu1 %v3090_v57 }
 0x685   :  { %v3035_v27 = vrot.slane %v4649_v53, %v7246_v45 }
 0x686   :  { %v3067_v51 = vmul.f32 %v6612_v34, %v3031_v44  ;;  %v4651_v1 = vpop.eup %4650 }
 0x687   :  { %v4653_v20 = vpop.eup %4652  ;;  %v3068_v60 = vmul.f32 %v6644_v59, %v3035_v27  ;;  %v3039_v8 = vrot.slane %v4651_v1, %v7246_v45 }
 0x688   :  { %v3091_v24 = vmul.f32 %v3067_v51, %v7288_v10  ;;  %v3043_v50 = vrot.slane %v4653_v20, %v7246_v45  ;;  %v4655_v52 = vpop.eup %4654 }
 0x689   :  { %v3092_v32 = vmul.f32 %v3068_v60, %v7289_v28  ;;  %v3069_v48 = vmul.f32 %v6621_v63, %v3039_v8  ;;  %v3047_v17 = vrot.slane %v4655_v52, %v7246_v45 }
 0x68a   :  { %3950 = vmatmul.mubr.f32.gmra.mxu1 %v3091_v24  ;;  %v3070_v34 = vmul.f32 %v6648_v13, %v3043_v50 }
 0x68b   :  { %3952 = vmatprep.mubr.f32.mxu1 %v3092_v32  ;;  %v3093_v30 = vmul.f32 %v3069_v48, %v7290_v37  ;;  %v3071_v59 = vmul.f32 %v6637_v6, %v3047_v17 }
 0x68c   :  { %v3094_v3 = vmul.f32 %v3070_v34, %v7291_v49 }
 0x68d   :  { %v3095_v16 = vmul.f32 %v3071_v59, %v7292_v22 }
 0x68e   :  { %3953 = vmatmul.mubr.f32.gmra.mxu1 %v3093_v30 }
 0x68f   :  { %3955 = vmatprep.mubr.f32.mxu1 %v3094_v3 }
 0x692   :  { %3956 = vmatmul.mubr.f32.gmra.mxu1 %v3095_v16 }
 0x705   :  { %v3924_v38 = vpop.f32.mrf.mxu1 }
 0x706   :  { %3309 = vperm.xlu0 %4414, %v3924_v38  }
 0x707   :  { %v3162_v29 = vpop.f32.mrf.mxu1 }
 0x708   :  { %3306 = vperm.xlu1 %4415, %v3162_v29  }
 0x70b   :  { %v3927_v63 = vpop.f32.mrf.mxu1 }
 0x70c   :  { %3315 = vperm.xlu1 %4415, %v3927_v63  }
 0x70d   :  { %v3172_v13 = vpop.f32.mrf.mxu1 }
 0x710   :  { %3312 = vperm.xlu1 %4415, %v3172_v13  }
 0x711   :  { %v3930_v45 = vpop.f32.mrf.mxu1 }
 0x713   :  { %v3182_v55 = vpop.f32.mrf.mxu1 }
 0x714   :  { %3318 = vperm.xlu0 %4414, %v3182_v55   ;;  %3321 = vperm.xlu1 %4415, %v3930_v45  }
 0x715   :  { %v3933_v62 = vpop.f32.mrf.mxu1 }
 0x717   :  { %v3192_v33 = vpop.f32.mrf.mxu1 }
 0x718   :  { %3324 = vperm.xlu0 %4414, %v3192_v33   ;;  %3327 = vperm.xlu1 %4415, %v3933_v62  }
 0x719   :  { %v3936_v6 = vpop.f32.mrf.mxu1 }
 0x71b   :  { %v3202_v43 = vpop.f32.mrf.mxu1 }
 0x71c   :  { %3333 = vperm.xlu0 %4414, %v3936_v6   ;;  %3330 = vperm.xlu1 %4415, %v3202_v43  }
 0x71d   :  { %v3939_v19 = vpop.f32.mrf.mxu1 }
 0x71f   :  { %v3212_v40 = vpop.f32.mrf.mxu1 }
 0x720   :  { %3339 = vperm.xlu0 %4414, %v3939_v19  }
 0x723   :  { %v3942_v56 = vpop.f32.mrf.mxu1 }
 0x724   :  { %3336 = vperm.xlu0 %4414, %v3212_v40  }
 0x725   :  { %v3222_v35 = vpop.f32.mrf.mxu1 }
 0x726   :  { %3342 = vperm.xlu1 %4415, %v3222_v35  }
 0x728   :  { %3345 = vperm.xlu0 %4414, %v3942_v56  }
 0x731   :  { %v3945_v26 = vpop.f32.mrf.mxu1 }
 0x732   :  { %3351 = vperm.xlu0 %4414, %v3945_v26  }
 0x733   :  { %v3232_v39 = vpop.f32.mrf.mxu1 }
 0x734   :  { %3348 = vperm.xlu1 %4415, %v3232_v39  }
 0x73d   :  { %v3948_v2 = vpop.f32.mrf.mxu1 }
 0x73e   :  { %3357 = vperm.xlu0 %4414, %v3948_v2  }
 0x73f   :  { %v3242_v18 = vpop.f32.mrf.mxu1 }
 0x740   :  { %3354 = vperm.xlu1 %4415, %v3242_v18  }
 0x74a   :  { %v3951_v23 = vpop.f32.mrf.mxu1 }
 0x74b   :  { %3363 = vperm.xlu0 %4414, %v3951_v23  }
 0x74c   :  { %v3252_v7 = vpop.f32.mrf.mxu1 }
 0x74d   :  { %3360 = vperm.xlu1 %4415, %v3252_v7  }
 0x74e   :  { %v3954_v42 = vpop.f32.mrf.mxu1 }
 0x74f   :  { %3369 = vperm.xlu0 %4414, %v3954_v42  }
 0x750   :  { %v3262_v58 = vpop.f32.mrf.mxu1 }
 0x751   :  { %3366 = vperm.xlu1 %4415, %v3262_v58  }
 0x752   :  { %v3957_v14 = vpop.f32.mrf.mxu1 }
 0x753   :  { %3375 = vperm.xlu0 %4414, %v3957_v14  }
 0x754   :  { %v3272_v12 = vpop.f32.mrf.mxu1 }
 0x755   :  { %3372 = vperm.xlu1 %4415, %v3272_v12  }
 0x781   :  { %v3310_v21 = vpop.permute.xlu0 %3309 }
 0x782   :  { %v3386_v54 = vrot.slane %v3310_v21, %v6819_v41 }
 0x783   :  { %v3307_v11 = vpop.permute.xlu1 %3306 }
 0x784   :  { %v3382_v46 = vrot.slane %v3307_v11, %v6819_v41 }
 0x786   :  { %v3476_v5 = vsel %vm3475_vm1, %v3386_v54, %v3382_v46 }
 0x787   :  { %v3316_v61 = vpop.permute.xlu1 %3315 }
 0x788   :  { %v3394_v9 = vrot.slane %v3316_v61, %v6819_v41 }
 0x78b   :  { %v3313_v31 = vpop.permute.xlu1 %3312 }
 0x78c   :  { %v3390_v36 = vrot.slane %v3313_v31, %v6819_v41 }
 0x78e   :  { %v3478_v0 = vsel %vm3477_vm2, %v3390_v36, %v3476_v5 }
 0x78f   :  { %v3319_v47 = vpop.permute.xlu0 %3318  ;;  %v3322_v57 = vpop.permute.xlu1 %3321  ;;  %v3480_v53 = vsel %vm3479_vm3, %v3394_v9, %v3478_v0 }
 0x790   :  { %v3398_v44 = vrot.slane %v3319_v47, %v6819_v41  ;;  %v3402_v27 = vrot.slane %v3322_v57, %v6819_v41  ;;  %v3525_v57 = vadd.s32 4294967288, %v6815_v25 }
 0x792   :  { %v3482_v51 = vsel %vm3481_vm4, %v3398_v44, %v3480_v53 }
 0x793   :  { %v3325_v1 = vpop.permute.xlu0 %3324  ;;  %v3328_v20 = vpop.permute.xlu1 %3327  ;;  %v3484_v60 = vsel %vm3483_vm5, %v3402_v27, %v3482_v51  ;;  %v3532_v51 = vadd.s32 4294967280, %v6815_v25  ;;  %v3528_v27 = vsub.s32 %v3525_v57, %v7294_v4 }
 0x794   :  { %v3406_v10 = vrot.slane %v3325_v1, %v6819_v41  ;;  %v3410_v24 = vrot.slane %v3328_v20, %v6819_v41 }
 0x796   :  { %v3486_v8 = vsel %vm3485_vm6, %v3406_v10, %v3484_v60  ;;  %v3535_v10 = vsub.s32 %v3532_v51, %v7294_v4 }
 0x797   :  { %v3334_v50 = vpop.permute.xlu0 %3333  ;;  %v3488_v52 = vsel %vm3487_vm7, %v3410_v24, %v3486_v8  ;;  %v3331_v48 = vpop.permute.xlu1 %3330 }
 0x798   :  { %v3506_v28 = vsel %vm43_vm0, %v3488_v52, 0.0  ;;  %v3418_v17 = vrot.slane %v3334_v50, %v6819_v41  ;;  %v3414_v37 = vrot.slane %v3331_v48, %v6819_v41 }
 0x799   :  { %3507 = vadd.xlane.f32.xlu1 %v3506_v28 }
 0x79a   :  { %v3489_v49 = vsel %vm3475_vm1, %v3418_v17, %v3414_v37 }
 0x79b   :  { %v3340_v32 = vpop.permute.xlu0 %3339 }
 0x79c   :  { %v3426_v59 = vrot.slane %v3340_v32, %v6819_v41 }
 0x79f   :  { %v3337_v34 = vpop.permute.xlu0 %3336 }
 0x7a0   :  { %v3422_v30 = vrot.slane %v3337_v34, %v6819_v41 }
 0x7a1   :  { %v3343_v22 = vpop.permute.xlu1 %3342 }
 0x7a2   :  { %v3490_v3 = vsel %vm3477_vm2, %v3422_v30, %v3489_v49  ;;  %v3430_v29 = vrot.slane %v3343_v22, %v6819_v41 }
 0x7a3   :  { %v3346_v16 = vpop.permute.xlu0 %3345  ;;  %v3491_v38 = vsel %vm3479_vm3, %v3426_v59, %v3490_v3 }
 0x7a4   :  { %v3434_v63 = vrot.slane %v3346_v16, %v6819_v41  ;;  %v3492_v13 = vsel %vm3481_vm4, %v3430_v29, %v3491_v38 }
 0x7a6   :  { %v3493_v55 = vsel %vm3483_vm5, %v3434_v63, %v3492_v13 }
 0x7ad   :  { %v3352_v45 = vpop.permute.xlu0 %3351 }
 0x7ae   :  { %v3442_v33 = vrot.slane %v3352_v45, %v6819_v41 }
 0x7af   :  { %v3349_v62 = vpop.permute.xlu1 %3348 }
 0x7b0   :  { %v3438_v6 = vrot.slane %v3349_v62, %v6819_v41 }
 0x7b2   :  { %v3494_v43 = vsel %vm3485_vm6, %v3438_v6, %v3493_v55 }
 0x7b3   :  { %v3495_v19 = vsel %vm3487_vm7, %v3442_v33, %v3494_v43 }
 0x7b4   :  { %v3509_v40 = vsel %vm43_vm0, %v3495_v19, 0.0 }
 0x7b5   :  { %3510 = vadd.xlane.f32.xlu0 %v3509_v40 }
 0x7b9   :  { %v3358_v56 = vpop.permute.xlu0 %3357 }
 0x7ba   :  { %v3450_v26 = vrot.slane %v3358_v56, %v6819_v41 }
 0x7bb   :  { %v3355_v35 = vpop.permute.xlu1 %3354 }
 0x7bc   :  { %v3446_v39 = vrot.slane %v3355_v35, %v6819_v41 }
 0x7be   :  { %v3496_v18 = vsel %vm3475_vm1, %v3450_v26, %v3446_v39 }
 0x7c6   :  { %v3364_v2 = vpop.permute.xlu0 %3363 }
 0x7c7   :  { %v3458_v7 = vrot.slane %v3364_v2, %v6819_v41 }
 0x7c8   :  { %v3361_v23 = vpop.permute.xlu1 %3360 }
 0x7c9   :  { %v3454_v42 = vrot.slane %v3361_v23, %v6819_v41 }
 0x7ca   :  { %v3370_v58 = vpop.permute.xlu0 %3369 }
 0x7cb   :  { %v3497_v14 = vsel %vm3477_vm2, %v3454_v42, %v3496_v18  ;;  %v3466_v11 = vrot.slane %v3370_v58, %v6819_v41 }
 0x7cc   :  { %v3498_v12 = vsel %vm3479_vm3, %v3458_v7, %v3497_v14  ;;  %v3367_v15 = vpop.permute.xlu1 %3366 }
 0x7cd   :  { %v3462_v61 = vrot.slane %v3367_v15, %v6819_v41 }
 0x7ce   :  { %v3376_v21 = vpop.permute.xlu0 %3375 }
 0x7cf   :  { %v3499_v46 = vsel %vm3481_vm4, %v3462_v61, %v3498_v12  ;;  %v3474_v36 = vrot.slane %v3376_v21, %v6819_v41 }
 0x7d0   :  { %v3500_v54 = vsel %vm3483_vm5, %v3466_v11, %v3499_v46  ;;  %v3373_v31 = vpop.permute.xlu1 %3372 }
 0x7d1   :  { %v3470_v5 = vrot.slane %v3373_v31, %v6819_v41 }
 0x7d3   :  { %v3501_v9 = vsel %vm3485_vm6, %v3470_v5, %v3500_v54 }
 0x7d4   :  { %v3502_v0 = vsel %vm3487_vm7, %v3474_v36, %v3501_v9 }
 0x7d5   :  { %v3512_v47 = vsel %vm43_vm0, %v3502_v0, 0.0 }
 0x7d6   :  { %3513 = vadd.xlane.f32.xlu0 %v3512_v47 }
 0x822   :  { %v3508_v53 = vpop.xlane.xlu1 %3507 }
 0x823   :  { %v3515_v20 = vmul.f32 -0.01, %v3508_v53 }
 0x825   :  { %v3524_v50 = vrot.slane %v3515_v20, %v6819_v41 }
 0x83e   :  { %v3511_v44 = vpop.xlane.xlu0 %3510 }
 0x83f   :  { %v3516_v1 = vmul.f32 -0.01, %v3511_v44 }
 0x841   :  { %v3529_v24 = vrot.slane %v3516_v1, %v3528_v27 }
 0x843   :  { %v3531_v28 = vsel %vm3530_vm8, %v3529_v24, %v3524_v50 }
 0x85f   :  { %v3514_v60 = vpop.xlane.xlu0 %3513 }
 0x860   :  { %v3517_v8 = vmul.f32 -0.01, %v3514_v60 }
 0x862   :  { %v3536_v52 = vrot.slane %v3517_v8, %v3535_v10 }
 0x864   :  { %v3538_v25 = vsel %vm3537_vm9, %v3536_v52, %v3531_v28 }
 0x865   :  { %3541 = vst.msk [vmem:[#allocation2] sm:$0x1] %vm3540_vm10, %v3538_v25 }
 0x866   :  { %4667 = shalt.err (!%p4664_p5)
}
 0x867   :  { %3551 = dma.vmem_to_hbm [thread:$0]  %s3549_s8, 16, %s6881_s4, [#allocation3]  }
 0x868   :  { %4776 = dma.done.wait [#allocation3], 16  }
 0x869   :  { %4777 = vsyncadd [#allocation3], 4294967280 }
 0x86a   :  { %3555 = vsyncpa [#allocation3], 1 }

</bundles_post_ra>
